<compile_context>
chip_gen: v5e
topology: v5e:2x2
jax: 0.10.0
libtpu: 0.0.40
codegen_flags: <defaults>
</compile_context>

<pallas_src>
import functools

import jax
import jax.numpy as jnp
from jax.experimental import pallas as pl
from jax.experimental.pallas import tpu as pltpu


def _vmem_limit_bytes():
    """Per-generation VMEM limit: ~3/4 of physical capacity, capped at 100 MiB."""
    try:
        info = pltpu.get_tpu_info()
        cap = getattr(info, "vmem_capacity_bytes", None)
        if cap:
            return int(min(cap * 3 // 4, 100 * 1024 * 1024))
    except Exception:
        pass
    return 48 * 1024 * 1024  # conservative fallback (safe inside v7x's 64 MiB)


@functools.partial(jax.jit,
                   static_argnames=("kernel", "stride", "padding", "activate"))
def conv_bn_forward(x_nchw, weight, gamma, beta, running_mean, running_var, *,
                    kernel, stride, padding, eps=1e-5, activate="relu6"):
    """Fused Conv2d(bias=False) + BatchNorm2d(eval) + ReLU6/LeakyReLU(0.1).

    x_nchw: [N, Cin, H, W]; weight: [Cout, Cin, KH, KW] (PyTorch layouts).
    Returns NCHW bf16 (bf16 operands / f32 accumulation inside the kernel).
    """
    if activate not in ("relu6", "leaky"):
        raise AttributeError("activate type not supported")

    Cout, Cin, KH, KW = weight.shape
    assert KH == kernel and KW == kernel
    N, _, H, W = x_nchw.shape
    SH = SW = stride
    Hp, Wp = H + 2 * padding, W + 2 * padding
    OH = (Hp - KH) // SH + 1
    OW = (Wp - KW) // SW + 1
    M = OH * OW
    K = KH * KW * Cin

    # ---- wrapper-side prep (cheap XLA passes, all at bf16 width) ------------
    x = x_nchw.astype(jnp.bfloat16)                    # cast first: bf16 transpose/pad
    x = jnp.transpose(x, (0, 2, 3, 1))                 # NCHW -> NHWC
    x = jnp.pad(x, ((0, 0), (padding, padding), (padding, padding), (0, 0)))

    if SH > 1 or SW > 1:
        # Phase split: fold the SHxSW stride phases into the channel dim
        # (same total bytes, no duplication) so in-kernel slices are dense.
        Hq, Wq = -(-Hp // SH), -(-Wp // SW)
        x = jnp.pad(x, ((0, 0), (0, Hq * SH - Hp), (0, Wq * SW - Wp), (0, 0)))
        x = x.reshape(N, Hq, SH, Wq, SW, Cin)
        x = jnp.transpose(x, (0, 1, 3, 2, 4, 5))       # (N, Hq, Wq, SH, SW, Cin)
        x = x.reshape(N, Hq, Wq, SH * SW * Cin)
    else:
        Hq, Wq = Hp, Wp
    G = x.shape[-1]

    # Fold eval-mode BatchNorm into the conv weight / per-channel bias:
    #   y = (conv(x, W) - mean) * gamma/sqrt(var+eps) + beta
    #     = conv(x, W * scale) + (beta - mean * scale)
    scale = gamma / jnp.sqrt(running_var + eps)                      # [Cout]
    bias = beta - running_mean * scale                               # [Cout]
    w = weight.astype(jnp.float32) * scale[:, None, None, None]
    w = jnp.transpose(w, (0, 2, 3, 1)).reshape(Cout, K)              # [Cout, KH*KW*Cin]
    w = w.astype(jnp.bfloat16)
    b = bias.reshape(Cout, 1).astype(jnp.float32)

    leaky_slope = 0.1  # module spec uses nn.LeakyReLU(0.1)

    # ---- Pallas kernel -------------------------------------------------------
    def kernel_fn(x_ref, w_ref, b_ref, o_ref, patch_ref):
        # x_ref:     (Hq, Wq, G)  bf16   padded (phase-split) NHWC image
        # w_ref:     (Cout, K)    bf16   BN-folded weight
        # b_ref:     (Cout, 1)    f32    BN-folded bias
        # o_ref:     (Cout, M)    bf16   output, spatial dim lane-dense
        # patch_ref: (M, K)       bf16   VMEM im2col patch matrix (never in HBM)
        for kh in range(KH):
            for kw in range(KW):
                r, s = kh // SH, kw // SW
                g0 = ((kh % SH) * SW + (kw % SW)) * Cin
                win = x_ref[r:r + OH, s:s + OW, g0:g0 + Cin]         # (OH, OW, Cin)
                k0 = (kh * KW + kw) * Cin
                patch_ref[:, k0:k0 + Cin] = win.reshape(M, Cin)
        # One merged contraction over K = KH*KW*Cin (f32 accumulation); result
        # already oriented (Cout, M) so stores are full-lane and no transpose
        # epilogue is needed.
        y = jax.lax.dot_general(
            w_ref[...], patch_ref[...],
            dimension_numbers=(((1,), (1,)), ((), ())),
            preferred_element_type=jnp.float32)                      # (Cout, M)
        y = y + b_ref[...]
        if activate == "relu6":
            y = jnp.clip(y, 0.0, 6.0)
        else:  # leaky
            y = jnp.where(y > 0, y, leaky_slope * y)
        o_ref[...] = y.astype(o_ref.dtype)

    cost = pl.CostEstimate(
        flops=2 * N * M * K * Cout,
        transcendentals=0,
        bytes_accessed=(N * Hq * Wq * G * 2 + Cout * K * 2 + Cout * 4
                        + N * Cout * M * 2))

    out = pl.pallas_call(
        kernel_fn,
        out_shape=jax.ShapeDtypeStruct((N, Cout, M), jnp.bfloat16),
        grid_spec=pltpu.PrefetchScalarGridSpec(
            num_scalar_prefetch=0,
            grid=(N,),   # batch-parallel; shards across v7x's two TensorCores
            in_specs=[
                pl.BlockSpec((pl.Squeezed(), Hq, Wq, G), lambda n: (n, 0, 0, 0)),
                pl.BlockSpec((Cout, K), lambda n: (0, 0)),
                pl.BlockSpec((Cout, 1), lambda n: (0, 0)),
            ],
            out_specs=pl.BlockSpec((pl.Squeezed(), Cout, M), lambda n: (n, 0, 0)),
            scratch_shapes=[pltpu.VMEM((M, K), jnp.bfloat16)],
        ),
        compiler_params=pltpu.CompilerParams(
            dimension_semantics=("parallel",),
            vmem_limit_bytes=_vmem_limit_bytes(),
        ),
        cost_estimate=cost,
    )(x, w, b)

    # (N, Cout, OH*OW) -> (N, Cout, OH, OW): already NCHW, no transpose pass.
    return out.reshape(N, Cout, OH, OW)


if __name__ == "__main__":
    # Module config: conv_bn(inp=4, oup=8, kernel=3, stride=1, padding=1, 'relu6')
    N, Cin, H, W = 2, 4, 16, 16
    Cout, kernel, stride, padding = 8, 3, 1, 1

    key = jax.random.PRNGKey(0)
    k_x, k_w, k_g, k_b, k_m, k_v = jax.random.split(key, 6)

    x = jax.random.normal(k_x, (N, Cin, H, W), dtype=jnp.float32)
    weight = 0.1 * jax.random.normal(k_w, (Cout, Cin, kernel, kernel), dtype=jnp.float32)
    gamma = 1.0 + 0.1 * jax.random.normal(k_g, (Cout,), dtype=jnp.float32)
    beta = 0.1 * jax.random.normal(k_b, (Cout,), dtype=jnp.float32)
    running_mean = 0.1 * jax.random.normal(k_m, (Cout,), dtype=jnp.float32)
    running_var = jnp.abs(1.0 + 0.1 * jax.random.normal(k_v, (Cout,), dtype=jnp.float32))

    eps = 1e-5
    scale = gamma / jnp.sqrt(running_var + eps)
    bias = beta - running_mean * scale

    def ref_conv(x_in, w_in, s):
        return jax.lax.conv_general_dilated(
            x_in, w_in, window_strides=(s, s),
            padding=((padding, padding), (padding, padding)),
            dimension_numbers=("NCHW", "OIHW", "NCHW"))

    # Operand-matched inputs (bf16-rounded operands, f32 math).
    x_q = x.astype(jnp.bfloat16).astype(jnp.float32)
    w_q = (weight * scale[:, None, None, None]).astype(jnp.bfloat16).astype(jnp.float32)

    # --- relu6, stride 1 ------------------------------------------------------
    out = conv_bn_forward(x, weight, gamma, beta, running_mean, running_var,
                          kernel=kernel, stride=stride, padding=padding,
                          activate="relu6")
    out = jax.block_until_ready(out).astype(jnp.float32)
    assert out.shape == (N, Cout, H, W)

    # Reference 1: pure f32 module semantics (loose tol covers bf16 operands/output).
    ref_f32 = jnp.clip(ref_conv(x, weight, 1) * scale[None, :, None, None]
                       + bias[None, :, None, None], 0.0, 6.0)
    assert jnp.allclose(out, ref_f32, atol=1e-1, rtol=1e-1)

    # Reference 2: operand-matched (tol covers f32-accumulation order + bf16 output).
    ref_q = jnp.clip(ref_conv(x_q, w_q, 1) + bias[None, :, None, None], 0.0, 6.0)
    assert jnp.allclose(out, ref_q, atol=2e-2, rtol=2e-2)

    # --- leaky, stride 1 ------------------------------------------------------
    out_l = conv_bn_forward(x, weight, gamma, beta, running_mean, running_var,
                            kernel=kernel, stride=stride, padding=padding,
                            activate="leaky")
    out_l = jax.block_until_ready(out_l).astype(jnp.float32)
    conv_l = ref_conv(x_q, w_q, 1) + bias[None, :, None, None]
    ref_l = jnp.where(conv_l > 0, conv_l, 0.1 * conv_l)
    assert jnp.allclose(out_l, ref_l, atol=2e-2, rtol=2e-2)

    # --- relu6, stride 2 (exercises the wrapper phase-split path) -------------
    out_s2 = conv_bn_forward(x, weight, gamma, beta, running_mean, running_var,
                             kernel=kernel, stride=2, padding=padding,
                             activate="relu6")
    out_s2 = jax.block_until_ready(out_s2).astype(jnp.float32)
    assert out_s2.shape == (N, Cout, H // 2, W // 2)
    ref_s2 = jnp.clip(ref_conv(x_q, w_q, 2) + bias[None, :, None, None], 0.0, 6.0)
    assert jnp.allclose(out_s2, ref_s2, atol=2e-2, rtol=2e-2)

    print("KERNEL_OK")
</pallas_src>

<mosaic_0001>
module attributes {stable_mosaic.version = 11 : i64} {
  func.func @kernel_fn(%arg0: i32, %arg1: memref<1x18x18x4xbf16, #tpu.memory_space<vmem>>, %arg2: memref<8x36xbf16, #tpu.memory_space<vmem>>, %arg3: memref<8x1xf32, #tpu.memory_space<vmem>>, %arg4: memref<1x8x256xbf16, #tpu.memory_space<vmem>>, %arg5: memref<256x36xbf16, #tpu.memory_space<vmem>>) attributes {dimension_semantics = [#tpu.dimension_semantics<parallel>], iteration_bounds = array<i64: 2>, scalar_prefetch = 0 : i64, scratch_operands = 1 : i64, tpu.core_type = #tpu.core_type<tc>, window_params = [{transform_indices = @transform_0, window_bounds = array<i64: 1, 18, 18, 4>}, {pipeline_mode = #tpu.pipeline_mode<synchronous>, transform_indices = @transform_1, window_bounds = array<i64: 8, 36>}, {pipeline_mode = #tpu.pipeline_mode<synchronous>, transform_indices = @transform_2, window_bounds = array<i64: 8, 1>}, {transform_indices = @transform_3, window_bounds = array<i64: 1, 8, 256>}]} {
    %c0 = arith.constant 0 : index
    %c0_0 = arith.constant 0 : index
    %c0_1 = arith.constant 0 : index
    %c0_2 = arith.constant 0 : index
    %0 = vector.load %arg1[%c0, %c0_0, %c0_1, %c0_2] : memref<1x18x18x4xbf16, #tpu.memory_space<vmem>>, vector<1x16x16x4xbf16>
    %1 = vector.shape_cast %0 : vector<1x16x16x4xbf16> to vector<16x16x4xbf16>
    %2 = vector.shape_cast %1 : vector<16x16x4xbf16> to vector<256x4xbf16>
    %c0_3 = arith.constant 0 : index
    %c0_4 = arith.constant 0 : index
    %3 = vector.load %arg5[%c0_3, %c0_4] : memref<256x36xbf16, #tpu.memory_space<vmem>>, vector<256x4xbf16>
    tpu.vector_store %arg5[%c0_3, %c0_4], %2 {strides = array<i32>} : memref<256x36xbf16, #tpu.memory_space<vmem>>, vector<256x4xbf16>,
    %c0_5 = arith.constant 0 : index
    %c0_6 = arith.constant 0 : index
    %c1 = arith.constant 1 : index
    %c0_7 = arith.constant 0 : index
    %4 = vector.load %arg1[%c0_5, %c0_6, %c1, %c0_7] : memref<1x18x18x4xbf16, #tpu.memory_space<vmem>>, vector<1x16x16x4xbf16>
    %5 = vector.shape_cast %4 : vector<1x16x16x4xbf16> to vector<16x16x4xbf16>
    %6 = vector.shape_cast %5 : vector<16x16x4xbf16> to vector<256x4xbf16>
    %c0_8 = arith.constant 0 : index
    %c4 = arith.constant 4 : index
    %7 = vector.load %arg5[%c0_8, %c4] : memref<256x36xbf16, #tpu.memory_space<vmem>>, vector<256x4xbf16>
    tpu.vector_store %arg5[%c0_8, %c4], %6 {strides = array<i32>} : memref<256x36xbf16, #tpu.memory_space<vmem>>, vector<256x4xbf16>,
    %c0_9 = arith.constant 0 : index
    %c0_10 = arith.constant 0 : index
    %c2 = arith.constant 2 : index
    %c0_11 = arith.constant 0 : index
    %8 = vector.load %arg1[%c0_9, %c0_10, %c2, %c0_11] : memref<1x18x18x4xbf16, #tpu.memory_space<vmem>>, vector<1x16x16x4xbf16>
    %9 = vector.shape_cast %8 : vector<1x16x16x4xbf16> to vector<16x16x4xbf16>
    %10 = vector.shape_cast %9 : vector<16x16x4xbf16> to vector<256x4xbf16>
    %c0_12 = arith.constant 0 : index
    %c8 = arith.constant 8 : index
    %11 = vector.load %arg5[%c0_12, %c8] : memref<256x36xbf16, #tpu.memory_space<vmem>>, vector<256x4xbf16>
    tpu.vector_store %arg5[%c0_12, %c8], %10 {strides = array<i32>} : memref<256x36xbf16, #tpu.memory_space<vmem>>, vector<256x4xbf16>,
    %c0_13 = arith.constant 0 : index
    %c1_14 = arith.constant 1 : index
    %c0_15 = arith.constant 0 : index
    %c0_16 = arith.constant 0 : index
    %12 = vector.load %arg1[%c0_13, %c1_14, %c0_15, %c0_16] : memref<1x18x18x4xbf16, #tpu.memory_space<vmem>>, vector<1x16x16x4xbf16>
    %13 = vector.shape_cast %12 : vector<1x16x16x4xbf16> to vector<16x16x4xbf16>
    %14 = vector.shape_cast %13 : vector<16x16x4xbf16> to vector<256x4xbf16>
    %c0_17 = arith.constant 0 : index
    %c12 = arith.constant 12 : index
    %15 = vector.load %arg5[%c0_17, %c12] : memref<256x36xbf16, #tpu.memory_space<vmem>>, vector<256x4xbf16>
    tpu.vector_store %arg5[%c0_17, %c12], %14 {strides = array<i32>} : memref<256x36xbf16, #tpu.memory_space<vmem>>, vector<256x4xbf16>,
    %c0_18 = arith.constant 0 : index
    %c1_19 = arith.constant 1 : index
    %c1_20 = arith.constant 1 : index
    %c0_21 = arith.constant 0 : index
    %16 = vector.load %arg1[%c0_18, %c1_19, %c1_20, %c0_21] : memref<1x18x18x4xbf16, #tpu.memory_space<vmem>>, vector<1x16x16x4xbf16>
    %17 = vector.shape_cast %16 : vector<1x16x16x4xbf16> to vector<16x16x4xbf16>
    %18 = vector.shape_cast %17 : vector<16x16x4xbf16> to vector<256x4xbf16>
    %c0_22 = arith.constant 0 : index
    %c16 = arith.constant 16 : index
    %19 = vector.load %arg5[%c0_22, %c16] : memref<256x36xbf16, #tpu.memory_space<vmem>>, vector<256x4xbf16>
    tpu.vector_store %arg5[%c0_22, %c16], %18 {strides = array<i32>} : memref<256x36xbf16, #tpu.memory_space<vmem>>, vector<256x4xbf16>,
    %c0_23 = arith.constant 0 : index
    %c1_24 = arith.constant 1 : index
    %c2_25 = arith.constant 2 : index
    %c0_26 = arith.constant 0 : index
    %20 = vector.load %arg1[%c0_23, %c1_24, %c2_25, %c0_26] : memref<1x18x18x4xbf16, #tpu.memory_space<vmem>>, vector<1x16x16x4xbf16>
    %21 = vector.shape_cast %20 : vector<1x16x16x4xbf16> to vector<16x16x4xbf16>
    %22 = vector.shape_cast %21 : vector<16x16x4xbf16> to vector<256x4xbf16>
    %c0_27 = arith.constant 0 : index
    %c20 = arith.constant 20 : index
    %23 = vector.load %arg5[%c0_27, %c20] : memref<256x36xbf16, #tpu.memory_space<vmem>>, vector<256x4xbf16>
    tpu.vector_store %arg5[%c0_27, %c20], %22 {strides = array<i32>} : memref<256x36xbf16, #tpu.memory_space<vmem>>, vector<256x4xbf16>,
    %c0_28 = arith.constant 0 : index
    %c2_29 = arith.constant 2 : index
    %c0_30 = arith.constant 0 : index
    %c0_31 = arith.constant 0 : index
    %24 = vector.load %arg1[%c0_28, %c2_29, %c0_30, %c0_31] : memref<1x18x18x4xbf16, #tpu.memory_space<vmem>>, vector<1x16x16x4xbf16>
    %25 = vector.shape_cast %24 : vector<1x16x16x4xbf16> to vector<16x16x4xbf16>
    %26 = vector.shape_cast %25 : vector<16x16x4xbf16> to vector<256x4xbf16>
    %c0_32 = arith.constant 0 : index
    %c24 = arith.constant 24 : index
    %27 = vector.load %arg5[%c0_32, %c24] : memref<256x36xbf16, #tpu.memory_space<vmem>>, vector<256x4xbf16>
    tpu.vector_store %arg5[%c0_32, %c24], %26 {strides = array<i32>} : memref<256x36xbf16, #tpu.memory_space<vmem>>, vector<256x4xbf16>,
    %c0_33 = arith.constant 0 : index
    %c2_34 = arith.constant 2 : index
    %c1_35 = arith.constant 1 : index
    %c0_36 = arith.constant 0 : index
    %28 = vector.load %arg1[%c0_33, %c2_34, %c1_35, %c0_36] : memref<1x18x18x4xbf16, #tpu.memory_space<vmem>>, vector<1x16x16x4xbf16>
    %29 = vector.shape_cast %28 : vector<1x16x16x4xbf16> to vector<16x16x4xbf16>
    %30 = vector.shape_cast %29 : vector<16x16x4xbf16> to vector<256x4xbf16>
    %c0_37 = arith.constant 0 : index
    %c28 = arith.constant 28 : index
    %31 = vector.load %arg5[%c0_37, %c28] : memref<256x36xbf16, #tpu.memory_space<vmem>>, vector<256x4xbf16>
    tpu.vector_store %arg5[%c0_37, %c28], %30 {strides = array<i32>} : memref<256x36xbf16, #tpu.memory_space<vmem>>, vector<256x4xbf16>,
    %c0_38 = arith.constant 0 : index
    %c2_39 = arith.constant 2 : index
    %c2_40 = arith.constant 2 : index
    %c0_41 = arith.constant 0 : index
    %32 = vector.load %arg1[%c0_38, %c2_39, %c2_40, %c0_41] : memref<1x18x18x4xbf16, #tpu.memory_space<vmem>>, vector<1x16x16x4xbf16>
    %33 = vector.shape_cast %32 : vector<1x16x16x4xbf16> to vector<16x16x4xbf16>
    %34 = vector.shape_cast %33 : vector<16x16x4xbf16> to vector<256x4xbf16>
    %c0_42 = arith.constant 0 : index
    %c32 = arith.constant 32 : index
    %35 = vector.load %arg5[%c0_42, %c32] : memref<256x36xbf16, #tpu.memory_space<vmem>>, vector<256x4xbf16>
    tpu.vector_store %arg5[%c0_42, %c32], %34 {strides = array<i32>} : memref<256x36xbf16, #tpu.memory_space<vmem>>, vector<256x4xbf16>,
    %c0_43 = arith.constant 0 : index
    %c0_44 = arith.constant 0 : index
    %36 = vector.load %arg2[%c0_43, %c0_44] : memref<8x36xbf16, #tpu.memory_space<vmem>>, vector<8x36xbf16>
    %c0_45 = arith.constant 0 : index
    %c0_46 = arith.constant 0 : index
    %37 = vector.load %arg5[%c0_45, %c0_46] : memref<256x36xbf16, #tpu.memory_space<vmem>>, vector<256x36xbf16>
    %cst = arith.constant dense<0.000000e+00> : vector<8x256xf32>
    %38 = tpu.matmul %36, %37, %cst {dimension_numbers = #tpu.dot_dimension_numbers<[1], [1], [0], [0], [0, 0, 1, 0], [], []>} : vector<8x36xbf16>, vector<256x36xbf16>, vector<8x256xf32> -> vector<8x256xf32>
    %c0_47 = arith.constant 0 : index
    %c0_48 = arith.constant 0 : index
    %39 = vector.load %arg3[%c0_47, %c0_48] : memref<8x1xf32, #tpu.memory_space<vmem>>, vector<8x1xf32>
    %40 = vector.broadcast %39 : vector<8x1xf32> to vector<8x256xf32>
    %41 = arith.addf %38, %40 : vector<8x256xf32>
    %cst_49 = arith.constant 0.000000e+00 : f32
    %cst_50 = arith.constant 6.000000e+00 : f32
    %42 = vector.broadcast %cst_49 : f32 to vector<8x256xf32>
    %43 = arith.maximumf %42, %41 : vector<8x256xf32>
    %44 = vector.broadcast %cst_50 : f32 to vector<8x256xf32>
    %45 = arith.minimumf %44, %43 : vector<8x256xf32>
    %46 = arith.truncf %45 : vector<8x256xf32> to vector<8x256xbf16>
    %c0_51 = arith.constant 0 : index
    %c0_52 = arith.constant 0 : index
    %c0_53 = arith.constant 0 : index
    %47 = vector.load %arg4[%c0_51, %c0_52, %c0_53] : memref<1x8x256xbf16, #tpu.memory_space<vmem>>, vector<1x8x256xbf16>
    %48 = vector.shape_cast %47 : vector<1x8x256xbf16> to vector<8x256xbf16>
    %49 = vector.shape_cast %46 : vector<8x256xbf16> to vector<1x8x256xbf16>
    tpu.vector_store %arg4[%c0_51, %c0_52, %c0_53], %49 {strides = array<i32>} : memref<1x8x256xbf16, #tpu.memory_space<vmem>>, vector<1x8x256xbf16>,
    return
  }
  func.func @transform_0(%arg0: i32) -> (i32, i32, i32, i32) {
    %c0_i32 = arith.constant 0 : i32
    %c0_i32_0 = arith.constant 0 : i32
    %c0_i32_1 = arith.constant 0 : i32
    %c0_i32_2 = arith.constant 0 : i32
    return %arg0, %c0_i32, %c0_i32_0, %c0_i32_1 : i32, i32, i32, i32
  }
  func.func @transform_1(%arg0: i32) -> (i32, i32) {
    %c0_i32 = arith.constant 0 : i32
    %c0_i32_0 = arith.constant 0 : i32
    %c0_i32_1 = arith.constant 0 : i32
    return %c0_i32, %c0_i32_0 : i32, i32
  }
  func.func @transform_2(%arg0: i32) -> (i32, i32) {
    %c0_i32 = arith.constant 0 : i32
    %c0_i32_0 = arith.constant 0 : i32
    %c0_i32_1 = arith.constant 0 : i32
    return %c0_i32, %c0_i32_0 : i32, i32
  }
  func.func @transform_3(%arg0: i32) -> (i32, i32, i32) {
    %c0_i32 = arith.constant 0 : i32
    %c0_i32_0 = arith.constant 0 : i32
    %c0_i32_1 = arith.constant 0 : i32
    return %arg0, %c0_i32, %c0_i32_0 : i32, i32, i32
  }
}

</mosaic_0001>

<bundles_post_ra>
// kernel: conv_bn_forward.1
= control target key start
LH: loop header
LB: loop body
LE: loop exit
PB: predicated region body
PF: predicated region fallthrough
CT: control target
= control target key end

     0   :  { %s4036_s12 = smov 0   ;;  %s5567_s0 = inlined_call_operand.vmem [shape: bf16[2,18,18,4], index: 0, kind: input, shape index: {}]   ;;  %s5568_s1 = inlined_call_operand.vmem [shape: bf16[8,36], index: 1, kind: input, shape index: {}]   ;;  %s5569_s2 = inlined_call_operand.vmem [shape: f32[8,1], index: 2, kind: input, shape index: {}]   ;;  %s5570_s3 = inlined_call_operand.vmem [shape: bf16[2,8,256], index: 3, kind: output, shape index: {}]  }
   0x1 LB: > { %s3582_s13 = sadd.s32 4294967295, %s4005_s12   ;;  %p3586_p0 = scmp.ge.s32.totalorder %s4005_s12, 1  ;;  %s4005_s12 = sphi %s4036_s12, %s13_s12  }
   0x2   : > { %p137_p1 = scmp.lt.s32.totalorder %s4005_s12, 3 }
   0x4   : > { %p138_p2 = pnand %p3586_p0, %p137_p1 }
   0x5   : > { %p161_p3 = scmp.lt.s32.totalorder (!%p138_p2), %s3582_s13, 1  ;;  %s4007_s18 = smov (!%p138_p2), 4  }
   0x6   : > { %141 = sbr.rel (%p138_p2) target bundleno = 972 (0x3cc), region = 32  ;;  %s4008_s19 = smov (!%p138_p2), 8  }
   0x7   : > { %s4009_s20 = smov (!%p138_p2), 12   ;;  %s4010_s21 = smov (!%p138_p2), 16  }
   0x8   : > { %s4011_s22 = smov (!%p138_p2), 20   ;;  %s4012_s23 = smov (!%p138_p2), 24  }
   0x9   : > { %s4013_s24 = smov (!%p138_p2), 28   ;;  %s4014_s25 = smov (!%p138_p2), 32  }
   0xb   : > { %s5576_s13 = smov (!%p161_p3, %s3582_s13), 1  ;;  %vm284_vm0 = vsmask.f32 3328  ;;  %vm285_vm1 = vsmask.f32 7440  ;;  %vm896_vm3 = vcmask 1042432  }
   0xc   : > { %s3979_s14 = smul.u32 216, %s5576_s13  ;;  %vm4061_vm2 = vmor %vm284_vm0, %vm285_vm1  ;;  %vm897_vm4 = vcmask 1046532   ;;  %vm203_vm6 = vcmask 27648   ;;  %vm767_vm7 = vcmask 60448   ;;  %vm1107_vm8 = vcmask 93248   ;;  %s3962_s30 = sshll.u32 %s5576_s13, 3 }
   0xd   : > { %vm4251_vm5 = vmor %vm896_vm3, %vm897_vm4  ;;  %vm1301_vm9 = vcmask 126048   ;;  %vm1862_vm10 = vcmask 158848   ;;  %vm2199_vm11 = vcmask 191648   ;;  %vm2393_vm12 = vcmask 224448   ;;  %s170_s6 = scalar_lea.vmem %s5570_s3, %s3962_s30 }
   0xe   : > { %s4050_s17 = scalar_lea.vmem %s5567_s0, %s3979_s14  ;;  %vm2954_vm13 = vcmask 257248   ;;  %vm3291_vm14 = vcmask 290048   ;;  %vm3443_vm15 = vcmask 293888  }
   0xf   : > { %v239_v0 = vld [vmem:[%s4050_s17 + $0xc] sm:$0xf]  ;;  %v240_v1 = vld [vmem:[%s4050_s17 + $0x10] sm:$0xf]  ;;  %v236_v2 = vld [vmem:[%s4050_s17] sm:$0xf] }
  0x10   : > { %v312_v3 = vshrl.u32 %v239_v0, 16  ;;  %v315_v4 = vshll.u32 %v239_v0, 16  ;;  %v321_v5 = vshll.u32 %v240_v1, 16  ;;  %v325_v6 = vshrl.u32 %v240_v1, 16  ;;  %v237_v7 = vld [vmem:[%s4050_s17 + $0x4] sm:$0xf] }
  0x11   : > { %v288_v8 = vshrl.u32 %v236_v2, 16  ;;  %v291_v9 = vshll.u32 %v236_v2, 16  ;;  %v297_v10 = vshll.u32 %v237_v7, 16  ;;  %v301_v11 = vshrl.u32 %v237_v7, 16  ;;  %v241_v16 = vld [vmem:[%s4050_s17 + $0x14] sm:$0x1] }
  0x12   : > { %v314_v12 = vrot.slane %v312_v3, 4  ;;  %v317_v13 = vrot.slane %v315_v4, 5  ;;  %v323_v14 = vrot.slane %v321_v5, 5  ;;  %v327_v15 = vrot.slane %v325_v6, 4  ;;  %v246_v20 = vld [vmem:[%s4050_s17 + $0x28] sm:$0xf] }
  0x13   : > { %v290_v17 = vrot.slane %v288_v8, 4  ;;  %v293_v18 = vrot.slane %v291_v9, 5  ;;  %v303_v19 = vrot.slane %v301_v11, 4  ;;  %v299_v22 = vrot.slane %v297_v10, 5  ;;  %v238_v24 = vld [vmem:[%s4050_s17 + $0x8] sm:$0x1] }
  0x14   : > { %v318_v21 = vor.u32 %v317_v13, %v314_v12  ;;  %v328_v23 = vor.u32 %v327_v15, %v323_v14  ;;  %v331_v27 = vshll.u32 %v241_v16, 16  ;;  %v369_v28 = vshll.u32 %v246_v20, 16  ;;  %v245_v30 = vld [vmem:[%s4050_s17 + $0x24] sm:$0xf]  ;;  %v247_v42 = vld [vmem:[%s4050_s17 + $0x2c] sm:$0x1] }
  0x15   : > { %v294_v26 = vor.u32 %v293_v18, %v290_v17  ;;  %v373_v29 = vshrl.u32 %v246_v20, 16  ;;  %v304_v33 = vor.u32 %v303_v19, %v299_v22  ;;  %v307_v34 = vshll.u32 %v238_v24, 16  ;;  %v251_v44 = vld [vmem:[%s4050_s17 + $0x3c] sm:$0xf]  ;;  %v249_v45 = vld [vmem:[%s4050_s17 + $0x34] sm:$0xf] }
  0x16   : > { %v319_v31 = vrot.slane %v318_v21, 4  ;;  %v4068_v36 = vrot.slane %v369_v28, 5  ;;  %v360_v38 = vshrl.u32 %v245_v30, 16  ;;  %v329_v40 = vrot.slane %v328_v23, 4  ;;  %v242_v50 = vld [vmem:[%s4050_s17 + $0x18] sm:$0xf] }
  0x17   : > { %v295_v32 = vrot.slane %v294_v26, 4  ;;  %v375_v37 = vrot.slane %v373_v29, 4  ;;  %v333_v41 = vrot.slane %v331_v27, 5  ;;  %v363_v43 = vshll.u32 %v245_v30, 16  ;;  %v243_v53 = vld [vmem:[%s4050_s17 + $0x1c] sm:$0xf] }
  0x18   : > { %v324_v35 = vsel %vm4061_vm2, %v319_v31, %v323_v14  ;;  %v305_v46 = vrot.slane %v304_v33, 4  ;;  %v309_v47 = vrot.slane %v307_v34, 5  ;;  %v362_v48 = vrot.slane %v360_v38, 4  ;;  %v4086_v4 = vld [vmem:[%s4050_s17 + $0x40] sm:$0xf] }
  0x19   : > { %675 = vrot.lane.b32.xlu1 %v324_v35, %s4007_s18  ;;  %v300_v39 = vsel %vm4061_vm2, %v295_v32, %v299_v22  ;;  %v365_v49 = vrot.slane %v363_v43, 5  ;;  %v376_v51 = vor.u32 %v375_v37, %v4068_v36  ;;  %v379_v52 = vshll.u32 %v247_v42, 16  ;;  %v250_v6 = vld [vmem:[%s4050_s17 + $0x38] sm:$0x1]  ;;  %v244_v12 = vld [vmem:[%s4050_s17 + $0x20] sm:$0x1] }
  0x1a   : > { %671 = vrot.lane.b32.xlu0 %v300_v39, %s4007_s18  ;;  %v334_v54 = vsel %vm4061_vm2, %v329_v40, %v333_v41  ;;  %v408_v55 = vshrl.u32 %v251_v44, 16  ;;  %v411_v56 = vshll.u32 %v251_v44, 16  ;;  %v393_v57 = vshll.u32 %v249_v45, 16  ;;  %v255_v16 = vld [vmem:[%s4050_s17 + $0x4c] sm:$0xf] }
  0x1b   : > { %v397_v58 = vshrl.u32 %v249_v45, 16  ;;  %v336_v59 = vshrl.u32 %v242_v50, 16  ;;  %v310_v60 = vsel %vm4061_vm2, %v305_v46, %v309_v47  ;;  %v366_v61 = vor.u32 %v365_v49, %v362_v48  ;;  %v254_v19 = vld [vmem:[%s4050_s17 + $0x48] sm:$0xf]  ;;  %v248_v33 = vld [vmem:[%s4050_s17 + $0x30] sm:$0xf] }
  0x1c   : > { %v339_v62 = vshll.u32 %v242_v50, 16  ;;  %v345_v63 = vshll.u32 %v243_v53, 16  ;;  %v377_v0 = vrot.slane %v376_v51, 4  ;;  %v381_v1 = vrot.slane %v379_v52, 5  ;;  %v260_v39 = vld [vmem:[%s4050_s17 + $0x60] sm:$0xf] }
  0x1d   : > { %v338_v2 = vrot.slane %v336_v59, 4  ;;  %v349_v3 = vshrl.u32 %v243_v53, 16  ;;  %v410_v5 = vrot.slane %v408_v55, 4  ;;  %v413_v8 = vrot.slane %v411_v56, 5  ;;  %v256_v43 = vld [vmem:[%s4050_s17 + $0x50] sm:$0x1] }
  0x1e   : > { %v341_v7 = vrot.slane %v339_v62, 5  ;;  %v4090_v9 = vrot.slane %v393_v57, 5  ;;  %v399_v10 = vrot.slane %v397_v58, 4  ;;  %v367_v13 = vrot.slane %v366_v61, 4  ;;  %v258_v50 = vld [vmem:[%s4050_s17 + $0x58] sm:$0xf] }
  0x1f   : > { %v351_v11 = vrot.slane %v349_v3, 4  ;;  %v347_v15 = vrot.slane %v345_v63, 5  ;;  %v382_v17 = vsel %vm4061_vm2, %v377_v0, %v381_v1  ;;  %v417_v18 = vshll.u32 %v4086_v4, 16  ;;  %v4127_v1 = vld [vmem:[%s4050_s17 + $0x64] sm:$0xf] }
  0x20   : > { %v342_v14 = vor.u32 %v341_v7, %v338_v2  ;;  %v403_v20 = vshll.u32 %v250_v6, 16  ;;  %v355_v23 = vshll.u32 %v244_v12, 16  ;;  %v414_v24 = vor.u32 %v413_v8, %v410_v5  ;;  %v264_v6 = vld [vmem:[%s4050_s17 + $0x70] sm:$0xf]  ;;  %v253_v7 = vld [vmem:[%s4050_s17 + $0x44] sm:$0x1] }
  0x21   : > { %677 = vrot.lane.b32.xlu1 %v334_v54, %s4007_s18  ;;  %v352_v22 = vor.u32 %v351_v11, %v347_v15  ;;  %v400_v26 = vor.u32 %v399_v10, %v4090_v9  ;;  %v441_v27 = vshll.u32 %v255_v16, 16  ;;  %v445_v28 = vshrl.u32 %v255_v16, 16  ;;  %v263_v12 = vld [vmem:[%s4050_s17 + $0x6c] sm:$0xf]  ;;  %v257_v16 = vld [vmem:[%s4050_s17 + $0x54] sm:$0xf] }
  0x22   : > { %673 = vrot.lane.b32.xlu0 %v310_v60, %s4007_s18  ;;  %v343_v21 = vrot.slane %v342_v14, 4  ;;  %v372_v29 = vsel %vm4061_vm2, %v367_v13, %v4068_v36  ;;  %v432_v31 = vshrl.u32 %v254_v19, 16  ;;  %v435_v32 = vshll.u32 %v254_v19, 16 }
  0x23   : > { %v4107_v34 = vrot.slane %v417_v18, 5  ;;  %v405_v35 = vrot.slane %v403_v20, 5  ;;  %v353_v37 = vrot.slane %v352_v22, 4  ;;  %v357_v38 = vrot.slane %v355_v23, 5 }
  0x24   : > { %v348_v30 = vsel %vm4061_vm2, %v343_v21, %v347_v15  ;;  %v415_v36 = vrot.slane %v414_v24, 4  ;;  %v401_v40 = vrot.slane %v400_v26, 4  ;;  %v4111_v41 = vrot.slane %v441_v27, 5  ;;  %v259_v15 = vld [vmem:[%s4050_s17 + $0x5c] sm:$0x1] }
  0x25   : > { %679 = vrot.lane.b32.xlu2 %v348_v30, %s4007_s18  ;;  %v447_v42 = vrot.slane %v445_v28, 4  ;;  %v434_v44 = vrot.slane %v432_v31, 4  ;;  %v437_v45 = vrot.slane %v435_v32, 5  ;;  %v384_v46 = vshrl.u32 %v248_v33, 16  ;;  %v265_v32 = vld [vmem:[%s4050_s17 + $0x74] sm:$0x1] }
  0x26   : > { %v387_v47 = vshll.u32 %v248_v33, 16  ;;  %v480_v48 = vshrl.u32 %v260_v39, 16  ;;  %v483_v49 = vshll.u32 %v260_v39, 16  ;;  %v421_v51 = vshrl.u32 %v4086_v4, 16 }
  0x27   : > { %v358_v52 = vsel %vm4061_vm2, %v353_v37, %v357_v38  ;;  %v386_v53 = vrot.slane %v384_v46, 4  ;;  %v420_v55 = vsel %vm4061_vm2, %v415_v36, %v4107_v34  ;;  %v406_v56 = vsel %vm4061_vm2, %v401_v40, %v405_v35 }
  0x28   : > { %v389_v54 = vrot.slane %v387_v47, 5  ;;  %v448_v57 = vor.u32 %v447_v42, %v4111_v41  ;;  %v451_v58 = vshll.u32 %v256_v43, 16  ;;  %v438_v59 = vor.u32 %v437_v45, %v434_v44  ;;  %v269_v43 = vld [vmem:[%s4050_s17 + $0x84] sm:$0xf]  ;;  %v267_v45 = vld [vmem:[%s4050_s17 + $0x7c] sm:$0xf] }
  0x29   : > { %685 = vrot.lane.b32.xlu1 %v382_v17, %s4007_s18  ;;  %v465_v60 = vshll.u32 %v258_v50, 16  ;;  %v469_v61 = vshrl.u32 %v258_v50, 16  ;;  %v482_v63 = vrot.slane %v480_v48, 4  ;;  %v485_v0 = vrot.slane %v483_v49, 5 }
  0x2a   : > { %683 = vrot.lane.b32.xlu0 %v372_v29, %s4007_s18  ;;  %v390_v62 = vor.u32 %v389_v54, %v386_v53  ;;  %v423_v3 = vrot.slane %v421_v51, 4  ;;  %v449_v4 = vrot.slane %v448_v57, 4  ;;  %v453_v5 = vrot.slane %v451_v58, 5 }
  0x2b   : > { %v439_v8 = vrot.slane %v438_v59, 4  ;;  %v4132_v10 = vrot.slane %v465_v60, 5  ;;  %v471_v11 = vrot.slane %v469_v61, 4  ;;  %v486_v13 = vor.u32 %v485_v0, %v482_v63  ;;  %v273_v59 = vld [vmem:[%s4050_s17 + $0x94] sm:$0xf] }
  0x2c   : > { %v391_v2 = vrot.slane %v390_v62, 4  ;;  %v489_v14 = vshll.u32 %v4127_v1, 16  ;;  %v513_v18 = vshll.u32 %v264_v6, 16  ;;  %v424_v19 = vor.u32 %v423_v3, %v4107_v34  ;;  %v262_v60 = vld [vmem:[%s4050_s17 + $0x68] sm:$0x1] }
  0x2d   : > { %681 = vrot.lane.b32.xlu2 %v358_v52, %s4007_s18  ;;  %v427_v20 = vshll.u32 %v253_v7, 16  ;;  %v454_v21 = vsel %vm4061_vm2, %v449_v4, %v453_v5  ;;  %v517_v22 = vshrl.u32 %v264_v6, 16  ;;  %v504_v23 = vshrl.u32 %v263_v12, 16  ;;  %v270_v3 = vld [vmem:[%s4050_s17 + $0x88] sm:$0xf] }
  0x2e   : > { %v396_v17 = vsel %vm4061_vm2, %v391_v2, %v4090_v9  ;;  %v507_v24 = vshll.u32 %v263_v12, 16  ;;  %v444_v26 = vsel %vm4061_vm2, %v439_v8, %v4111_v41  ;;  %v472_v27 = vor.u32 %v471_v11, %v4132_v10  ;;  %v266_v2 = vld [vmem:[%s4050_s17 + $0x78] sm:$0xf]  ;;  %v268_v4 = vld [vmem:[%s4050_s17 + $0x80] sm:$0x1] }
  0x2f   : > { %v475_v28 = vshll.u32 %v259_v15, 16  ;;  %v456_v29 = vshrl.u32 %v257_v16, 16  ;;  %v487_v9 = vrot.slane %v486_v13, 4  ;;  %v4148_v30 = vrot.slane %v489_v14, 5  ;;  %v272_v11 = vld [vmem:[%s4050_s17 + $0x90] sm:$0xf] }
  0x30   : > { %v459_v31 = vshll.u32 %v257_v16, 16  ;;  %v4153_v33 = vrot.slane %v513_v18, 5  ;;  %v425_v34 = vrot.slane %v424_v19, 4  ;;  %v429_v35 = vrot.slane %v427_v20, 5 }
  0x31   : > { %691 = vrot.lane.b32.xlu1 %v420_v55, %s4007_s18  ;;  %v458_v37 = vrot.slane %v456_v29, 4  ;;  %v519_v38 = vrot.slane %v517_v22, 4  ;;  %v506_v39 = vrot.slane %v504_v23, 4  ;;  %v509_v36 = vrot.slane %v507_v24, 5 }
  0x32   : > { %689 = vrot.lane.b32.xlu0 %v406_v56, %s4007_s18  ;;  %v461_v40 = vrot.slane %v459_v31, 5  ;;  %v473_v41 = vrot.slane %v472_v27, 4  ;;  %v477_v42 = vrot.slane %v475_v28, 5  ;;  %v523_v44 = vshll.u32 %v265_v32, 16  ;;  %v274_v27 = vld [vmem:[%s4050_s17 + $0x98] sm:$0x1] }
  0x33   : > { %v492_v46 = vsel %vm4061_vm2, %v487_v9, %v4148_v30  ;;  %v493_v47 = vshrl.u32 %v4127_v1, 16  ;;  %v430_v48 = vsel %vm4061_vm2, %v425_v34, %v429_v35  ;;  %v520_v50 = vor.u32 %v519_v38, %v4153_v33  ;;  %v278_v38 = vld [vmem:[%s4050_s17 + $0xa8] sm:$0xf] }
  0x34   : > { %v462_v49 = vor.u32 %v461_v40, %v458_v37  ;;  %v510_v51 = vor.u32 %v509_v36, %v506_v39  ;;  %v552_v52 = vshrl.u32 %v269_v43, 16  ;;  %v555_v53 = vshll.u32 %v269_v43, 16  ;;  %v276_v40 = vld [vmem:[%s4050_s17 + $0xa0] sm:$0xf] }
  0x35   : > { %687 = vrot.lane.b32.xlu2 %v396_v17, %s4007_s18  ;;  %v478_v54 = vsel %vm4061_vm2, %v473_v41, %v477_v42  ;;  %v537_v55 = vshll.u32 %v267_v45, 16  ;;  %v541_v56 = vshrl.u32 %v267_v45, 16  ;;  %v525_v57 = vrot.slane %v523_v44, 5 }
  0x36   : > { %v463_v58 = vrot.slane %v462_v49, 4  ;;  %v495_v61 = vrot.slane %v493_v47, 4  ;;  %v521_v62 = vrot.slane %v520_v50, 4  ;;  %v511_v63 = vrot.slane %v510_v51, 4 }
  0x37   : > { %v554_v0 = vrot.slane %v552_v52, 4  ;;  %v557_v1 = vrot.slane %v555_v53, 5  ;;  %v4175_v5 = vrot.slane %v537_v55, 5  ;;  %v543_v6 = vrot.slane %v541_v56, 4  ;;  %v279_v53 = vld [vmem:[%s4050_s17 + $0xac] sm:$0xf] }
  0x38   : > { %v585_v7 = vshll.u32 %v273_v59, 16  ;;  %v589_v8 = vshrl.u32 %v273_v59, 16  ;;  %v499_v12 = vshll.u32 %v262_v60, 16  ;;  %v468_v13 = vsel %vm4061_vm2, %v463_v58, %v4132_v10  ;;  %v271_v55 = vld [vmem:[%s4050_s17 + $0x8c] sm:$0x1] }
  0x39   : > { %697 = vrot.lane.b32.xlu1 %v454_v21, %s4007_s18  ;;  %v496_v14 = vor.u32 %v495_v61, %v4148_v30  ;;  %v528_v15 = vshrl.u32 %v266_v2, 16  ;;  %v531_v16 = vshll.u32 %v266_v2, 16  ;;  %v526_v17 = vsel %vm4061_vm2, %v521_v62, %v525_v57  ;;  %v277_v59 = vld [vmem:[%s4050_s17 + $0xa4] sm:$0x1]  ;;  %v275_v60 = vld [vmem:[%s4050_s17 + $0x9c] sm:$0xf] }
  0x3a   : > { %695 = vrot.lane.b32.xlu0 %v444_v26, %s4007_s18  ;;  %v516_v18 = vsel %vm4061_vm2, %v511_v63, %v4153_v33  ;;  %v558_v19 = vor.u32 %v557_v1, %v554_v0  ;;  %v561_v20 = vshll.u32 %v270_v3, 16  ;;  %v544_v21 = vor.u32 %v543_v6, %v4175_v5  ;;  %v282_v0 = vld [vmem:[%s4050_s17 + $0xb8] sm:$0xf] }
  0x3b   : > { %v547_v22 = vshll.u32 %v268_v4, 16  ;;  %v576_v23 = vshrl.u32 %v272_v11, 16  ;;  %v579_v24 = vshll.u32 %v272_v11, 16  ;;  %v4189_v10 = vrot.slane %v585_v7, 5 }
  0x3c   : > { %v591_v26 = vrot.slane %v589_v8, 4  ;;  %v497_v28 = vrot.slane %v496_v14, 4  ;;  %v501_v29 = vrot.slane %v499_v12, 5  ;;  %v530_v9 = vrot.slane %v528_v15, 4 }
  0x3d   : > { %693 = vrot.lane.b32.xlu2 %v430_v48, %s4007_s18  ;;  %v533_v30 = vrot.slane %v531_v16, 5  ;;  %v559_v31 = vrot.slane %v558_v19, 4  ;;  %v563_v32 = vrot.slane %v561_v20, 5  ;;  %v545_v33 = vrot.slane %v544_v21, 4 }
  0x3e   : > { %v549_v34 = vrot.slane %v547_v22, 5  ;;  %v578_v35 = vrot.slane %v576_v23, 4  ;;  %v581_v37 = vrot.slane %v579_v24, 5  ;;  %v592_v39 = vor.u32 %v591_v26, %v4189_v10 }
  0x3f   : > { %v595_v36 = vshll.u32 %v274_v27, 16  ;;  %v565_v41 = vshrl.u32 %v270_v3, 16  ;;  %v502_v42 = vsel %vm4061_vm2, %v497_v28, %v501_v29  ;;  %v534_v43 = vor.u32 %v533_v30, %v530_v9  ;;  %v281_v3 = vld [vmem:[%s4050_s17 + $0xb4] sm:$0xf]  ;;  %v283_v29 = vld [vmem:[%s4050_s17 + $0xbc] sm:$0x1] }
  0x40   : > { %v564_v44 = vsel %vm4061_vm2, %v559_v31, %v563_v32  ;;  %v624_v45 = vshrl.u32 %v278_v38, 16  ;;  %v550_v47 = vsel %vm4061_vm2, %v545_v33, %v549_v34  ;;  %v582_v48 = vor.u32 %v581_v37, %v578_v35 }
  0x41   : > { %703 = vrot.lane.b32.xlu1 %v492_v46, %s4007_s18  ;;  %v627_v46 = vshll.u32 %v278_v38, 16  ;;  %v609_v49 = vshll.u32 %v276_v40, 16  ;;  %v613_v50 = vshrl.u32 %v276_v40, 16  ;;  %v593_v51 = vrot.slane %v592_v39, 4 }
  0x42   : > { %701 = vrot.lane.b32.xlu0 %v478_v54, %s4007_s18  ;;  %v597_v52 = vrot.slane %v595_v36, 5  ;;  %v535_v54 = vrot.slane %v534_v43, 4  ;;  %v567_v56 = vrot.slane %v565_v41, 4  ;;  %v626_v57 = vrot.slane %v624_v45, 4  ;;  %v280_v43 = vld [vmem:[%s4050_s17 + $0xb0] sm:$0x1] }
  0x43   : > { %v629_v58 = vrot.slane %v627_v46, 5  ;;  %v583_v61 = vrot.slane %v582_v48, 4  ;;  %v4210_v62 = vrot.slane %v609_v49, 5  ;;  %v615_v63 = vrot.slane %v613_v50, 4  ;;  %v801_v45 = vld [vmem:[%s4050_s17 + $0x4] sm:$0xf] }
  0x44   : > { %v598_v1 = vsel %vm4061_vm2, %v593_v51, %v597_v52  ;;  %v633_v2 = vshll.u32 %v279_v53, 16  ;;  %v571_v4 = vshll.u32 %v271_v55, 16  ;;  %v540_v6 = vsel %vm4061_vm2, %v535_v54, %v4175_v5  ;;  %v803_v50 = vld [vmem:[%s4050_s17 + $0xc] sm:$0xe]  ;;  %v802_v54 = vld [vmem:[%s4050_s17 + $0x8] sm:$0x1] }
  0x45   : > { %699 = vrot.lane.b32.xlu2 %v468_v13, %s4007_s18  ;;  %v568_v7 = vor.u32 %v567_v56, %v563_v32  ;;  %v600_v8 = vshrl.u32 %v275_v60, 16  ;;  %v603_v11 = vshll.u32 %v275_v60, 16  ;;  %v630_v12 = vor.u32 %v629_v58, %v626_v57 }
  0x46   : > { %v619_v13 = vshll.u32 %v277_v59, 16  ;;  %v657_v14 = vshll.u32 %v282_v0, 16  ;;  %v661_v15 = vshrl.u32 %v282_v0, 16  ;;  %v588_v16 = vsel %vm4061_vm2, %v583_v61, %v4189_v10  ;;  %v171_v0 = vld [vmem:[%s4050_s17] sm:$0xf] }
  0x47   : > { %v651_v19 = vshll.u32 %v281_v3, 16  ;;  %v569_v5 = vrot.slane %v568_v7, 4  ;;  %v573_v20 = vrot.slane %v571_v4, 5  ;;  %v602_v21 = vrot.slane %v600_v8, 4  ;;  %204 = vst.msk [vmem:[#allocation2] sm:$0xf] %vm203_vm6, %v171_v0 }
  0x48   : > { %v605_v22 = vrot.slane %v603_v11, 5  ;;  %v631_v23 = vrot.slane %v630_v12, 4  ;;  %v635_v24 = vrot.slane %v633_v2, 5  ;;  %v659_v26 = vrot.slane %v657_v14, 5  ;;  %v806_v8 = vld [vmem:[%s4050_s17 + $0x18] sm:$0xe] }
  0x49   : > { %709 = vrot.lane.b32.xlu1 %v526_v17, %s4007_s18  ;;  %v616_v17 = vor.u32 %v615_v63, %v4210_v62  ;;  %v663_v27 = vrot.slane %v661_v15, 4  ;;  %v621_v28 = vrot.slane %v619_v13, 5  ;;  %v653_v30 = vrot.slane %v651_v19, 5  ;;  %v173_v63 = vld [vmem:[%s4050_s17 + $0xc] sm:$0xf] }
  0x4a   : > { %707 = vrot.lane.b32.xlu0 %v516_v18, %s4007_s18  ;;  %v648_v18 = vshrl.u32 %v281_v3, 16  ;;  %v637_v31 = vshrl.u32 %v279_v53, 16  ;;  %v574_v32 = vsel %vm4061_vm2, %v569_v5, %v573_v20  ;;  %v606_v33 = vor.u32 %v605_v22, %v602_v21  ;;  %v804_v53 = vld [vmem:[%s4050_s17 + $0x10] sm:$0xf]  ;;  %206 = vst.msk [vmem:[#allocation2 + $0x8] sm:$0xf] %vm203_vm6, %v173_v63 }
  0x4b   : > { %v617_v10 = vrot.slane %v616_v17, 4  ;;  %v636_v34 = vsel %vm4061_vm2, %v631_v23, %v635_v24  ;;  %v664_v35 = vor.u32 %v663_v27, %v659_v26  ;;  %v667_v37 = vshll.u32 %v283_v29, 16  ;;  %v808_v3 = vld [vmem:[%s4050_s17 + $0x20] sm:$0x1]  ;;  %v810_v15 = vld [vmem:[%s4050_s17 + $0x28] sm:$0xf] }
  0x4c   : > { %v650_v9 = vrot.slane %v648_v18, 4  ;;  %v607_v36 = vrot.slane %v606_v33, 4  ;;  %v639_v40 = vrot.slane %v637_v31, 4  ;;  %v643_v48 = vshll.u32 %v280_v43, 16  ;;  %v174_v17 = vld [vmem:[%s4050_s17 + $0x10] sm:$0xf] }
  0x4d   : > { %705 = vrot.lane.b32.xlu2 %v502_v42, %s4007_s18  ;;  %v622_v38 = vsel %vm4061_vm2, %v617_v10, %v621_v28  ;;  %v665_v41 = vrot.slane %v664_v35, 4  ;;  %v669_v42 = vrot.slane %v667_v37, 5  ;;  %v901_v51 = vrot.slane %v801_v45, 5  ;;  %v172_v18 = vld [vmem:[%s4050_s17 + $0x4] sm:$0xf] }
  0x4e   : > { %v654_v39 = vor.u32 %v653_v30, %v650_v9  ;;  %v612_v46 = vsel %vm4061_vm2, %v607_v36, %v4210_v62  ;;  %v3591_v55 = vrot.slane %v803_v50, 9  ;;  %v645_v57 = vrot.slane %v643_v48, 5  ;;  %v807_v62 = vld [vmem:[%s4050_s17 + $0x1c] sm:$0xf]  ;;  %207 = vst.msk [vmem:[#allocation2 + $0xc] sm:$0xf] %vm203_vm6, %v174_v17 }
  0x4f   : > { %v670_v49 = vsel %vm4061_vm2, %v665_v41, %v669_v42  ;;  %v908_v59 = vrot.slane %v804_v53, 5  ;;  %v903_v60 = vrot.slane %v901_v51, 4  ;;  %v904_v61 = vrot.slane %v802_v54, 5  ;;  %v812_v19 = vld [vmem:[%s4050_s17 + $0x30] sm:$0xe] }
  0x50   : > { %v915_v4 = vrot.slane %v807_v62, 5  ;;  %v918_v11 = vrot.slane %v808_v3, 5  ;;  %v3592_v14 = vrot.slane %v806_v8, 9  ;;  %205 = vst.msk [vmem:[#allocation2 + $0x4] sm:$0xf] %vm203_vm6, %v172_v18  ;;  %v922_v22 = vrot.slane %v810_v15, 5 }
  0x51   : > { %715 = vrot.lane.b32.xlu1 %v564_v44, %s4007_s18  ;;  %v655_v44 = vrot.slane %v654_v39, 4  ;;  %v909_v2 = vsel %vm4251_vm5, %v3591_v55, %v908_v59  ;;  %v905_v7 = vsel %vm4251_vm5, %v903_v60, %v904_v61  ;;  %v813_v21 = vld [vmem:[%s4050_s17 + $0x34] sm:$0xf]  ;;  %v3594_v27 = vrot.slane %v812_v19, 9  ;;  %v816_v31 = vld [vmem:[%s4050_s17 + $0x40] sm:$0xf] }
  0x52   : > { %713 = vrot.lane.b32.xlu0 %v550_v47, %s4007_s18  ;;  %v640_v47 = vor.u32 %v639_v40, %v635_v24  ;;  %v917_v13 = vrot.slane %v915_v4, 4  ;;  %v805_v23 = vld [vmem:[%s4050_s17 + $0x14] sm:$0x1]  ;;  %v916_v24 = vsel %vm4251_vm5, %v3592_v14, %v915_v4  ;;  %v929_v10 = vrot.slane %v813_v21, 5  ;;  %v178_v33 = vld [vmem:[%s4050_s17 + $0x28] sm:$0xf] }
  0x53   : > { %v660_v52 = vsel %vm4061_vm2, %v655_v44, %v659_v26  ;;  %v811_v26 = vld [vmem:[%s4050_s17 + $0x2c] sm:$0x1]  ;;  %v910_v28 = vrot.slane %v908_v59, 4  ;;  %v911_v29 = vrot.slane %v805_v23, 5  ;;  %v924_v9 = vrot.slane %v922_v22, 4 }
  0x54   : > { %v641_v56 = vrot.slane %v640_v47, 4  ;;  %v919_v20 = vsel %vm4251_vm5, %v917_v13, %v918_v11  ;;  %v925_v30 = vrot.slane %v811_v26, 5  ;;  %211 = vst.msk [vmem:[#allocation2 + $0x1c] sm:$0xf] %vm203_vm6, %v178_v33  ;;  %v936_v35 = vrot.slane %v816_v31, 5 }
  0x55   : > { %711 = vrot.lane.b32.xlu2 %v540_v6, %s4007_s18  ;;  %v800_v6 = vld [vmem:[%s4050_s17] sm:$0xe]  ;;  %v912_v37 = vsel %vm4251_vm5, %v910_v28, %v911_v29  ;;  %v817_v39 = vld [vmem:[%s4050_s17 + $0x44] sm:$0x1]  ;;  %v809_v36 = vld [vmem:[%s4050_s17 + $0x24] sm:$0xe] }
  0x56   : > { %v3590_v12 = vrot.slane %v800_v6, 9  ;;  %v926_v40 = vsel %vm4251_vm5, %v924_v9, %v925_v30  ;;  %v815_v41 = vld [vmem:[%s4050_s17 + $0x3c] sm:$0xe]  ;;  %v938_v42 = vrot.slane %v936_v35, 4  ;;  %v939_v43 = vrot.slane %v817_v39, 5 }
  0x57   : > { %v3593_v44 = vrot.slane %v809_v36, 9  ;;  %v3595_v45 = vrot.slane %v815_v41, 9  ;;  %v179_v48 = vld [vmem:[%s4050_s17 + $0x30] sm:$0xf]  ;;  %v180_v50 = vld [vmem:[%s4050_s17 + $0x34] sm:$0xf] }
  0x58   : > { %v902_v5 = vsel %vm4251_vm5, %v3590_v12, %v901_v51  ;;  %212 = vst.msk [vmem:[#allocation2 + $0x20] sm:$0xf] %vm203_vm6, %v179_v48  ;;  %v814_v54 = vld [vmem:[%s4050_s17 + $0x38] sm:$0x1]  ;;  %v820_v59 = vld [vmem:[%s4050_s17 + $0x50] sm:$0x1] }
  0x59   : > { %721 = vrot.lane.b32.xlu1 %v598_v1, %s4007_s18  ;;  %v646_v1 = vsel %vm4061_vm2, %v641_v56, %v645_v57  ;;  %v923_v51 = vsel %vm4251_vm5, %v3593_v44, %v922_v22  ;;  %213 = vst.msk [vmem:[#allocation2 + $0x24] sm:$0xf] %vm203_vm6, %v180_v50  ;;  %v937_v55 = vsel %vm4251_vm5, %v3595_v45, %v936_v35  ;;  %v821_v56 = vld [vmem:[%s4050_s17 + $0x54] sm:$0xe]  ;;  %v822_v57 = vld [vmem:[%s4050_s17 + $0x58] sm:$0xf] }
  0x5a   : > { %719 = vrot.lane.b32.xlu0 %v588_v16, %s4007_s18  ;;  %v175_v16 = vld [vmem:[%s4050_s17 + $0x18] sm:$0xf]  ;;  %v931_v60 = vrot.slane %v929_v10, 4  ;;  %v932_v61 = vrot.slane %v814_v54, 5  ;;  %v3597_v62 = vrot.slane %v821_v56, 9  ;;  %v950_v63 = vrot.slane %v822_v57, 5 }
  0x5b   : > { %208 = vst.msk [vmem:[#allocation2 + $0x10] sm:$0xf] %vm203_vm6, %v175_v16  ;;  %v825_v4 = vld [vmem:[%s4050_s17 + $0x64] sm:$0xf]  ;;  %v182_v6 = vld [vmem:[%s4050_s17 + $0x40] sm:$0xf] }
  0x5c   : > { %v184_v8 = vld [vmem:[%s4050_s17 + $0x4c] sm:$0xf]  ;;  %v933_v11 = vsel %vm4251_vm5, %v931_v60, %v932_v61  ;;  %v183_v12 = vld [vmem:[%s4050_s17 + $0x48] sm:$0xf]  ;;  %v951_v13 = vsel %vm4251_vm5, %v3597_v62, %v950_v63  ;;  %v957_v14 = vrot.slane %v825_v4, 5 }
  0x5d   : > { %717 = vrot.lane.b32.xlu2 %v574_v32, %s4007_s18  ;;  %v176_v32 = vld [vmem:[%s4050_s17 + $0x1c] sm:$0xf]  ;;  %v818_v15 = vld [vmem:[%s4050_s17 + $0x48] sm:$0xe]  ;;  %215 = vst.msk [vmem:[#allocation2 + $0x2c] sm:$0xf] %vm203_vm6, %v182_v6 }
  0x5e   : > { %209 = vst.msk [vmem:[#allocation2 + $0x14] sm:$0xf] %vm203_vm6, %v176_v32  ;;  %v826_v17 = vld [vmem:[%s4050_s17 + $0x68] sm:$0x1]  ;;  %v824_v18 = vld [vmem:[%s4050_s17 + $0x60] sm:$0xe] }
  0x5f   : > { %217 = vst.msk [vmem:[#allocation2 + $0x34] sm:$0xf] %vm203_vm6, %v184_v8  ;;  %v3596_v19 = vrot.slane %v818_v15, 9  ;;  %v4358_v21 = vld [vmem:[%s4050_s17 + $0x70] sm:$0xf] }
  0x60   : > { %216 = vst.msk [vmem:[#allocation2 + $0x30] sm:$0xf] %vm203_vm6, %v183_v12  ;;  %v185_v26 = vld [vmem:[%s4050_s17 + $0x54] sm:$0xf]  ;;  %v964_v28 = vrot.slane %v4358_v21, 5 }
  0x61   : > { %727 = vrot.lane.b32.xlu1 %v636_v34, %s4007_s18  ;;  %v177_v34 = vld [vmem:[%s4050_s17 + $0x24] sm:$0xf]  ;;  %v186_v9 = vld [vmem:[%s4050_s17 + $0x58] sm:$0xf]  ;;  %v823_v32 = vld [vmem:[%s4050_s17 + $0x5c] sm:$0x1] }
  0x62   : > { %725 = vrot.lane.b32.xlu0 %v622_v38, %s4007_s18  ;;  %210 = vst.msk [vmem:[#allocation2 + $0x18] sm:$0xf] %vm203_vm6, %v177_v34  ;;  %v930_v38 = vsel %vm4251_vm5, %v3594_v27, %v929_v10  ;;  %v187_v10 = vld [vmem:[%s4050_s17 + $0x60] sm:$0xf]  ;;  %v830_v31 = vld [vmem:[%s4050_s17 + $0x78] sm:$0xe] }
  0x63   : > { %218 = vst.msk [vmem:[#allocation2 + $0x38] sm:$0xf] %vm203_vm6, %v185_v26  ;;  %v4377_v34 = vld [vmem:[%s4050_s17 + $0x7c] sm:$0xf]  ;;  %v829_v35 = vld [vmem:[%s4050_s17 + $0x74] sm:$0x1] }
  0x64   : > { %220 = vst.msk [vmem:[#allocation2 + $0x40] sm:$0xf] %vm203_vm6, %v187_v10  ;;  %v3600_v39 = vrot.slane %v830_v31, 9  ;;  %v971_v36 = vrot.slane %v4377_v34, 5  ;;  %v967_v41 = vrot.slane %v829_v35, 5 }
  0x65   : > { %723 = vrot.lane.b32.xlu2 %v612_v46, %s4007_s18  ;;  %v4312_v46 = vld [vmem:[%s4050_s17 + $0x4c] sm:$0xf]  ;;  %219 = vst.msk [vmem:[#allocation2 + $0x3c] sm:$0xf] %vm203_vm6, %v186_v9  ;;  %v834_v44 = vld [vmem:[%s4050_s17 + $0x88] sm:$0xf] }
  0x66   : > { %v943_v53 = vrot.slane %v4312_v46, 5  ;;  %v188_v45 = vld [vmem:[%s4050_s17 + $0x64] sm:$0xf]  ;;  %v972_v50 = vsel %vm4251_vm5, %v3600_v39, %v971_v36  ;;  %v835_v54 = vld [vmem:[%s4050_s17 + $0x8c] sm:$0x1]  ;;  %v973_v15 = vrot.slane %v971_v36, 4 }
  0x67   : > { %221 = vst.msk [vmem:[#allocation2 + $0x44] sm:$0xf] %vm203_vm6, %v188_v45  ;;  %v4409_v60 = vld [vmem:[%s4050_s17 + $0x94] sm:$0xf]  ;;  %v192_v6 = vld [vmem:[%s4050_s17 + $0x7c] sm:$0xf] }
  0x68   : > { %v945_v0 = vrot.slane %v943_v53, 4  ;;  %v944_v29 = vsel %vm4251_vm5, %v3596_v19, %v943_v53  ;;  %v839_v8 = vld [vmem:[%s4050_s17 + $0x9c] sm:$0xe]  ;;  %225 = vst.msk [vmem:[#allocation2 + $0x54] sm:$0xf] %vm203_vm6, %v192_v6 }
  0x69   : > { %733 = vrot.lane.b32.xlu1 %v670_v49, %s4007_s18  ;;  %v181_v49 = vld [vmem:[%s4050_s17 + $0x3c] sm:$0xf]  ;;  %v196_v26 = vld [vmem:[%s4050_s17 + $0x94] sm:$0xf]  ;;  %v195_v10 = vld [vmem:[%s4050_s17 + $0x90] sm:$0xf] }
  0x6a   : > { %731 = vrot.lane.b32.xlu0 %v660_v52, %s4007_s18  ;;  %214 = vst.msk [vmem:[#allocation2 + $0x28] sm:$0xf] %vm203_vm6, %v181_v49  ;;  %v940_v52 = vsel %vm4251_vm5, %v938_v42, %v939_v43  ;;  %v189_v49 = vld [vmem:[%s4050_s17 + $0x6c] sm:$0xf]  ;;  %v836_v9 = vld [vmem:[%s4050_s17 + $0x90] sm:$0xe] }
  0x6b   : > { %222 = vst.msk [vmem:[#allocation2 + $0x48] sm:$0xf] %vm203_vm6, %v189_v49  ;;  %v844_v31 = vld [vmem:[%s4050_s17 + $0xb0] sm:$0x1]  ;;  %v197_v36 = vld [vmem:[%s4050_s17 + $0x9c] sm:$0xf] }
  0x6c   : > { %229 = vst.msk [vmem:[#allocation2 + $0x64] sm:$0xf] %vm203_vm6, %v196_v26  ;;  %v1002_v35 = vrot.slane %v844_v31, 5  ;;  %v847_v49 = vld [vmem:[%s4050_s17 + $0xbc] sm:$0x1] }
  0x6d   : > { %729 = vrot.lane.b32.xlu2 %v646_v1, %s4007_s18  ;;  %v946_v1 = vrot.slane %v820_v59, 5  ;;  %v981_v59 = vrot.slane %v835_v54, 5  ;;  %228 = vst.msk [vmem:[#allocation2 + $0x60] sm:$0xf] %vm203_vm6, %v195_v10  ;;  %v3613_v26 = vld [vmem:[%s4050_s17 + $0x34] sm:$0xf] }
  0x6e   : > { %230 = vst.msk [vmem:[#allocation2 + $0x68] sm:$0xf] %vm203_vm6, %v197_v36  ;;  %v3617_v10 = vld [vmem:[%s4050_s17 + $0x4c] sm:$0xf]  ;;  %v3621_v31 = vld [vmem:[%s4050_s17 + $0x64] sm:$0xf] }
  0x6f   : > { %v947_v16 = vsel %vm4251_vm5, %v945_v0, %v946_v1  ;;  %v191_v0 = vld [vmem:[%s4050_s17 + $0x78] sm:$0xf] }
  0x70   : > { %224 = vst.msk [vmem:[#allocation2 + $0x50] sm:$0xf] %vm203_vm6, %v191_v0 }
  0x71   : > { %1015 = vrot.lane.b32.xlu1 %v909_v2, %s4008_s19 }
  0x72   : > { %1013 = vrot.lane.b32.xlu0 %v905_v7, %s4008_s19 }
  0x75   : > { %1011 = vrot.lane.b32.xlu2 %v902_v5, %s4008_s19  ;;  %v959_v5 = vrot.slane %v957_v14, 4 }
  0x79   : > { %1021 = vrot.lane.b32.xlu1 %v919_v20, %s4008_s19  ;;  %v960_v20 = vrot.slane %v826_v17, 5  ;;  %v3603_v17 = vrot.slane %v839_v8, 9  ;;  %v3608_v8 = vld [vmem:[%s4050_s17 + $0x18] sm:$0xf] }
  0x7a   : > { %1019 = vrot.lane.b32.xlu0 %v916_v24, %s4008_s19  ;;  %v3598_v24 = vrot.slane %v824_v18, 9 }
  0x7b   : > { %v961_v30 = vsel %vm4251_vm5, %v959_v5, %v960_v20 }
  0x7c   : > { %v958_v33 = vsel %vm4251_vm5, %v3598_v24, %v957_v14  ;;  %v838_v14 = vld [vmem:[%s4050_s17 + $0x98] sm:$0x1] }
  0x7d   : > { %1017 = vrot.lane.b32.xlu2 %v912_v37, %s4008_s19  ;;  %v952_v37 = vrot.slane %v950_v63, 4  ;;  %v988_v5 = vrot.slane %v838_v14, 5  ;;  %v3607_v14 = vld [vmem:[%s4050_s17 + $0x10] sm:$0xf] }
  0x7f   : > { %v680_v47 = vpop.permute.xlu2 %679 }
  0x80   : > { %772 = vst.msk [vmem:[#allocation2 + $0x10] sm:$0xf] %vm767_vm7, %v680_v47  ;;  %v190_v47 = vld [vmem:[%s4050_s17 + $0x70] sm:$0xf] }
  0x81   : > { %1027 = vrot.lane.b32.xlu1 %v930_v38, %s4008_s19  ;;  %v953_v38 = vrot.slane %v823_v32, 5  ;;  %223 = vst.msk [vmem:[#allocation2 + $0x4c] sm:$0xf] %vm203_vm6, %v190_v47  ;;  %v842_v32 = vld [vmem:[%s4050_s17 + $0xa8] sm:$0xe] }
  0x82   : > { %1025 = vrot.lane.b32.xlu0 %v926_v40, %s4008_s19  ;;  %v966_v40 = vrot.slane %v964_v28, 4  ;;  %v3604_v39 = vrot.slane %v842_v32, 9  ;;  %v3620_v32 = vld [vmem:[%s4050_s17 + $0x60] sm:$0xf] }
  0x83   : > { %v954_v48 = vsel %vm4251_vm5, %v952_v37, %v953_v38 }
  0x84   : > { %v968_v53 = vsel %vm4251_vm5, %v966_v40, %v967_v41  ;;  %v846_v41 = vld [vmem:[%s4050_s17 + $0xb8] sm:$0xf] }
  0x85   : > { %1023 = vrot.lane.b32.xlu2 %v923_v51, %s4008_s19  ;;  %v978_v51 = vrot.slane %v834_v44, 5  ;;  %v198_v44 = vld [vmem:[%s4050_s17 + $0xa0] sm:$0xf] }
  0x86   : > { %231 = vst.msk [vmem:[#allocation2 + $0x6c] sm:$0xf] %vm203_vm6, %v198_v44  ;;  %v3626_v44 = vld [vmem:[%s4050_s17 + $0x84] sm:$0xf] }
  0x87   : > { %v682_v2 = vpop.permute.xlu2 %681  ;;  %v980_v57 = vrot.slane %v978_v51, 4 }
  0x88   : > { %773 = vst.msk [vmem:[#allocation2 + $0x14] sm:$0xf] %vm767_vm7, %v682_v2  ;;  %v193_v2 = vld [vmem:[%s4050_s17 + $0x84] sm:$0xf] }
  0x89   : > { %1033 = vrot.lane.b32.xlu1 %v940_v52, %s4008_s19  ;;  %v827_v52 = vld [vmem:[%s4050_s17 + $0x6c] sm:$0xe]  ;;  %226 = vst.msk [vmem:[#allocation2 + $0x58] sm:$0xf] %vm203_vm6, %v193_v2 }
  0x8a   : > { %1031 = vrot.lane.b32.xlu0 %v937_v55, %s4008_s19  ;;  %v833_v55 = vld [vmem:[%s4050_s17 + $0x84] sm:$0xe]  ;;  %v3599_v56 = vrot.slane %v827_v52, 9 }
  0x8b   : > { %v676_v3 = vpop.permute.xlu1 %675  ;;  %v3601_v63 = vrot.slane %v833_v55, 9  ;;  %v1009_v55 = vrot.slane %v847_v49, 5  ;;  %v3630_v49 = vld [vmem:[%s4050_s17 + $0x9c] sm:$0xf] }
  0x8c   : > { %770 = vst.msk [vmem:[#allocation2 + $0x8] sm:$0xf] %vm767_vm7, %v676_v3  ;;  %v672_v7 = vpop.permute.xlu0 %671  ;;  %v985_v3 = vrot.slane %v4409_v60, 5  ;;  %v965_v4 = vsel %vm4251_vm5, %v3599_v56, %v964_v28  ;;  %v200_v56 = vld [vmem:[%s4050_s17 + $0xac] sm:$0xf] }
  0x8d   : > { %768 = vst.msk [vmem:[#allocation2] sm:$0xf] %vm767_vm7, %v672_v7  ;;  %1029 = vrot.lane.b32.xlu2 %v933_v11, %s4008_s19  ;;  %v982_v7 = vsel %vm4251_vm5, %v980_v57, %v981_v59  ;;  %v832_v11 = vld [vmem:[%s4050_s17 + $0x80] sm:$0x1]  ;;  %v979_v12 = vsel %vm4251_vm5, %v3601_v63, %v978_v51  ;;  %v202_v59 = vld [vmem:[%s4050_s17 + $0xb8] sm:$0xf] }
  0x8e   : > { %v987_v19 = vrot.slane %v985_v3, 4  ;;  %v845_v63 = vld [vmem:[%s4050_s17 + $0xb4] sm:$0xe]  ;;  %233 = vst.msk [vmem:[#allocation2 + $0x74] sm:$0xf] %vm203_vm6, %v200_v56 }
  0x8f   : > { %v688_v22 = vpop.permute.xlu2 %687  ;;  %235 = vst.msk [vmem:[#allocation2 + $0x7c] sm:$0xf] %vm203_vm6, %v202_v59  ;;  %v3628_v59 = vld [vmem:[%s4050_s17 + $0x90] sm:$0xf] }
  0x90   : > { %776 = vst.msk [vmem:[#allocation2 + $0x20] sm:$0xf] %vm767_vm7, %v688_v22  ;;  %v843_v22 = vld [vmem:[%s4050_s17 + $0xac] sm:$0xf] }
  0x91   : > { %1039 = vrot.lane.b32.xlu1 %v951_v13, %s4008_s19  ;;  %v840_v13 = vld [vmem:[%s4050_s17 + $0xa0] sm:$0xf] }
  0x92   : > { %1037 = vrot.lane.b32.xlu0 %v947_v16, %s4008_s19  ;;  %v974_v16 = vrot.slane %v832_v11, 5  ;;  %v992_v18 = vrot.slane %v840_v13, 5 }
  0x93   : > { %v678_v23 = vpop.permute.xlu1 %677 }
  0x94   : > { %771 = vst.msk [vmem:[#allocation2 + $0xc] sm:$0xf] %vm767_vm7, %v678_v23  ;;  %v674_v27 = vpop.permute.xlu0 %673  ;;  %v194_v23 = vld [vmem:[%s4050_s17 + $0x88] sm:$0xf]  ;;  %v993_v28 = vsel %vm4251_vm5, %v3603_v17, %v992_v18 }
  0x95   : > { %769 = vst.msk [vmem:[#allocation2 + $0x4] sm:$0xf] %vm767_vm7, %v674_v27  ;;  %1035 = vrot.lane.b32.xlu2 %v944_v29, %s4008_s19  ;;  %v975_v27 = vsel %vm4251_vm5, %v973_v15, %v974_v16  ;;  %v999_v29 = vrot.slane %v843_v22, 5  ;;  %v3612_v15 = vld [vmem:[%s4050_s17 + $0x30] sm:$0xf] }
  0x96   : > { %227 = vst.msk [vmem:[#allocation2 + $0x5c] sm:$0xf] %vm203_vm6, %v194_v23  ;;  %v3611_v16 = vld [vmem:[%s4050_s17 + $0x28] sm:$0xf] }
  0x97   : > { %v694_v42 = vpop.permute.xlu2 %693  ;;  %v1001_v34 = vrot.slane %v999_v29, 4  ;;  %v1000_v47 = vsel %vm4251_vm5, %v3604_v39, %v999_v29  ;;  %v3623_v39 = vld [vmem:[%s4050_s17 + $0x70] sm:$0xf] }
  0x98   : > { %779 = vst.msk [vmem:[#allocation2 + $0x2c] sm:$0xf] %vm767_vm7, %v694_v42  ;;  %v199_v42 = vld [vmem:[%s4050_s17 + $0xa8] sm:$0xf] }
  0x99   : > { %1045 = vrot.lane.b32.xlu1 %v961_v30, %s4008_s19  ;;  %v989_v30 = vsel %vm4251_vm5, %v987_v19, %v988_v5  ;;  %v1003_v45 = vsel %vm4251_vm5, %v1001_v34, %v1002_v35  ;;  %232 = vst.msk [vmem:[#allocation2 + $0x70] sm:$0xf] %vm203_vm6, %v199_v42  ;;  %v3610_v5 = vld [vmem:[%s4050_s17 + $0x24] sm:$0xf]  ;;  %v3622_v42 = vld [vmem:[%s4050_s17 + $0x6c] sm:$0xf] }
  0x9a   : > { %1043 = vrot.lane.b32.xlu0 %v958_v33, %s4008_s19  ;;  %v3602_v33 = vrot.slane %v836_v9, 9 }
  0x9b   : > { %v686_v43 = vpop.permute.xlu1 %685 }
  0x9c   : > { %775 = vst.msk [vmem:[#allocation2 + $0x1c] sm:$0xf] %vm767_vm7, %v686_v43  ;;  %v684_v46 = vpop.permute.xlu0 %683  ;;  %v986_v43 = vsel %vm4251_vm5, %v3602_v33, %v985_v3 }
  0x9d   : > { %774 = vst.msk [vmem:[#allocation2 + $0x18] sm:$0xf] %vm767_vm7, %v684_v46  ;;  %1041 = vrot.lane.b32.xlu2 %v954_v48, %s4008_s19  ;;  %v841_v46 = vld [vmem:[%s4050_s17 + $0xa4] sm:$0x1]  ;;  %v1006_v48 = vrot.slane %v846_v41, 5 }
  0x9e   : > { %v995_v51 = vrot.slane %v841_v46, 5 }
  0x9f   : > { %v700_v61 = vpop.permute.xlu2 %699  ;;  %v1008_v54 = vrot.slane %v1006_v48, 4 }
  0xa0   : > { %782 = vst.msk [vmem:[#allocation2 + $0x38] sm:$0xf] %vm767_vm7, %v700_v61  ;;  %v201_v61 = vld [vmem:[%s4050_s17 + $0xb4] sm:$0xf] }
  0xa1   : > { %1051 = vrot.lane.b32.xlu1 %v972_v50, %s4008_s19  ;;  %v994_v50 = vrot.slane %v992_v18, 4  ;;  %v1010_v0 = vsel %vm4251_vm5, %v1008_v54, %v1009_v55  ;;  %234 = vst.msk [vmem:[#allocation2 + $0x78] sm:$0xf] %vm203_vm6, %v201_v61 }
  0xa2   : > { %1049 = vrot.lane.b32.xlu0 %v968_v53, %s4008_s19 }
  0xa3   : > { %v692_v62 = vpop.permute.xlu1 %691  ;;  %v996_v60 = vsel %vm4251_vm5, %v994_v50, %v995_v51  ;;  %v3629_v50 = vld [vmem:[%s4050_s17 + $0x94] sm:$0xf]  ;;  %v3639_v51 = vld [vmem:[%s4050_s17 + $0x10] sm:$0xf] }
  0xa4   : > { %778 = vst.msk [vmem:[#allocation2 + $0x28] sm:$0xf] %vm767_vm7, %v692_v62  ;;  %v690_v1 = vpop.permute.xlu0 %689  ;;  %v3606_v62 = vld [vmem:[%s4050_s17 + $0xc] sm:$0xf]  ;;  %v1392_v56 = vshll.u32 %v3639_v51, 16 }
  0xa5   : > { %777 = vst.msk [vmem:[#allocation2 + $0x24] sm:$0xf] %vm767_vm7, %v690_v1  ;;  %1047 = vrot.lane.b32.xlu2 %v965_v4, %s4008_s19  ;;  %v3605_v1 = vrot.slane %v845_v63, 9  ;;  %v3632_v63 = vld [vmem:[%s4050_s17 + $0xa8] sm:$0xf] }
  0xa7   : > { %v706_v20 = vpop.permute.xlu2 %705  ;;  %v1007_v6 = vsel %vm4251_vm5, %v3605_v1, %v1006_v48  ;;  %v3625_v48 = vld [vmem:[%s4050_s17 + $0x7c] sm:$0xf] }
  0xa8   : > { %785 = vst.msk [vmem:[#allocation2 + $0x44] sm:$0xf] %vm767_vm7, %v706_v20  ;;  %v3615_v20 = vld [vmem:[%s4050_s17 + $0x40] sm:$0xf] }
  0xa9   : > { %1057 = vrot.lane.b32.xlu1 %v982_v7, %s4008_s19  ;;  %v3609_v7 = vld [vmem:[%s4050_s17 + $0x1c] sm:$0xf] }
  0xaa   : > { %1055 = vrot.lane.b32.xlu0 %v979_v12, %s4008_s19 }
  0xab   : > { %v698_v21 = vpop.permute.xlu1 %697 }
  0xac   : > { %781 = vst.msk [vmem:[#allocation2 + $0x34] sm:$0xf] %vm767_vm7, %v698_v21  ;;  %v696_v24 = vpop.permute.xlu0 %695  ;;  %v3614_v21 = vld [vmem:[%s4050_s17 + $0x3c] sm:$0xf] }
  0xad   : > { %780 = vst.msk [vmem:[#allocation2 + $0x30] sm:$0xf] %vm767_vm7, %v696_v24  ;;  %1053 = vrot.lane.b32.xlu2 %v975_v27, %s4008_s19  ;;  %v3618_v27 = vld [vmem:[%s4050_s17 + $0x54] sm:$0xf] }
  0xaf   : > { %v712_v37 = vpop.permute.xlu2 %711 }
  0xb0   : > { %788 = vst.msk [vmem:[#allocation2 + $0x50] sm:$0xf] %vm767_vm7, %v712_v37  ;;  %v3619_v37 = vld [vmem:[%s4050_s17 + $0x58] sm:$0xf] }
  0xb1   : > { %1063 = vrot.lane.b32.xlu1 %v993_v28, %s4008_s19 }
  0xb2   : > { %1061 = vrot.lane.b32.xlu0 %v989_v30, %s4008_s19  ;;  %v3616_v30 = vld [vmem:[%s4050_s17 + $0x48] sm:$0xf] }
  0xb3   : > { %v704_v38 = vpop.permute.xlu1 %703 }
  0xb4   : > { %784 = vst.msk [vmem:[#allocation2 + $0x40] sm:$0xf] %vm767_vm7, %v704_v38  ;;  %v702_v40 = vpop.permute.xlu0 %701  ;;  %v3624_v38 = vld [vmem:[%s4050_s17 + $0x78] sm:$0xf] }
  0xb5   : > { %783 = vst.msk [vmem:[#allocation2 + $0x3c] sm:$0xf] %vm767_vm7, %v702_v40  ;;  %1059 = vrot.lane.b32.xlu2 %v986_v43, %s4008_s19  ;;  %v3627_v43 = vld [vmem:[%s4050_s17 + $0x88] sm:$0xf] }
  0xb7   : > { %v718_v52 = vpop.permute.xlu2 %717 }
  0xb8   : > { %791 = vst.msk [vmem:[#allocation2 + $0x5c] sm:$0xf] %vm767_vm7, %v718_v52 }
  0xb9   : > { %1069 = vrot.lane.b32.xlu1 %v1003_v45, %s4008_s19 }
  0xba   : > { %1067 = vrot.lane.b32.xlu0 %v1000_v47, %s4008_s19 }
  0xbb   : > { %v710_v53 = vpop.permute.xlu1 %709 }
  0xbc   : > { %787 = vst.msk [vmem:[#allocation2 + $0x4c] sm:$0xf] %vm767_vm7, %v710_v53  ;;  %v708_v57 = vpop.permute.xlu0 %707  ;;  %v3638_v53 = vld [vmem:[%s4050_s17 + $0xc] sm:$0xf] }
  0xbd   : > { %786 = vst.msk [vmem:[#allocation2 + $0x48] sm:$0xf] %vm767_vm7, %v708_v57  ;;  %1065 = vrot.lane.b32.xlu2 %v996_v60, %s4008_s19  ;;  %v1396_v57 = vshrl.u32 %v3639_v51, 16  ;;  %v1383_v60 = vshrl.u32 %v3638_v53, 16  ;;  %v1386_v61 = vshll.u32 %v3638_v53, 16 }
  0xbe   : > { %v3649_v53 = vld [vmem:[%s4050_s17 + $0x38] sm:$0x1] }
  0xbf   : > { %v724_v2 = vpop.permute.xlu2 %723  ;;  %v1398_v1 = vrot.slane %v1396_v57, 4 }
  0xc0   : > { %794 = vst.msk [vmem:[#allocation2 + $0x68] sm:$0xf] %vm767_vm7, %v724_v2  ;;  %v1385_v2 = vrot.slane %v1383_v60, 4 }
  0xc1   : > { %1205 = vrot.lane.b32.xlu1 %v3606_v62, %s4009_s20  ;;  %v3633_v62 = vld [vmem:[%s4050_s17 + $0xac] sm:$0xf] }
  0xc2   : > { %1073 = vrot.lane.b32.xlu0 %v1010_v0, %s4008_s19  ;;  %v4577_v0 = vrot.slane %v1392_v56, 5 }
  0xc3   : > { %v716_v3 = vpop.permute.xlu1 %715 }
  0xc4   : > { %790 = vst.msk [vmem:[#allocation2 + $0x58] sm:$0xf] %vm767_vm7, %v716_v3  ;;  %v714_v4 = vpop.permute.xlu0 %713  ;;  %v1388_v3 = vrot.slane %v1386_v61, 5 }
  0xc5   : > { %789 = vst.msk [vmem:[#allocation2 + $0x54] sm:$0xf] %vm767_vm7, %v714_v4  ;;  %1071 = vrot.lane.b32.xlu2 %v1007_v6, %s4008_s19  ;;  %v3640_v4 = vld [vmem:[%s4050_s17 + $0x14] sm:$0x1] }
  0xc7   : > { %v730_v11 = vpop.permute.xlu2 %729 }
  0xc8   : > { %797 = vst.msk [vmem:[#allocation2 + $0x74] sm:$0xf] %vm767_vm7, %v730_v11 }
  0xc9   : > { %1211 = vrot.lane.b32.xlu1 %v3609_v7, %s4009_s20 }
  0xca   : > { %1209 = vrot.lane.b32.xlu0 %v3608_v8, %s4009_s20  ;;  %v3644_v8 = vld [vmem:[%s4050_s17 + $0x24] sm:$0xf] }
  0xcb   : > { %v722_v12 = vpop.permute.xlu1 %721 }
  0xcc   : > { %793 = vst.msk [vmem:[#allocation2 + $0x64] sm:$0xf] %vm767_vm7, %v722_v12  ;;  %v720_v13 = vpop.permute.xlu0 %719  ;;  %v1399_v12 = vor.u32 %v1398_v1, %v4577_v0 }
  0xcd   : > { %792 = vst.msk [vmem:[#allocation2 + $0x60] sm:$0xf] %vm767_vm7, %v720_v13  ;;  %1207 = vrot.lane.b32.xlu2 %v3607_v14, %s4009_s20  ;;  %v3642_v13 = vld [vmem:[%s4050_s17 + $0x1c] sm:$0xf]  ;;  %v1402_v14 = vshll.u32 %v3640_v4, 16 }
  0xcf   : > { %v1012_v17 = vpop.permute.xlu2 %1011 }
  0xd0   : > { %1108 = vst.msk [vmem:[#allocation2] sm:$0xf] %vm1107_vm8, %v1012_v17  ;;  %v3636_v17 = vld [vmem:[%s4050_s17 + $0xc0] sm:$0xf] }
  0xd1   : > { %1217 = vrot.lane.b32.xlu1 %v3612_v15, %s4009_s20  ;;  %v1389_v15 = vor.u32 %v1388_v3, %v1385_v2  ;;  %v1474_v3 = vshll.u32 %v3649_v53, 16  ;;  %v3658_v53 = vld [vmem:[%s4050_s17 + $0x5c] sm:$0x1] }
  0xd2   : > { %1215 = vrot.lane.b32.xlu0 %v3611_v16, %s4009_s20  ;;  %v3631_v16 = vld [vmem:[%s4050_s17 + $0xa0] sm:$0xf] }
  0xd3   : > { %v728_v18 = vpop.permute.xlu1 %727 }
  0xd4   : > { %796 = vst.msk [vmem:[#allocation2 + $0x70] sm:$0xf] %vm767_vm7, %v728_v18  ;;  %v726_v19 = vpop.permute.xlu0 %725  ;;  %v1431_v18 = vshrl.u32 %v3644_v8, 16 }
  0xd5   : > { %795 = vst.msk [vmem:[#allocation2 + $0x6c] sm:$0xf] %vm767_vm7, %v726_v19  ;;  %1213 = vrot.lane.b32.xlu2 %v3610_v5, %s4009_s20  ;;  %v1434_v19 = vshll.u32 %v3644_v8, 16  ;;  %v3635_v5 = vld [vmem:[%s4050_s17 + $0xb8] sm:$0xf] }
  0xd6   : > { %v3637_v8 = vld [vmem:[%s4050_s17 + $0xc4] sm:$0xf] }
  0xd7   : > { %v1018_v22 = vpop.permute.xlu2 %1017 }
  0xd8   : > { %1111 = vst.msk [vmem:[#allocation2 + $0xc] sm:$0xf] %vm1107_vm8, %v1018_v22  ;;  %v1400_v22 = vrot.slane %v1399_v12, 4 }
  0xd9   : > { %1223 = vrot.lane.b32.xlu1 %v3615_v20, %s4009_s20  ;;  %v1416_v20 = vshll.u32 %v3642_v13, 16 }
  0xda   : > { %1221 = vrot.lane.b32.xlu0 %v3614_v21, %s4009_s20  ;;  %v1420_v21 = vshrl.u32 %v3642_v13, 16 }
  0xdb   : > { %v734_v23 = vpop.permute.xlu1 %733 }
  0xdc   : > { %799 = vst.msk [vmem:[#allocation2 + $0x7c] sm:$0xf] %vm767_vm7, %v734_v23  ;;  %v732_v24 = vpop.permute.xlu0 %731  ;;  %v1404_v23 = vrot.slane %v1402_v14, 5 }
  0xdd   : > { %798 = vst.msk [vmem:[#allocation2 + $0x78] sm:$0xf] %vm767_vm7, %v732_v24  ;;  %1219 = vrot.lane.b32.xlu2 %v3613_v26, %s4009_s20  ;;  %v1390_v24 = vrot.slane %v1389_v15, 4  ;;  %v3648_v26 = vld [vmem:[%s4050_s17 + $0x34] sm:$0xf] }
  0xdf   : > { %v1024_v28 = vpop.permute.xlu2 %1023 }
  0xe0   : > { %1114 = vst.msk [vmem:[#allocation2 + $0x18] sm:$0xf] %vm1107_vm8, %v1024_v28  ;;  %v1433_v28 = vrot.slane %v1431_v18, 4  ;;  %v1476_v18 = vrot.slane %v1474_v3, 5 }
  0xe1   : > { %1229 = vrot.lane.b32.xlu1 %v3618_v27, %s4009_s20  ;;  %v3647_v27 = vld [vmem:[%s4050_s17 + $0x30] sm:$0xf] }
  0xe2   : > { %1227 = vrot.lane.b32.xlu0 %v3617_v10, %s4009_s20  ;;  %v4597_v10 = vld [vmem:[%s4050_s17 + $0x28] sm:$0xf] }
  0xe3   : > { %v1016_v29 = vpop.permute.xlu1 %1015 }
  0xe4   : > { %1110 = vst.msk [vmem:[#allocation2 + $0x8] sm:$0xf] %vm1107_vm8, %v1016_v29  ;;  %v1014_v9 = vpop.permute.xlu0 %1013  ;;  %v1436_v29 = vrot.slane %v1434_v19, 5 }
  0xe5   : > { %1109 = vst.msk [vmem:[#allocation2 + $0x4] sm:$0xf] %vm1107_vm8, %v1014_v9  ;;  %1225 = vrot.lane.b32.xlu2 %v3616_v30, %s4009_s20  ;;  %v3641_v30 = vld [vmem:[%s4050_s17 + $0x18] sm:$0xf] }
  0xe7   : > { %v1030_v33 = vpop.permute.xlu2 %1029 }
  0xe8   : > { %1117 = vst.msk [vmem:[#allocation2 + $0x24] sm:$0xf] %vm1107_vm8, %v1030_v33  ;;  %v4601_v33 = vrot.slane %v1416_v20, 5  ;;  %v3657_v20 = vld [vmem:[%s4050_s17 + $0x58] sm:$0xf] }
  0xe9   : > { %1235 = vrot.lane.b32.xlu1 %v3621_v31, %s4009_s20 }
  0xea   : > { %1233 = vrot.lane.b32.xlu0 %v3620_v32, %s4009_s20  ;;  %v3643_v32 = vld [vmem:[%s4050_s17 + $0x20] sm:$0x1] }
  0xeb   : > { %v1022_v34 = vpop.permute.xlu1 %1021 }
  0xec   : > { %1113 = vst.msk [vmem:[#allocation2 + $0x14] sm:$0xf] %vm1107_vm8, %v1022_v34  ;;  %v1020_v35 = vpop.permute.xlu0 %1019  ;;  %v1422_v34 = vrot.slane %v1420_v21, 4 }
  0xed   : > { %1112 = vst.msk [vmem:[#allocation2 + $0x10] sm:$0xf] %vm1107_vm8, %v1020_v35  ;;  %1231 = vrot.lane.b32.xlu2 %v3619_v37, %s4009_s20  ;;  %v1464_v37 = vshll.u32 %v3648_v26, 16 }
  0xef   : > { %v1036_v36 = vpop.permute.xlu2 %1035 }
  0xf0   : > { %1120 = vst.msk [vmem:[#allocation2 + $0x30] sm:$0xf] %vm1107_vm8, %v1036_v36  ;;  %v1458_v36 = vshll.u32 %v3647_v27, 16 }
  0xf1   : > { %1241 = vrot.lane.b32.xlu1 %v3624_v38, %s4009_s20  ;;  %v1468_v38 = vshrl.u32 %v3648_v26, 16  ;;  %v4642_v26 = vld [vmem:[%s4050_s17 + $0x4c] sm:$0xf] }
  0xf2   : > { %1239 = vrot.lane.b32.xlu0 %v3623_v39, %s4009_s20  ;;  %v1455_v39 = vshrl.u32 %v3647_v27, 16 }
  0xf3   : > { %v1028_v40 = vpop.permute.xlu1 %1027 }
  0xf4   : > { %1116 = vst.msk [vmem:[#allocation2 + $0x20] sm:$0xf] %vm1107_vm8, %v1028_v40  ;;  %v1026_v41 = vpop.permute.xlu0 %1025  ;;  %v3634_v40 = vld [vmem:[%s4050_s17 + $0xb4] sm:$0xf]  ;;  %v1457_v51 = vrot.slane %v1455_v39, 4 }
  0xf5   : > { %1115 = vst.msk [vmem:[#allocation2 + $0x1c] sm:$0xf] %vm1107_vm8, %v1026_v41  ;;  %1237 = vrot.lane.b32.xlu2 %v3622_v42, %s4009_s20  ;;  %v1407_v41 = vshrl.u32 %v3641_v30, 16  ;;  %v1410_v42 = vshll.u32 %v3641_v30, 16  ;;  %v3652_v30 = vld [vmem:[%s4050_s17 + $0x44] sm:$0x1] }
  0xf7   : > { %v1042_v45 = vpop.permute.xlu2 %1041  ;;  %v1412_v56 = vrot.slane %v1410_v42, 5 }
  0xf8   : > { %1123 = vst.msk [vmem:[#allocation2 + $0x3c] sm:$0xf] %vm1107_vm8, %v1042_v45  ;;  %v1440_v45 = vshll.u32 %v4597_v10, 16 }
  0xf9   : > { %1247 = vrot.lane.b32.xlu1 %v3627_v43, %s4009_s20  ;;  %v1405_v43 = vsel %vm4061_vm2, %v1400_v22, %v1404_v23  ;;  %v3656_v22 = vld [vmem:[%s4050_s17 + $0x54] sm:$0xf] }
  0xfa   : > { %1245 = vrot.lane.b32.xlu0 %v3626_v44, %s4009_s20  ;;  %v1437_v44 = vor.u32 %v1436_v29, %v1433_v28  ;;  %v3646_v29 = vld [vmem:[%s4050_s17 + $0x2c] sm:$0x1] }
  0xfb   : > { %v1034_v46 = vpop.permute.xlu1 %1033  ;;  %v1450_v42 = vshll.u32 %v3646_v29, 16  ;;  %v3659_v29 = vld [vmem:[%s4050_s17 + $0x60] sm:$0xf] }
  0xfc   : > { %1119 = vst.msk [vmem:[#allocation2 + $0x2c] sm:$0xf] %vm1107_vm8, %v1034_v46  ;;  %v1032_v47 = vpop.permute.xlu0 %1031  ;;  %v1395_v46 = vsel %vm4061_vm2, %v1390_v24, %v4577_v0  ;;  %v1438_v57 = vrot.slane %v1437_v44, 4  ;;  %v3651_v0 = vld [vmem:[%s4050_s17 + $0x40] sm:$0xf] }
  0xfd   : > { %1118 = vst.msk [vmem:[#allocation2 + $0x28] sm:$0xf] %vm1107_vm8, %v1032_v47  ;;  %1243 = vrot.lane.b32.xlu2 %v3625_v48, %s4009_s20  ;;  %v1423_v47 = vor.u32 %v1422_v34, %v4601_v33  ;;  %v1426_v48 = vshll.u32 %v3643_v32, 16  ;;  %v1488_v14 = vshll.u32 %v3651_v0, 16  ;;  %v3650_v24 = vld [vmem:[%s4050_s17 + $0x3c] sm:$0xf] }
  0xfe   : > { %v1536_v32 = vshll.u32 %v3657_v20, 16  ;;  %v1482_v39 = vshll.u32 %v3650_v24, 16 }
  0xff   : > { %v1048_v52 = vpop.permute.xlu2 %1047 }
 0x100   : > { %1126 = vst.msk [vmem:[#allocation2 + $0x48] sm:$0xf] %vm1107_vm8, %v1048_v52  ;;  %v1460_v52 = vrot.slane %v1458_v36, 5 }
 0x101   : > { %1253 = vrot.lane.b32.xlu1 %v3630_v49, %s4009_s20  ;;  %v4615_v49 = vrot.slane %v1464_v37, 5  ;;  %v1527_v37 = vshrl.u32 %v3656_v22, 16 }
 0x102   : > { %1251 = vrot.lane.b32.xlu0 %v3629_v50, %s4009_s20  ;;  %v1470_v50 = vrot.slane %v1468_v38, 4  ;;  %v1461_v4 = vor.u32 %v1460_v52, %v1457_v51  ;;  %v1479_v38 = vshrl.u32 %v3650_v24, 16  ;;  %v1484_v52 = vrot.slane %v1482_v39, 5  ;;  %v3665_v39 = vld [vmem:[%s4050_s17 + $0x78] sm:$0xf] }
 0x103   : > { %v1040_v54 = vpop.permute.xlu1 %1039 }
 0x104   : > { %1122 = vst.msk [vmem:[#allocation2 + $0x38] sm:$0xf] %vm1107_vm8, %v1040_v54  ;;  %v1038_v55 = vpop.permute.xlu0 %1037  ;;  %v3653_v54 = vld [vmem:[%s4050_s17 + $0x48] sm:$0xf]  ;;  %v1471_v2 = vor.u32 %v1470_v50, %v4615_v49  ;;  %v1462_v19 = vrot.slane %v1461_v4, 4  ;;  %v1481_v51 = vrot.slane %v1479_v38, 4 }
 0x105   : > { %1121 = vst.msk [vmem:[#allocation2 + $0x34] sm:$0xf] %vm1107_vm8, %v1038_v55  ;;  %1249 = vrot.lane.b32.xlu2 %v3628_v59, %s4009_s20  ;;  %v1409_v55 = vrot.slane %v1407_v41, 4  ;;  %v4621_v59 = vrot.slane %v1440_v45, 5  ;;  %v1506_v13 = vshll.u32 %v3653_v54, 16  ;;  %v1512_v45 = vshll.u32 %v4642_v26, 16 }
 0x106   : > { %v1546_v4 = vshll.u32 %v3658_v53, 16 }
 0x107   : > { %v1054_v6 = vpop.permute.xlu2 %1053  ;;  %v1443_v12 = vsel %vm4061_vm2, %v1438_v57, %v4621_v59  ;;  %v1508_v27 = vrot.slane %v1506_v13, 5 }
 0x108   : > { %1129 = vst.msk [vmem:[#allocation2 + $0x54] sm:$0xf] %vm1107_vm8, %v1054_v6  ;;  %v1503_v6 = vshrl.u32 %v3653_v54, 16  ;;  %v1529_v54 = vrot.slane %v1527_v37, 4 }
 0x109   : > { %1259 = vrot.lane.b32.xlu1 %v3633_v62, %s4009_s20  ;;  %v1424_v62 = vrot.slane %v1423_v47, 4 }
 0x10a   : > { %1257 = vrot.lane.b32.xlu0 %v3632_v63, %s4009_s20  ;;  %v1428_v63 = vrot.slane %v1426_v48, 5  ;;  %v1498_v48 = vshll.u32 %v3652_v30, 16  ;;  %v3661_v30 = vld [vmem:[%s4050_s17 + $0x68] sm:$0x1] }
 0x10b   : > { %v1046_v7 = vpop.permute.xlu1 %1045 }
 0x10c   : > { %1125 = vst.msk [vmem:[#allocation2 + $0x44] sm:$0xf] %vm1107_vm8, %v1046_v7  ;;  %v1044_v11 = vpop.permute.xlu0 %1043  ;;  %v1444_v7 = vshrl.u32 %v4597_v10, 16  ;;  %v1429_v15 = vsel %vm4061_vm2, %v1424_v62, %v1428_v63  ;;  %v4644_v10 = vrot.slane %v1488_v14, 5 }
 0x10d   : > { %1124 = vst.msk [vmem:[#allocation2 + $0x40] sm:$0xf] %vm1107_vm8, %v1044_v11  ;;  %1255 = vrot.lane.b32.xlu2 %v3631_v16, %s4009_s20  ;;  %v1413_v11 = vor.u32 %v1412_v56, %v1409_v55  ;;  %v1492_v16 = vshrl.u32 %v3651_v0, 16  ;;  %v1500_v0 = vrot.slane %v1498_v48, 5  ;;  %v1599_v48 = vshrl.u32 %v3665_v39, 16 }
 0x10e   : > { %v1446_v23 = vrot.slane %v1444_v7, 4  ;;  %v1485_v7 = vor.u32 %v1484_v52, %v1481_v51  ;;  %v3667_v51 = vld [vmem:[%s4050_s17 + $0x80] sm:$0x1] }
 0x10f   : > { %v1060_v9 = vpop.permute.xlu2 %1059  ;;  %v1414_v21 = vrot.slane %v1413_v11, 4 }
 0x110   : > { %1132 = vst.msk [vmem:[#allocation2 + $0x60] sm:$0xf] %vm1107_vm8, %v1060_v9  ;;  %v1447_v41 = vor.u32 %v1446_v23, %v4621_v59  ;;  %v4668_v59 = vrot.slane %v1512_v45, 5  ;;  %v3666_v23 = vld [vmem:[%s4050_s17 + $0x7c] sm:$0xf] }
 0x111   : > { %1265 = vrot.lane.b32.xlu1 %v3636_v17, %s4009_s20  ;;  %v1472_v17 = vrot.slane %v1471_v2, 4  ;;  %v1419_v36 = vsel %vm4061_vm2, %v1414_v21, %v4601_v33  ;;  %v4663_v33 = vrot.slane %v1536_v32, 5  ;;  %v1516_v2 = vshrl.u32 %v4642_v26, 16  ;;  %v4689_v26 = vld [vmem:[%s4050_s17 + $0x70] sm:$0xf] }
 0x112   : > { %1263 = vrot.lane.b32.xlu0 %v3635_v5, %s4009_s20  ;;  %v1505_v5 = vrot.slane %v1503_v6, 4  ;;  %v1448_v56 = vrot.slane %v1447_v41, 4  ;;  %v3660_v6 = vld [vmem:[%s4050_s17 + $0x64] sm:$0xf]  ;;  %v1608_v37 = vshll.u32 %v3666_v23, 16  ;;  %v1612_v38 = vshrl.u32 %v3666_v23, 16 }
 0x113   : > { %v1052_v31 = vpop.permute.xlu1 %1051  ;;  %v1518_v24 = vrot.slane %v1516_v2, 4  ;;  %v1551_v41 = vshrl.u32 %v3659_v29, 16  ;;  %v1584_v45 = vshll.u32 %v4689_v26, 16 }
 0x114   : > { %1128 = vst.msk [vmem:[#allocation2 + $0x50] sm:$0xf] %vm1107_vm8, %v1052_v31  ;;  %v1050_v35 = vpop.permute.xlu0 %1049  ;;  %v1494_v31 = vrot.slane %v1492_v16, 4  ;;  %v1509_v44 = vor.u32 %v1508_v27, %v1505_v5  ;;  %v1560_v16 = vshll.u32 %v3660_v6, 16  ;;  %v1486_v5 = vrot.slane %v1485_v7, 4 }
 0x115   : > { %1127 = vst.msk [vmem:[#allocation2 + $0x4c] sm:$0xf] %vm1107_vm8, %v1050_v35  ;;  %1261 = vrot.lane.b32.xlu2 %v3634_v40, %s4009_s20  ;;  %v1540_v35 = vshrl.u32 %v3657_v20, 16  ;;  %v1530_v40 = vshll.u32 %v3656_v22, 16  ;;  %v4713_v52 = vrot.slane %v1608_v37, 5  ;;  %v1614_v53 = vrot.slane %v1612_v38, 4 }
 0x116   : > { %v1495_v47 = vor.u32 %v1494_v31, %v4644_v10  ;;  %v1510_v57 = vrot.slane %v1509_v44, 4  ;;  %v4694_v31 = vrot.slane %v1560_v16, 5 }
 0x117   : > { %v1066_v60 = vpop.permute.xlu2 %1065  ;;  %v1542_v50 = vrot.slane %v1540_v35, 4  ;;  %v1532_v55 = vrot.slane %v1530_v40, 5  ;;  %v1491_v35 = vsel %vm4061_vm2, %v1486_v5, %v4644_v10 }
 0x118   : > { %1135 = vst.msk [vmem:[#allocation2 + $0x6c] sm:$0xf] %vm1107_vm8, %v1066_v60  ;;  %v1496_v63 = vrot.slane %v1495_v47, 4  ;;  %v1515_v14 = vsel %vm4061_vm2, %v1510_v57, %v4668_v59 }
 0x119   : > { %1768 = vrot.lane.b32.xlu1 %v1405_v43, %s4010_s21  ;;  %v1477_v43 = vsel %vm4061_vm2, %v1472_v17, %v1476_v18  ;;  %v1543_v3 = vor.u32 %v1542_v50, %v4663_v33  ;;  %v1564_v17 = vshrl.u32 %v3660_v6, 16  ;;  %v1602_v50 = vshll.u32 %v3665_v39, 16 }
 0x11a   : > { %1766 = vrot.lane.b32.xlu0 %v1395_v46, %s4010_s21  ;;  %v1467_v46 = vsel %vm4061_vm2, %v1462_v19, %v4615_v49  ;;  %v1452_v49 = vrot.slane %v1450_v42, 5  ;;  %v1548_v19 = vrot.slane %v1546_v4, 5  ;;  %v1554_v42 = vshll.u32 %v3659_v29, 16  ;;  %v3670_v29 = vld [vmem:[%s4050_s17 + $0x8c] sm:$0x1] }
 0x11b   : > { %v1058_v61 = vpop.permute.xlu1 %1057  ;;  %v1544_v18 = vrot.slane %v1543_v3, 4  ;;  %v1566_v32 = vrot.slane %v1564_v17, 4  ;;  %v1604_v2 = vrot.slane %v1602_v50, 5  ;;  %v1615_v4 = vor.u32 %v1614_v53, %v4713_v52 }
 0x11c   : > { %1131 = vst.msk [vmem:[#allocation2 + $0x5c] sm:$0xf] %vm1107_vm8, %v1058_v61  ;;  %v1056_v1 = vpop.permute.xlu0 %1055  ;;  %v3662_v61 = vld [vmem:[%s4050_s17 + $0x6c] sm:$0xf]  ;;  %v1453_v11 = vsel %vm4061_vm2, %v1448_v56, %v1452_v49  ;;  %v3671_v56 = vld [vmem:[%s4050_s17 + $0x90] sm:$0xf] }
 0x11d   : > { %1130 = vst.msk [vmem:[#allocation2 + $0x58] sm:$0xf] %vm1107_vm8, %v1056_v1  ;;  %1267 = vrot.lane.b32.xlu2 %v3637_v8, %s4009_s20  ;;  %v1533_v8 = vor.u32 %v1532_v55, %v1529_v54  ;;  %v1578_v13 = vshll.u32 %v3662_v61, 16  ;;  %v1567_v47 = vor.u32 %v1566_v32, %v4694_v31  ;;  %v1553_v49 = vrot.slane %v1551_v41, 4 }
 0x11e   : > { %v1556_v57 = vrot.slane %v1554_v42, 5  ;;  %v1647_v6 = vshrl.u32 %v3671_v56, 16  ;;  %v1650_v7 = vshll.u32 %v3671_v56, 16  ;;  %v1642_v50 = vshll.u32 %v3670_v29, 16 }
 0x11f   : > { %v1072_v28 = vpop.permute.xlu2 %1071  ;;  %v1534_v20 = vrot.slane %v1533_v8, 4  ;;  %v1580_v22 = vrot.slane %v1578_v13, 5  ;;  %v3669_v8 = vld [vmem:[%s4050_s17 + $0x88] sm:$0xf] }
 0x120   : > { %1138 = vst.msk [vmem:[#allocation2 + $0x78] sm:$0xf] %vm1107_vm8, %v1072_v28  ;;  %v3655_v28 = vld [vmem:[%s4050_s17 + $0x50] sm:$0x1]  ;;  %v1557_v13 = vor.u32 %v1556_v57, %v1553_v49  ;;  %v1632_v17 = vshll.u32 %v3669_v8, 16 }
 0x121   : > { %1774 = vrot.lane.b32.xlu1 %v1443_v12, %s4010_s21  ;;  %v1575_v12 = vshrl.u32 %v3662_v61, 16  ;;  %v1522_v40 = vshll.u32 %v3655_v28, 16  ;;  %v1539_v10 = vsel %vm4061_vm2, %v1534_v20, %v4663_v33  ;;  %v1649_v20 = vrot.slane %v1647_v6, 4  ;;  %v4740_v28 = vld [vmem:[%s4050_s17 + $0x94] sm:$0xf] }
 0x122   : > { %1772 = vrot.lane.b32.xlu0 %v1429_v15, %s4010_s21  ;;  %v1501_v15 = vsel %vm4061_vm2, %v1496_v63, %v1500_v0  ;;  %v1568_v63 = vrot.slane %v1567_v47, 4  ;;  %v1618_v0 = vshll.u32 %v3667_v51, 16  ;;  %v1558_v23 = vrot.slane %v1557_v13, 4 }
 0x123   : > { %v1064_v9 = vpop.permute.xlu1 %1063  ;;  %v1577_v21 = vrot.slane %v1575_v12, 4  ;;  %v1524_v55 = vrot.slane %v1522_v40, 5  ;;  %v1660_v13 = vshrl.u32 %v4740_v28, 16 }
 0x124   : > { %1134 = vst.msk [vmem:[#allocation2 + $0x68] sm:$0xf] %vm1107_vm8, %v1064_v9  ;;  %v1062_v34 = vpop.permute.xlu0 %1061  ;;  %v1620_v5 = vrot.slane %v1618_v0, 5 }
 0x125   : > { %1133 = vst.msk [vmem:[#allocation2 + $0x64] sm:$0xf] %vm1107_vm8, %v1062_v34  ;;  %1770 = vrot.lane.b32.xlu2 %v1419_v36, %s4010_s21  ;;  %v1519_v36 = vor.u32 %v1518_v24, %v4668_v59  ;;  %v1581_v44 = vor.u32 %v1580_v22, %v1577_v21  ;;  %v4718_v59 = vrot.slane %v1584_v45, 5  ;;  %v1652_v21 = vrot.slane %v1650_v7, 5  ;;  %v3675_v22 = vld [vmem:[%s4050_s17 + $0xa0] sm:$0xf] }
 0x126   : > { %v3674_v24 = vld [vmem:[%s4050_s17 + $0x9c] sm:$0xf]  ;;  %v1680_v38 = vshll.u32 %v3675_v22, 16 }
 0x127   : > { %v1208_v60 = vpop.permute.xlu2 %1207  ;;  %v1520_v54 = vrot.slane %v1519_v36, 4  ;;  %v1582_v33 = vrot.slane %v1581_v44, 4  ;;  %v1684_v36 = vshrl.u32 %v3675_v22, 16  ;;  %v1671_v40 = vshrl.u32 %v3674_v24, 16 }
 0x128   : > { %1303 = vst.msk [vmem:[#allocation2 + $0x4] sm:$0xf] %vm1301_vm9, %v1208_v60  ;;  %v1674_v44 = vshll.u32 %v3674_v24, 16  ;;  %v1653_v47 = vor.u32 %v1652_v21, %v1649_v20 }
 0x129   : > { %1780 = vrot.lane.b32.xlu1 %v1477_v43, %s4010_s21  ;;  %v1549_v43 = vsel %vm4061_vm2, %v1544_v18, %v1548_v19  ;;  %v1525_v12 = vsel %vm4061_vm2, %v1520_v54, %v1524_v55  ;;  %v1636_v18 = vshrl.u32 %v3669_v8, 16  ;;  %v1616_v19 = vrot.slane %v1615_v4, 4  ;;  %v3678_v4 = vld [vmem:[%s4050_s17 + $0xac] sm:$0xf] }
 0x12a   : > { %1778 = vrot.lane.b32.xlu0 %v1467_v46, %s4010_s21  ;;  %v1570_v46 = vshll.u32 %v3661_v30, 16  ;;  %v3664_v30 = vld [vmem:[%s4050_s17 + $0x74] sm:$0x1]  ;;  %v4762_v54 = vrot.slane %v1680_v38, 5  ;;  %v1686_v55 = vrot.slane %v1684_v36, 4  ;;  %v1673_v57 = vrot.slane %v1671_v40, 4 }
 0x12b   : > { %v1070_v62 = vpop.permute.xlu1 %1069  ;;  %v1638_v37 = vrot.slane %v1636_v18, 4  ;;  %v1708_v18 = vshrl.u32 %v3678_v4, 16  ;;  %v3684_v38 = vld [vmem:[%s4050_s17 + $0xc4] sm:$0xf] }
 0x12c   : > { %1137 = vst.msk [vmem:[#allocation2 + $0x74] sm:$0xf] %vm1107_vm8, %v1070_v62  ;;  %v1068_v1 = vpop.permute.xlu0 %1067  ;;  %v1572_v60 = vrot.slane %v1570_v46, 5  ;;  %v1594_v46 = vshll.u32 %v3664_v30, 16  ;;  %v1687_v7 = vor.u32 %v1686_v55, %v4762_v54  ;;  %v3673_v30 = vld [vmem:[%s4050_s17 + $0x98] sm:$0x1] }
 0x12d   : > { %1136 = vst.msk [vmem:[#allocation2 + $0x70] sm:$0xf] %vm1107_vm8, %v1068_v1  ;;  %1776 = vrot.lane.b32.xlu2 %v1453_v11, %s4010_s21  ;;  %v1601_v1 = vrot.slane %v1599_v48, 4  ;;  %v1588_v11 = vshrl.u32 %v4689_v26, 16  ;;  %v1656_v48 = vshll.u32 %v4740_v28, 16  ;;  %v1710_v29 = vrot.slane %v1708_v18, 4 }
 0x12e   : > { %v1688_v20 = vrot.slane %v1687_v7, 4 }
 0x12f   : > { %v1214_v27 = vpop.permute.xlu2 %1213  ;;  %v1605_v16 = vor.u32 %v1604_v2, %v1601_v1  ;;  %v1590_v26 = vrot.slane %v1588_v11, 4 }
 0x130   : > { %1306 = vst.msk [vmem:[#allocation2 + $0x10] sm:$0xf] %vm1301_vm9, %v1214_v27  ;;  %v3668_v27 = vld [vmem:[%s4050_s17 + $0x84] sm:$0xf] }
 0x131   : > { %1786 = vrot.lane.b32.xlu1 %v1515_v14, %s4010_s21  ;;  %v1587_v14 = vsel %vm4061_vm2, %v1582_v33, %v4718_v59  ;;  %v1623_v41 = vshrl.u32 %v3668_v27, 16  ;;  %v1626_v42 = vshll.u32 %v3668_v27, 16  ;;  %v1591_v45 = vor.u32 %v1590_v26, %v4718_v59  ;;  %v4785_v26 = vld [vmem:[%s4050_s17 + $0xb8] sm:$0xf] }
 0x132   : > { %1784 = vrot.lane.b32.xlu0 %v1501_v15, %s4010_s21  ;;  %v1573_v15 = vsel %vm4061_vm2, %v1568_v63, %v1572_v60  ;;  %v1676_v33 = vrot.slane %v1674_v44, 5  ;;  %v1596_v60 = vrot.slane %v1594_v46, 5  ;;  %v1644_v63 = vrot.slane %v1642_v50, 5 }
 0x133   : > { %v1206_v9 = vpop.permute.xlu1 %1205  ;;  %v1625_v56 = vrot.slane %v1623_v41, 4  ;;  %v1628_v49 = vrot.slane %v1626_v42, 5  ;;  %v1592_v59 = vrot.slane %v1591_v45, 4  ;;  %v1662_v27 = vrot.slane %v1660_v13, 4 }
 0x134   : > { %1302 = vst.msk [vmem:[#allocation2] sm:$0xf] %vm1301_vm9, %v1206_v9  ;;  %v1074_v34 = vpop.permute.xlu0 %1073  ;;  %v1728_v41 = vshll.u32 %v4785_v26, 16  ;;  %v1666_v45 = vshll.u32 %v3673_v30, 16  ;;  %v1752_v50 = vshll.u32 %v3684_v38, 16 }
 0x135   : > { %1139 = vst.msk [vmem:[#allocation2 + $0x7c] sm:$0xf] %vm1107_vm8, %v1074_v34  ;;  %1782 = vrot.lane.b32.xlu2 %v1491_v35, %s4010_s21  ;;  %v1606_v34 = vrot.slane %v1605_v16, 4  ;;  %v4744_v35 = vrot.slane %v1632_v17, 5  ;;  %v1704_v17 = vshll.u32 %v3678_v4, 16  ;;  %v1732_v4 = vshrl.u32 %v4785_v26, 16 }
 0x136   : > { %v3689_v30 = vld [vmem:[%s4050_s17 + $0x18] sm:$0xe] }
 0x137   : > { %v1220_v61 = vpop.permute.xlu2 %1219  ;;  %v1611_v51 = vsel %vm4061_vm2, %v1606_v34, %v4713_v52  ;;  %v1639_v53 = vor.u32 %v1638_v37, %v4744_v35  ;;  %v1654_v52 = vrot.slane %v1653_v47, 4  ;;  %v4788_v28 = vrot.slane %v1704_v17, 5  ;;  %v3679_v37 = vld [vmem:[%s4050_s17 + $0xb0] sm:$0x1] }
 0x138   : > { %1309 = vst.msk [vmem:[#allocation2 + $0x1c] sm:$0xf] %vm1301_vm9, %v1220_v61  ;;  %v3680_v61 = vld [vmem:[%s4050_s17 + $0xb4] sm:$0xf] }
 0x139   : > { %1792 = vrot.lane.b32.xlu1 %v1549_v43, %s4010_s21  ;;  %v1563_v43 = vsel %vm4061_vm2, %v1558_v23, %v4694_v31  ;;  %v3676_v31 = vld [vmem:[%s4050_s17 + $0xa4] sm:$0x1]  ;;  %v1640_v2 = vrot.slane %v1639_v53, 4  ;;  %v1719_v8 = vshrl.u32 %v3680_v61, 16  ;;  %v1722_v11 = vshll.u32 %v3680_v61, 16 }
 0x13a   : > { %1790 = vrot.lane.b32.xlu0 %v1539_v10, %s4010_s21  ;;  %v1621_v10 = vsel %vm4061_vm2, %v1616_v19, %v1620_v5  ;;  %v1711_v47 = vor.u32 %v1710_v29, %v4788_v28 }
 0x13b   : > { %v1212_v62 = vpop.permute.xlu1 %1211  ;;  %v1645_v19 = vsel %vm4061_vm2, %v1640_v2, %v1644_v63  ;;  %v1721_v21 = vrot.slane %v1719_v8, 4  ;;  %v1724_v22 = vrot.slane %v1722_v11, 5 }
 0x13c   : > { %1305 = vst.msk [vmem:[#allocation2 + $0xc] sm:$0xf] %vm1301_vm9, %v1212_v62  ;;  %v1210_v3 = vpop.permute.xlu0 %1209  ;;  %v4767_v62 = vrot.slane %v1656_v48, 5  ;;  %v1714_v48 = vshll.u32 %v3679_v37, 16  ;;  %v3688_v37 = vld [vmem:[%s4050_s17 + $0x14] sm:$0x1] }
 0x13d   : > { %1304 = vst.msk [vmem:[#allocation2 + $0x8] sm:$0xf] %vm1301_vm9, %v1210_v3  ;;  %1788 = vrot.lane.b32.xlu2 %v1525_v12, %s4010_s21  ;;  %v1690_v3 = vshll.u32 %v3676_v31, 16  ;;  %v1629_v12 = vor.u32 %v1628_v49, %v1625_v56  ;;  %v1725_v40 = vor.u32 %v1724_v22, %v1721_v21  ;;  %v1730_v56 = vrot.slane %v1728_v41, 5 }
 0x13e   : > { %v1659_v16 = vsel %vm4061_vm2, %v1654_v52, %v4767_v62  ;;  %v1663_v44 = vor.u32 %v1662_v27, %v4767_v62  ;;  %v1716_v61 = vrot.slane %v1714_v48, 5  ;;  %v1754_v52 = vrot.slane %v1752_v50, 5  ;;  %v3686_v48 = vld [vmem:[%s4050_s17 + $0xc] sm:$0xe] }
 0x13f   : > { %v1226_v9 = vpop.permute.xlu2 %1225  ;;  %v1692_v5 = vrot.slane %v1690_v3, 5  ;;  %v1630_v23 = vrot.slane %v1629_v12, 4 }
 0x140   : > { %1312 = vst.msk [vmem:[#allocation2 + $0x28] sm:$0xf] %vm1301_vm9, %v1226_v9  ;;  %v1664_v49 = vrot.slane %v1663_v44, 4  ;;  %v3693_v44 = vld [vmem:[%s4050_s17 + $0x28] sm:$0xf] }
 0x141   : > { %1798 = vrot.lane.b32.xlu1 %v1587_v14, %s4010_s21  ;;  %v1677_v14 = vor.u32 %v1676_v33, %v1673_v57  ;;  %v1693_v36 = vsel %vm4061_vm2, %v1688_v20, %v1692_v5  ;;  %v1635_v42 = vsel %vm4061_vm2, %v1630_v23, %v4744_v35  ;;  %v1726_v35 = vrot.slane %v1725_v40, 4  ;;  %v3682_v5 = vld [vmem:[%s4050_s17 + $0xbc] sm:$0x1]  ;;  %v3687_v23 = vld [vmem:[%s4050_s17 + $0x10] sm:$0xf] }
 0x142   : > { %1796 = vrot.lane.b32.xlu0 %v1573_v15, %s4010_s21  ;;  %v1597_v15 = vsel %vm4061_vm2, %v1592_v59, %v1596_v60  ;;  %v1668_v57 = vrot.slane %v1666_v45, 5  ;;  %v1712_v60 = vrot.slane %v1711_v47, 4  ;;  %v1738_v27 = vshll.u32 %v3682_v5, 16  ;;  %v3703_v5 = vld [vmem:[%s4050_s17 + $0x50] sm:$0x1] }
 0x143   : > { %v1218_v32 = vpop.permute.xlu1 %1217  ;;  %v1678_v24 = vrot.slane %v1677_v14, 4  ;;  %v1731_v8 = vsel %vm4061_vm2, %v1726_v35, %v1730_v56  ;;  %v2007_v47 = vrot.slane %v3693_v44, 5 }
 0x144   : > { %1308 = vst.msk [vmem:[#allocation2 + $0x18] sm:$0xf] %vm1301_vm9, %v1218_v32  ;;  %v1216_v39 = vpop.permute.xlu0 %1215  ;;  %v3677_v32 = vld [vmem:[%s4050_s17 + $0xa8] sm:$0xf]  ;;  %v1717_v13 = vsel %vm4061_vm2, %v1712_v60, %v1716_v61 }
 0x145   : > { %1307 = vst.msk [vmem:[#allocation2 + $0x14] sm:$0xf] %vm1301_vm9, %v1216_v39  ;;  %1794 = vrot.lane.b32.xlu2 %v1563_v43, %s4010_s21  ;;  %v3683_v43 = vld [vmem:[%s4050_s17 + $0xc0] sm:$0xf]  ;;  %v1695_v46 = vshrl.u32 %v3677_v32, 16  ;;  %v1683_v53 = vsel %vm4061_vm2, %v1678_v24, %v4762_v54 }
 0x146   : > { %v1743_v31 = vshrl.u32 %v3683_v43, 16  ;;  %v1746_v55 = vshll.u32 %v3683_v43, 16  ;;  %v1996_v43 = vrot.slane %v3688_v37, 5 }
 0x147   : > { %v1232_v0 = vpop.permute.xlu2 %1231  ;;  %v1697_v33 = vrot.slane %v1695_v46, 4 }
 0x148   : > { %1315 = vst.msk [vmem:[#allocation2 + $0x34] sm:$0xf] %vm1301_vm9, %v1232_v0  ;;  %v3685_v0 = vld [vmem:[%s4050_s17 + $0xc8] sm:$0x1]  ;;  %v1748_v2 = vrot.slane %v1746_v55, 5  ;;  %v2009_v55 = vrot.slane %v2007_v47, 4 }
 0x149   : > { %1804 = vrot.lane.b32.xlu1 %v1621_v10, %s4010_s21  ;;  %v1698_v10 = vshll.u32 %v3677_v32, 16  ;;  %v1762_v12 = vshll.u32 %v3685_v0, 16  ;;  %v3690_v32 = vld [vmem:[%s4050_s17 + $0x1c] sm:$0xf] }
 0x14a   : > { %1802 = vrot.lane.b32.xlu0 %v1611_v51, %s4010_s21  ;;  %v1756_v51 = vshrl.u32 %v3684_v38, 16 }
 0x14b   : > { %v1224_v1 = vpop.permute.xlu1 %1223  ;;  %v1700_v59 = vrot.slane %v1698_v10, 5  ;;  %v1764_v18 = vrot.slane %v1762_v12, 5 }
 0x14c   : > { %1311 = vst.msk [vmem:[#allocation2 + $0x24] sm:$0xf] %vm1301_vm9, %v1224_v1  ;;  %v1222_v6 = vpop.permute.xlu0 %1221  ;;  %v1758_v62 = vrot.slane %v1756_v51, 4  ;;  %v1745_v1 = vrot.slane %v1743_v31, 4  ;;  %v3694_v51 = vld [vmem:[%s4050_s17 + $0x2c] sm:$0x1] }
 0x14d   : > { %1310 = vst.msk [vmem:[#allocation2 + $0x20] sm:$0xf] %vm1301_vm9, %v1222_v6  ;;  %1800 = vrot.lane.b32.xlu2 %v1597_v15, %s4010_s21  ;;  %v1669_v6 = vsel %vm4061_vm2, %v1664_v49, %v1668_v57  ;;  %v1701_v7 = vor.u32 %v1700_v59, %v1697_v33  ;;  %v3734_v31 = vrot.slane %v3686_v48, 9  ;;  %v2010_v35 = vrot.slane %v3694_v51, 5  ;;  %v3696_v59 = vld [vmem:[%s4050_s17 + $0x34] sm:$0xf] }
 0x14e   : > { %v1759_v11 = vor.u32 %v1758_v62, %v1754_v52  ;;  %v1749_v14 = vor.u32 %v1748_v2, %v1745_v1  ;;  %v2014_v0 = vrot.slane %v3696_v59, 5  ;;  %v3697_v1 = vld [vmem:[%s4050_s17 + $0x38] sm:$0x1] }
 0x14f   : > { %v1238_v9 = vpop.permute.xlu2 %1237  ;;  %v1702_v15 = vrot.slane %v1701_v7, 4  ;;  %v2011_v61 = vsel %vm4251_vm5, %v2009_v55, %v2010_v35  ;;  %v2017_v12 = vrot.slane %v3697_v1, 5  ;;  %v3712_v35 = vld [vmem:[%s4050_s17 + $0x74] sm:$0x1] }
 0x150   : > { %1318 = vst.msk [vmem:[#allocation2 + $0x40] sm:$0xf] %vm1301_vm9, %v1238_v9  ;;  %v1760_v17 = vrot.slane %v1759_v11, 4  ;;  %v1750_v21 = vrot.slane %v1749_v14, 4  ;;  %v2016_v11 = vrot.slane %v2014_v0, 4 }
 0x151   : > { %1810 = vrot.lane.b32.xlu1 %v1659_v16, %s4010_s21  ;;  %v1734_v16 = vrot.slane %v1732_v4, 4  ;;  %v1707_v24 = vsel %vm4061_vm2, %v1702_v15, %v4788_v28  ;;  %v3735_v28 = vrot.slane %v3689_v30, 9 }
 0x152   : > { %1808 = vrot.lane.b32.xlu0 %v1645_v19, %s4010_s21  ;;  %v1765_v29 = vsel %vm4061_vm2, %v1760_v17, %v1764_v18  ;;  %v1755_v9 = vsel %vm4061_vm2, %v1750_v21, %v1754_v52  ;;  %v3691_v52 = vld [vmem:[%s4050_s17 + $0x20] sm:$0x1]  ;;  %v3695_v18 = vld [vmem:[%s4050_s17 + $0x30] sm:$0xe] }
 0x153   : > { %v1230_v34 = vpop.permute.xlu1 %1229  ;;  %v1735_v26 = vor.u32 %v1734_v16, %v1730_v56  ;;  %v3737_v21 = vrot.slane %v3695_v18, 9 }
 0x154   : > { %1314 = vst.msk [vmem:[#allocation2 + $0x30] sm:$0xf] %vm1301_vm9, %v1230_v34  ;;  %v1228_v39 = vpop.permute.xlu0 %1227  ;;  %v1993_v34 = vrot.slane %v3687_v23, 5  ;;  %v2031_v23 = vrot.slane %v3703_v5, 5 }
 0x155   : > { %1313 = vst.msk [vmem:[#allocation2 + $0x2c] sm:$0xf] %vm1301_vm9, %v1228_v39  ;;  %1806 = vrot.lane.b32.xlu2 %v1635_v42, %s4010_s21  ;;  %v1736_v38 = vrot.slane %v1735_v26, 4  ;;  %v1740_v39 = vrot.slane %v1738_v27, 5  ;;  %v2015_v30 = vsel %vm4251_vm5, %v3737_v21, %v2014_v0  ;;  %v3709_v0 = vld [vmem:[%s4050_s17 + $0x68] sm:$0x1] }
 0x156   : > { %v1995_v42 = vrot.slane %v1993_v34, 4  ;;  %v1994_v60 = vsel %vm4251_vm5, %v3734_v31, %v1993_v34  ;;  %v3700_v34 = vld [vmem:[%s4050_s17 + $0x44] sm:$0x1]  ;;  %v3704_v31 = vld [vmem:[%s4050_s17 + $0x54] sm:$0xe] }
 0x157   : > { %v1244_v54 = vpop.permute.xlu2 %1243  ;;  %v1741_v46 = vsel %vm4061_vm2, %v1736_v38, %v1740_v39  ;;  %v3707_v38 = vld [vmem:[%s4050_s17 + $0x60] sm:$0xe]  ;;  %v3708_v39 = vld [vmem:[%s4050_s17 + $0x64] sm:$0xf]  ;;  %v3713_v21 = vld [vmem:[%s4050_s17 + $0x78] sm:$0xe] }
 0x158   : > { %1321 = vst.msk [vmem:[#allocation2 + $0x4c] sm:$0xf] %vm1301_vm9, %v1244_v54  ;;  %v1997_v50 = vsel %vm4251_vm5, %v1995_v42, %v1996_v43  ;;  %v3698_v54 = vld [vmem:[%s4050_s17 + $0x3c] sm:$0xe]  ;;  %v3741_v42 = vrot.slane %v3707_v38, 9  ;;  %v2042_v43 = vrot.slane %v3708_v39, 5 }
 0x159   : > { %1816 = vrot.lane.b32.xlu1 %v1693_v36, %s4010_s21  ;;  %v2000_v36 = vrot.slane %v3690_v32, 5  ;;  %v3738_v4 = vrot.slane %v3698_v54, 9 }
 0x15a   : > { %1814 = vrot.lane.b32.xlu0 %v1683_v53, %s4010_s21  ;;  %v3692_v53 = vld [vmem:[%s4050_s17 + $0x24] sm:$0xe]  ;;  %v2043_v51 = vsel %vm4251_vm5, %v3741_v42, %v2042_v43 }
 0x15b   : > { %v1236_v63 = vpop.permute.xlu1 %1235  ;;  %v2001_v10 = vsel %vm4251_vm5, %v3735_v28, %v2000_v36  ;;  %v3736_v57 = vrot.slane %v3692_v53, 9  ;;  %v2002_v2 = vrot.slane %v2000_v36, 4  ;;  %v3706_v36 = vld [vmem:[%s4050_s17 + $0x5c] sm:$0x1] }
 0x15c   : > { %1317 = vst.msk [vmem:[#allocation2 + $0x3c] sm:$0xf] %vm1301_vm9, %v1236_v63  ;;  %v1234_v3 = vpop.permute.xlu0 %1233  ;;  %v3699_v63 = vld [vmem:[%s4050_s17 + $0x40] sm:$0xf] }
 0x15d   : > { %1316 = vst.msk [vmem:[#allocation2 + $0x38] sm:$0xf] %vm1301_vm9, %v1234_v3  ;;  %1812 = vrot.lane.b32.xlu2 %v1669_v6, %s4010_s21  ;;  %v2008_v62 = vsel %vm4251_vm5, %v3736_v57, %v2007_v47  ;;  %v2003_v3 = vrot.slane %v3691_v52, 5  ;;  %v2021_v6 = vrot.slane %v3699_v63, 5  ;;  %v3711_v47 = vld [vmem:[%s4050_s17 + $0x70] sm:$0xf] }
 0x15e   : > { %v2049_v53 = vrot.slane %v3711_v47, 5 }
 0x15f   : > { %v1250_v19 = vpop.permute.xlu2 %1249  ;;  %v2004_v15 = vsel %vm4251_vm5, %v2002_v2, %v2003_v3  ;;  %v2022_v16 = vsel %vm4251_vm5, %v3738_v4, %v2021_v6  ;;  %v3716_v2 = vld [vmem:[%s4050_s17 + $0x84] sm:$0xe]  ;;  %v3717_v3 = vld [vmem:[%s4050_s17 + $0x88] sm:$0xf] }
 0x160   : > { %1324 = vst.msk [vmem:[#allocation2 + $0x58] sm:$0xf] %vm1301_vm9, %v1250_v19  ;;  %v2018_v19 = vsel %vm4251_vm5, %v2016_v11, %v2017_v12  ;;  %v2051_v57 = vrot.slane %v2049_v53, 4  ;;  %v3744_v11 = vrot.slane %v3716_v2, 9  ;;  %v2063_v12 = vrot.slane %v3717_v3, 5 }
 0x161   : > { %1822 = vrot.lane.b32.xlu1 %v1731_v8, %s4010_s21 }
 0x162   : > { %1820 = vrot.lane.b32.xlu0 %v1717_v13, %s4010_s21  ;;  %v3702_v13 = vld [vmem:[%s4050_s17 + $0x4c] sm:$0xf]  ;;  %v2064_v5 = vsel %vm4251_vm5, %v3744_v11, %v2063_v12 }
 0x163   : > { %v1242_v20 = vpop.permute.xlu1 %1241  ;;  %v2028_v17 = vrot.slane %v3702_v13, 5 }
 0x164   : > { %1320 = vst.msk [vmem:[#allocation2 + $0x48] sm:$0xf] %vm1301_vm9, %v1242_v20  ;;  %v1240_v22 = vpop.permute.xlu0 %1239  ;;  %v3701_v20 = vld [vmem:[%s4050_s17 + $0x48] sm:$0xe] }
 0x165   : > { %1319 = vst.msk [vmem:[#allocation2 + $0x44] sm:$0xf] %vm1301_vm9, %v1240_v22  ;;  %1818 = vrot.lane.b32.xlu2 %v1707_v24, %s4010_s21  ;;  %v2030_v22 = vrot.slane %v2028_v17, 4  ;;  %v3739_v27 = vrot.slane %v3701_v20, 9 }
 0x167   : > { %v1256_v40 = vpop.permute.xlu2 %1255  ;;  %v2032_v32 = vsel %vm4251_vm5, %v2030_v22, %v2031_v23  ;;  %v2029_v37 = vsel %vm4251_vm5, %v3739_v27, %v2028_v17  ;;  %v3720_v17 = vld [vmem:[%s4050_s17 + $0x94] sm:$0xf]  ;;  %v3721_v23 = vld [vmem:[%s4050_s17 + $0x98] sm:$0x1] }
 0x168   : > { %1327 = vst.msk [vmem:[#allocation2 + $0x64] sm:$0xf] %vm1301_vm9, %v1256_v40  ;;  %v2023_v40 = vrot.slane %v2021_v6, 4  ;;  %v3715_v6 = vld [vmem:[%s4050_s17 + $0x80] sm:$0x1]  ;;  %v2070_v20 = vrot.slane %v3720_v17, 5 }
 0x169   : > { %1828 = vrot.lane.b32.xlu1 %v1765_v29, %s4010_s21 }
 0x16a   : > { %1826 = vrot.lane.b32.xlu0 %v1755_v9, %s4010_s21  ;;  %v3705_v9 = vld [vmem:[%s4050_s17 + $0x58] sm:$0xf]  ;;  %v2072_v27 = vrot.slane %v2070_v20, 4 }
 0x16b   : > { %v1248_v41 = vpop.permute.xlu1 %1247  ;;  %v2035_v28 = vrot.slane %v3705_v9, 5 }
 0x16c   : > { %1323 = vst.msk [vmem:[#allocation2 + $0x54] sm:$0xf] %vm1301_vm9, %v1248_v41  ;;  %v1246_v45 = vpop.permute.xlu0 %1245  ;;  %v2024_v41 = vrot.slane %v3700_v34, 5 }
 0x16d   : > { %1322 = vst.msk [vmem:[#allocation2 + $0x50] sm:$0xf] %vm1301_vm9, %v1246_v45  ;;  %1824 = vrot.lane.b32.xlu2 %v1741_v46, %s4010_s21  ;;  %v2037_v46 = vrot.slane %v2035_v28, 4 }
 0x16f   : > { %v1262_v56 = vpop.permute.xlu2 %1261 }
 0x170   : > { %1330 = vst.msk [vmem:[#allocation2 + $0x70] sm:$0xf] %vm1301_vm9, %v1262_v56  ;;  %v3710_v56 = vld [vmem:[%s4050_s17 + $0x6c] sm:$0xe] }
 0x171   : > { %2107 = vrot.lane.b32.xlu1 %v2001_v10, %s4011_s22  ;;  %v2038_v10 = vrot.slane %v3706_v36, 5 }
 0x172   : > { %2105 = vrot.lane.b32.xlu0 %v1997_v50, %s4011_s22  ;;  %v2025_v50 = vsel %vm4251_vm5, %v2023_v40, %v2024_v41  ;;  %v3725_v40 = vld [vmem:[%s4050_s17 + $0xa8] sm:$0xe]  ;;  %v3726_v41 = vld [vmem:[%s4050_s17 + $0xac] sm:$0xf] }
 0x173   : > { %v1254_v49 = vpop.permute.xlu1 %1253  ;;  %v2039_v55 = vsel %vm4251_vm5, %v2037_v46, %v2038_v10  ;;  %v3747_v46 = vrot.slane %v3725_v40, 9  ;;  %v2084_v10 = vrot.slane %v3726_v41, 5  ;;  %v3754_v40 = vld [vmem:[%s4050_s17 + $0x30] sm:$0xf]  ;;  %v3759_v41 = vld [vmem:[%s4050_s17 + $0x4c] sm:$0xf] }
 0x174   : > { %1326 = vst.msk [vmem:[#allocation2 + $0x60] sm:$0xf] %vm1301_vm9, %v1254_v49  ;;  %v1252_v33 = vpop.permute.xlu0 %1251  ;;  %v3740_v49 = vrot.slane %v3704_v31, 9 }
 0x175   : > { %1325 = vst.msk [vmem:[#allocation2 + $0x5c] sm:$0xf] %vm1301_vm9, %v1252_v33  ;;  %2103 = vrot.lane.b32.xlu2 %v1994_v60, %s4011_s22  ;;  %v2052_v33 = vrot.slane %v3712_v35, 5  ;;  %v2085_v35 = vsel %vm4251_vm5, %v3747_v46, %v2084_v10  ;;  %v2086_v11 = vrot.slane %v2084_v10, 4  ;;  %v3757_v10 = vld [vmem:[%s4050_s17 + $0x40] sm:$0xf] }
 0x176   : > { %v2036_v54 = vsel %vm4251_vm5, %v3740_v49, %v2035_v28  ;;  %v3718_v28 = vld [vmem:[%s4050_s17 + $0x8c] sm:$0x1]  ;;  %v3722_v49 = vld [vmem:[%s4050_s17 + $0x9c] sm:$0xe] }
 0x177   : > { %v1268_v7 = vpop.permute.xlu2 %1267  ;;  %v2053_v63 = vsel %vm4251_vm5, %v2051_v57, %v2052_v33  ;;  %v3730_v33 = vld [vmem:[%s4050_s17 + $0xbc] sm:$0x1] }
 0x178   : > { %1333 = vst.msk [vmem:[#allocation2 + $0x7c] sm:$0xf] %vm1301_vm9, %v1268_v7  ;;  %v2044_v7 = vrot.slane %v2042_v43, 4  ;;  %v3724_v43 = vld [vmem:[%s4050_s17 + $0xa4] sm:$0x1] }
 0x179   : > { %2113 = vrot.lane.b32.xlu1 %v2011_v61, %s4011_s22  ;;  %v3742_v61 = vrot.slane %v3710_v56, 9 }
 0x17a   : > { %2111 = vrot.lane.b32.xlu0 %v2008_v62, %s4011_s22  ;;  %v3714_v62 = vld [vmem:[%s4050_s17 + $0x7c] sm:$0xf] }
 0x17b   : > { %v1260_v8 = vpop.permute.xlu1 %1259  ;;  %v2050_v1 = vsel %vm4251_vm5, %v3742_v61, %v2049_v53  ;;  %v2056_v4 = vrot.slane %v3714_v62, 5  ;;  %v3729_v53 = vld [vmem:[%s4050_s17 + $0xb8] sm:$0xf] }
 0x17c   : > { %1329 = vst.msk [vmem:[#allocation2 + $0x6c] sm:$0xf] %vm1301_vm9, %v1260_v8  ;;  %v1258_v14 = vpop.permute.xlu0 %1257  ;;  %v2045_v8 = vrot.slane %v3709_v0, 5  ;;  %v2091_v56 = vrot.slane %v3729_v53, 5 }
 0x17d   : > { %1328 = vst.msk [vmem:[#allocation2 + $0x68] sm:$0xf] %vm1301_vm9, %v1258_v14  ;;  %2109 = vrot.lane.b32.xlu2 %v2004_v15, %s4011_s22  ;;  %v2058_v15 = vrot.slane %v2056_v4, 4 }
 0x17e   : > { %v2093_v61 = vrot.slane %v2091_v56, 4 }
 0x17f   : > { %v1771_v24 = vpop.permute.xlu2 %1770 }
 0x180   : > { %1865 = vst.msk [vmem:[#allocation2 + $0x8] sm:$0xf] %vm1862_vm10, %v1771_v24  ;;  %v3719_v24 = vld [vmem:[%s4050_s17 + $0x90] sm:$0xe] }
 0x181   : > { %2119 = vrot.lane.b32.xlu1 %v2022_v16, %s4011_s22  ;;  %v2059_v16 = vrot.slane %v3715_v6, 5 }
 0x182   : > { %2117 = vrot.lane.b32.xlu0 %v2018_v19, %s4011_s22  ;;  %v2046_v19 = vsel %vm4251_vm5, %v2044_v7, %v2045_v8  ;;  %v3733_v8 = vld [vmem:[%s4050_s17 + $0xc8] sm:$0x1] }
 0x183   : > { %v1266_v26 = vpop.permute.xlu1 %1265  ;;  %v2060_v22 = vsel %vm4251_vm5, %v2058_v15, %v2059_v16  ;;  %v2101_v16 = vrot.slane %v3733_v8, 5 }
 0x184   : > { %1332 = vst.msk [vmem:[#allocation2 + $0x78] sm:$0xf] %vm1301_vm9, %v1266_v26  ;;  %v1264_v29 = vpop.permute.xlu0 %1263  ;;  %v3743_v26 = vrot.slane %v3713_v21, 9 }
 0x185   : > { %1331 = vst.msk [vmem:[#allocation2 + $0x74] sm:$0xf] %vm1301_vm9, %v1264_v29  ;;  %2115 = vrot.lane.b32.xlu2 %v2015_v30, %s4011_s22  ;;  %v2073_v29 = vrot.slane %v3721_v23, 5 }
 0x186   : > { %v2057_v38 = vsel %vm4251_vm5, %v3743_v26, %v2056_v4  ;;  %v3727_v4 = vld [vmem:[%s4050_s17 + $0xb0] sm:$0x1] }
 0x187   : > { %v1777_v44 = vpop.permute.xlu2 %1776  ;;  %v2074_v39 = vsel %vm4251_vm5, %v2072_v27, %v2073_v29  ;;  %v3753_v27 = vld [vmem:[%s4050_s17 + $0x28] sm:$0xf]  ;;  %v3752_v29 = vld [vmem:[%s4050_s17 + $0x24] sm:$0xf] }
 0x188   : > { %1868 = vst.msk [vmem:[#allocation2 + $0x14] sm:$0xf] %vm1862_vm10, %v1777_v44  ;;  %v2065_v44 = vrot.slane %v2063_v12, 4  ;;  %v2087_v12 = vrot.slane %v3727_v4, 5 }
 0x189   : > { %2125 = vrot.lane.b32.xlu1 %v2032_v32, %s4011_s22  ;;  %v3745_v32 = vrot.slane %v3719_v24, 9 }
 0x18a   : > { %2123 = vrot.lane.b32.xlu0 %v2029_v37, %s4011_s22  ;;  %v3723_v37 = vld [vmem:[%s4050_s17 + $0xa0] sm:$0xf] }
 0x18b   : > { %v1769_v45 = vpop.permute.xlu1 %1768  ;;  %v2071_v36 = vsel %vm4251_vm5, %v3745_v32, %v2070_v20  ;;  %v2077_v42 = vrot.slane %v3723_v37, 5  ;;  %v3756_v37 = vld [vmem:[%s4050_s17 + $0x3c] sm:$0xf] }
 0x18c   : > { %1864 = vst.msk [vmem:[#allocation2 + $0x4] sm:$0xf] %vm1862_vm10, %v1769_v45  ;;  %v1767_v48 = vpop.permute.xlu0 %1766  ;;  %v2066_v45 = vrot.slane %v3718_v28, 5 }
 0x18d   : > { %1863 = vst.msk [vmem:[#allocation2] sm:$0xf] %vm1862_vm10, %v1767_v48  ;;  %2121 = vrot.lane.b32.xlu2 %v2025_v50, %s4011_s22  ;;  %v2079_v50 = vrot.slane %v2077_v42, 4 }
 0x18f   : > { %v1783_v59 = vpop.permute.xlu2 %1782 }
 0x190   : > { %1871 = vst.msk [vmem:[#allocation2 + $0x20] sm:$0xf] %vm1862_vm10, %v1783_v59  ;;  %v3728_v59 = vld [vmem:[%s4050_s17 + $0xb4] sm:$0xe] }
 0x191   : > { %2131 = vrot.lane.b32.xlu1 %v2043_v51, %s4011_s22  ;;  %v2080_v51 = vrot.slane %v3724_v43, 5 }
 0x192   : > { %2129 = vrot.lane.b32.xlu0 %v2039_v55, %s4011_s22  ;;  %v2067_v55 = vsel %vm4251_vm5, %v2065_v44, %v2066_v45  ;;  %v3803_v45 = vld [vmem:[%s4050_s17 + $0x6c] sm:$0xf] }
 0x193   : > { %v1775_v60 = vpop.permute.xlu1 %1774  ;;  %v2081_v57 = vsel %vm4251_vm5, %v2079_v50, %v2080_v51  ;;  %v2646_v50 = vshll.u32 %v3803_v45, 16  ;;  %v3761_v51 = vld [vmem:[%s4050_s17 + $0x58] sm:$0xf] }
 0x194   : > { %1867 = vst.msk [vmem:[#allocation2 + $0x10] sm:$0xf] %vm1862_vm10, %v1775_v60  ;;  %v1773_v52 = vpop.permute.xlu0 %1772  ;;  %v3746_v60 = vrot.slane %v3722_v49, 9  ;;  %v3828_v49 = vld [vmem:[%s4050_s17 + $0xd0] sm:$0xf] }
 0x195   : > { %1866 = vst.msk [vmem:[#allocation2 + $0xc] sm:$0xf] %vm1862_vm10, %v1773_v52  ;;  %2127 = vrot.lane.b32.xlu2 %v2036_v54, %s4011_s22  ;;  %v2094_v52 = vrot.slane %v3730_v33, 5  ;;  %v3827_v33 = vld [vmem:[%s4050_s17 + $0xcc] sm:$0xf] }
 0x196   : > { %v2078_v2 = vsel %vm4251_vm5, %v3746_v60, %v2077_v42  ;;  %v3758_v42 = vld [vmem:[%s4050_s17 + $0x48] sm:$0xf]  ;;  %v3765_v60 = vld [vmem:[%s4050_s17 + $0x70] sm:$0xf] }
 0x197   : > { %v1789_v13 = vpop.permute.xlu2 %1788  ;;  %v2095_v3 = vsel %vm4251_vm5, %v2093_v61, %v2094_v52 }
 0x198   : > { %1874 = vst.msk [vmem:[#allocation2 + $0x2c] sm:$0xf] %vm1862_vm10, %v1789_v13 }
 0x199   : > { %2137 = vrot.lane.b32.xlu1 %v2053_v63, %s4011_s22  ;;  %v3748_v63 = vrot.slane %v3728_v59, 9  ;;  %v3760_v59 = vld [vmem:[%s4050_s17 + $0x54] sm:$0xf] }
 0x19a   : > { %2135 = vrot.lane.b32.xlu0 %v2050_v1, %s4011_s22  ;;  %v3732_v1 = vld [vmem:[%s4050_s17 + $0xc4] sm:$0xf] }
 0x19b   : > { %v1781_v14 = vpop.permute.xlu1 %1780  ;;  %v2092_v6 = vsel %vm4251_vm5, %v3748_v63, %v2091_v56  ;;  %v2098_v7 = vrot.slane %v3732_v1, 5  ;;  %v3804_v56 = vld [vmem:[%s4050_s17 + $0x70] sm:$0xf]  ;;  %v3764_v63 = vld [vmem:[%s4050_s17 + $0x6c] sm:$0xf]  ;;  %v2838_v1 = vshll.u32 %v3827_v33, 16 }
 0x19c   : > { %1870 = vst.msk [vmem:[#allocation2 + $0x1c] sm:$0xf] %vm1862_vm10, %v1781_v14  ;;  %v1779_v18 = vpop.permute.xlu0 %1778  ;;  %v2652_v52 = vshll.u32 %v3804_v56, 16 }
 0x19d   : > { %1869 = vst.msk [vmem:[#allocation2 + $0x18] sm:$0xf] %vm1862_vm10, %v1779_v18  ;;  %2133 = vrot.lane.b32.xlu2 %v2046_v19, %s4011_s22  ;;  %v2100_v15 = vrot.slane %v2098_v7, 4  ;;  %v2088_v18 = vsel %vm4251_vm5, %v2086_v11, %v2087_v12  ;;  %v3750_v19 = vld [vmem:[%s4050_s17 + $0x18] sm:$0xf] }
 0x19e   : > { %v3829_v11 = vld [vmem:[%s4050_s17 + $0xd4] sm:$0x1] }
 0x19f   : > { %v1795_v9 = vpop.permute.xlu2 %1794  ;;  %v2102_v20 = vsel %vm4251_vm5, %v2100_v15, %v2101_v16  ;;  %v2656_v15 = vshrl.u32 %v3804_v56, 16  ;;  %v3763_v16 = vld [vmem:[%s4050_s17 + $0x64] sm:$0xf] }
 0x1a0   : > { %1877 = vst.msk [vmem:[#allocation2 + $0x38] sm:$0xf] %vm1862_vm10, %v1795_v9 }
 0x1a1   : > { %2143 = vrot.lane.b32.xlu1 %v2064_v5, %s4011_s22  ;;  %v3731_v5 = vld [vmem:[%s4050_s17 + $0xc0] sm:$0xe] }
 0x1a2   : > { %2141 = vrot.lane.b32.xlu0 %v2060_v22, %s4011_s22  ;;  %v3749_v21 = vrot.slane %v3731_v5, 9  ;;  %v3781_v5 = vld [vmem:[%s4050_s17 + $0xd0] sm:$0xf] }
 0x1a3   : > { %v1787_v30 = vpop.permute.xlu1 %1786 }
 0x1a4   : > { %1873 = vst.msk [vmem:[#allocation2 + $0x28] sm:$0xf] %vm1862_vm10, %v1787_v30  ;;  %v1785_v34 = vpop.permute.xlu0 %1784  ;;  %v2099_v26 = vsel %vm4251_vm5, %v3749_v21, %v2098_v7  ;;  %v2658_v21 = vrot.slane %v2656_v15, 4  ;;  %v3778_v15 = vld [vmem:[%s4050_s17 + $0xc0] sm:$0xf] }
 0x1a5   : > { %1872 = vst.msk [vmem:[#allocation2 + $0x24] sm:$0xf] %vm1862_vm10, %v1785_v34  ;;  %2139 = vrot.lane.b32.xlu2 %v2057_v38, %s4011_s22  ;;  %v3751_v34 = vld [vmem:[%s4050_s17 + $0x1c] sm:$0xf]  ;;  %v3755_v38 = vld [vmem:[%s4050_s17 + $0x34] sm:$0xf] }
 0x1a7   : > { %v1801_v47 = vpop.permute.xlu2 %1800 }
 0x1a8   : > { %1880 = vst.msk [vmem:[#allocation2 + $0x44] sm:$0xf] %vm1862_vm10, %v1801_v47  ;;  %v3762_v47 = vld [vmem:[%s4050_s17 + $0x60] sm:$0xf] }
 0x1a9   : > { %2149 = vrot.lane.b32.xlu1 %v2074_v39, %s4011_s22 }
 0x1aa   : > { %2147 = vrot.lane.b32.xlu0 %v2071_v36, %s4011_s22 }
 0x1ab   : > { %v1793_v48 = vpop.permute.xlu1 %1792 }
 0x1ac   : > { %1876 = vst.msk [vmem:[#allocation2 + $0x34] sm:$0xf] %vm1862_vm10, %v1793_v48  ;;  %v1791_v31 = vpop.permute.xlu0 %1790  ;;  %v2643_v48 = vshrl.u32 %v3803_v45, 16 }
 0x1ad   : > { %1875 = vst.msk [vmem:[#allocation2 + $0x30] sm:$0xf] %vm1862_vm10, %v1791_v31  ;;  %2145 = vrot.lane.b32.xlu2 %v2067_v55, %s4011_s22  ;;  %v2648_v31 = vrot.slane %v2646_v50, 5  ;;  %v3824_v50 = vld [vmem:[%s4050_s17 + $0xc0] sm:$0xf] }
 0x1ae   : > { %v2645_v53 = vrot.slane %v2643_v48, 4  ;;  %v2814_v56 = vshll.u32 %v3824_v50, 16 }
 0x1af   : > { %v1807_v62 = vpop.permute.xlu2 %1806 }
 0x1b0   : > { %1883 = vst.msk [vmem:[#allocation2 + $0x50] sm:$0xf] %vm1862_vm10, %v1807_v62  ;;  %v2649_v61 = vor.u32 %v2648_v31, %v2645_v53  ;;  %v2844_v62 = vshll.u32 %v3828_v49, 16  ;;  %v3801_v53 = vld [vmem:[%s4050_s17 + $0x64] sm:$0xf] }
 0x1b1   : > { %2155 = vrot.lane.b32.xlu1 %v2085_v35, %s4011_s22 }
 0x1b2   : > { %2153 = vrot.lane.b32.xlu0 %v2081_v57, %s4011_s22  ;;  %v2846_v4 = vrot.slane %v2844_v62, 5 }
 0x1b3   : > { %v1799_v54 = vpop.permute.xlu1 %1798 }
 0x1b4   : > { %1879 = vst.msk [vmem:[#allocation2 + $0x40] sm:$0xf] %vm1862_vm10, %v1799_v54  ;;  %v1797_v0 = vpop.permute.xlu0 %1796  ;;  %v2848_v54 = vshrl.u32 %v3828_v49, 16  ;;  %v3851_v49 = vld [vmem:[%s4050_s17 + $0x6c] sm:$0xe] }
 0x1b5   : > { %1878 = vst.msk [vmem:[#allocation2 + $0x3c] sm:$0xf] %vm1862_vm10, %v1797_v0  ;;  %2151 = vrot.lane.b32.xlu2 %v2078_v2, %s4011_s22  ;;  %v2835_v0 = vshrl.u32 %v3827_v33, 16  ;;  %v2650_v2 = vrot.slane %v2649_v61, 4  ;;  %v2628_v33 = vshll.u32 %v3801_v53, 16 }
 0x1b7   : > { %v1813_v13 = vpop.permute.xlu2 %1812  ;;  %v2837_v12 = vrot.slane %v2835_v0, 4  ;;  %v3825_v0 = vld [vmem:[%s4050_s17 + $0xc4] sm:$0xf] }
 0x1b8   : > { %1886 = vst.msk [vmem:[#allocation2 + $0x5c] sm:$0xf] %vm1862_vm10, %v1813_v13  ;;  %v2840_v13 = vrot.slane %v2838_v1, 5  ;;  %v5113_v1 = vrot.slane %v2628_v33, 5 }
 0x1b9   : > { %2161 = vrot.lane.b32.xlu1 %v2095_v3, %s4011_s22  ;;  %v2654_v3 = vrot.slane %v2652_v52, 5  ;;  %v2816_v52 = vrot.slane %v2814_v56, 5 }
 0x1ba   : > { %2159 = vrot.lane.b32.xlu0 %v2092_v6, %s4011_s22  ;;  %v2850_v6 = vrot.slane %v2848_v54, 4  ;;  %v3800_v54 = vld [vmem:[%s4050_s17 + $0x60] sm:$0xf] }
 0x1bb   : > { %v1805_v14 = vpop.permute.xlu1 %1804 }
 0x1bc   : > { %1882 = vst.msk [vmem:[#allocation2 + $0x4c] sm:$0xf] %vm1862_vm10, %v1805_v14  ;;  %v1803_v17 = vpop.permute.xlu0 %1802 }
 0x1bd   : > { %1881 = vst.msk [vmem:[#allocation2 + $0x48] sm:$0xf] %vm1862_vm10, %v1803_v17  ;;  %2157 = vrot.lane.b32.xlu2 %v2088_v18, %s4011_s22  ;;  %v2655_v17 = vsel %vm4061_vm2, %v2650_v2, %v2654_v3  ;;  %v2851_v18 = vor.u32 %v2850_v6, %v2846_v4 }
 0x1bf   : > { %v1819_v22 = vpop.permute.xlu2 %1818 }
 0x1c0   : > { %1889 = vst.msk [vmem:[#allocation2 + $0x68] sm:$0xf] %vm1862_vm10, %v1819_v22  ;;  %v2852_v22 = vrot.slane %v2851_v18, 4 }
 0x1c1   : > { %2297 = vrot.lane.b32.xlu1 %v3750_v19, %s4012_s23  ;;  %v2854_v19 = vshll.u32 %v3829_v11, 16  ;;  %v3779_v11 = vld [vmem:[%s4050_s17 + $0xc4] sm:$0xf] }
 0x1c2   : > { %2165 = vrot.lane.b32.xlu0 %v2102_v20, %s4011_s22  ;;  %v2841_v20 = vor.u32 %v2840_v13, %v2837_v12  ;;  %v2820_v13 = vshll.u32 %v3825_v0, 16 }
 0x1c3   : > { %v1811_v23 = vpop.permute.xlu1 %1810 }
 0x1c4   : > { %1885 = vst.msk [vmem:[#allocation2 + $0x58] sm:$0xf] %vm1862_vm10, %v1811_v23  ;;  %v1809_v24 = vpop.permute.xlu0 %1808  ;;  %v2856_v23 = vrot.slane %v2854_v19, 5 }
 0x1c5   : > { %1884 = vst.msk [vmem:[#allocation2 + $0x54] sm:$0xf] %vm1862_vm10, %v1809_v24  ;;  %2163 = vrot.lane.b32.xlu2 %v2099_v26, %s4011_s22  ;;  %v3805_v26 = vld [vmem:[%s4050_s17 + $0x74] sm:$0x1] }
 0x1c7   : > { %v1825_v9 = vpop.permute.xlu2 %1824 }
 0x1c8   : > { %1892 = vst.msk [vmem:[#allocation2 + $0x74] sm:$0xf] %vm1862_vm10, %v1825_v9 }
 0x1c9   : > { %2303 = vrot.lane.b32.xlu1 %v3753_v27, %s4012_s23 }
 0x1ca   : > { %2301 = vrot.lane.b32.xlu0 %v3752_v29, %s4012_s23  ;;  %v2842_v29 = vrot.slane %v2841_v20, 4 }
 0x1cb   : > { %v1817_v30 = vpop.permute.xlu1 %1816 }
 0x1cc   : > { %1888 = vst.msk [vmem:[#allocation2 + $0x64] sm:$0xf] %vm1862_vm10, %v1817_v30  ;;  %v1815_v32 = vpop.permute.xlu0 %1814  ;;  %v3852_v30 = vld [vmem:[%s4050_s17 + $0x70] sm:$0xf] }
 0x1cd   : > { %1887 = vst.msk [vmem:[#allocation2 + $0x60] sm:$0xf] %vm1862_vm10, %v1815_v32  ;;  %2299 = vrot.lane.b32.xlu2 %v3751_v34, %s4012_s23  ;;  %v3780_v32 = vld [vmem:[%s4050_s17 + $0xcc] sm:$0xf]  ;;  %v2659_v34 = vor.u32 %v2658_v21, %v2654_v3 }
 0x1cf   : > { %v2104_v39 = vpop.permute.xlu2 %2103 }
 0x1d0   : > { %2200 = vst.msk [vmem:[#allocation2] sm:$0xf] %vm2199_vm11, %v2104_v39  ;;  %v2847_v39 = vsel %vm4061_vm2, %v2842_v29, %v2846_v4  ;;  %v3802_v4 = vld [vmem:[%s4050_s17 + $0x68] sm:$0x1]  ;;  %v3849_v29 = vld [vmem:[%s4050_s17 + $0x64] sm:$0xf] }
 0x1d1   : > { %2309 = vrot.lane.b32.xlu1 %v3756_v37, %s4012_s23  ;;  %v2662_v37 = vshll.u32 %v3805_v26, 16 }
 0x1d2   : > { %2307 = vrot.lane.b32.xlu0 %v3755_v38, %s4012_s23  ;;  %v2857_v38 = vsel %vm4061_vm2, %v2852_v22, %v2856_v23  ;;  %v2822_v22 = vrot.slane %v2820_v13, 5  ;;  %v3776_v13 = vld [vmem:[%s4050_s17 + $0xb4] sm:$0xf] }
 0x1d3   : > { %v1823_v28 = vpop.permute.xlu1 %1822 }
 0x1d4   : > { %1891 = vst.msk [vmem:[#allocation2 + $0x70] sm:$0xf] %vm1862_vm10, %v1823_v28  ;;  %v1821_v36 = vpop.permute.xlu0 %1820  ;;  %v3875_v28 = vld [vmem:[%s4050_s17 + $0xcc] sm:$0xe] }
 0x1d5   : > { %1890 = vst.msk [vmem:[#allocation2 + $0x6c] sm:$0xf] %vm1862_vm10, %v1821_v36  ;;  %2305 = vrot.lane.b32.xlu2 %v3754_v40, %s4012_s23  ;;  %v3876_v36 = vld [vmem:[%s4050_s17 + $0xd0] sm:$0xf]  ;;  %v3134_v40 = vrot.slane %v3852_v30, 5  ;;  %v2824_v30 = vshrl.u32 %v3825_v0, 16 }
 0x1d6   : > { %v3190_v45 = vrot.slane %v3876_v36, 5  ;;  %v3848_v36 = vld [vmem:[%s4050_s17 + $0x60] sm:$0xe] }
 0x1d7   : > { %v2110_v43 = vpop.permute.xlu2 %2109 }
 0x1d8   : > { %2203 = vst.msk [vmem:[#allocation2 + $0xc] sm:$0xf] %vm2199_vm11, %v2110_v43  ;;  %v2664_v43 = vrot.slane %v2662_v37, 5  ;;  %v3192_v18 = vrot.slane %v3190_v45, 4 }
 0x1d9   : > { %2315 = vrot.lane.b32.xlu1 %v3759_v41, %s4012_s23  ;;  %v3853_v41 = vld [vmem:[%s4050_s17 + $0x74] sm:$0x1] }
 0x1da   : > { %2313 = vrot.lane.b32.xlu0 %v3758_v42, %s4012_s23  ;;  %v2660_v42 = vrot.slane %v2659_v34, 4  ;;  %v3137_v48 = vrot.slane %v3853_v41, 5  ;;  %v2826_v41 = vrot.slane %v2824_v30, 4 }
 0x1db   : > { %v1829_v44 = vpop.permute.xlu1 %1828 }
 0x1dc   : > { %1894 = vst.msk [vmem:[#allocation2 + $0x7c] sm:$0xf] %vm1862_vm10, %v1829_v44  ;;  %v1827_v46 = vpop.permute.xlu0 %1826  ;;  %v3893_v44 = vrot.slane %v3875_v28, 9  ;;  %v2665_v31 = vsel %vm4061_vm2, %v2660_v42, %v2664_v43  ;;  %v3850_v28 = vld [vmem:[%s4050_s17 + $0x68] sm:$0x1] }
 0x1dd   : > { %1893 = vst.msk [vmem:[#allocation2 + $0x78] sm:$0xf] %vm1862_vm10, %v1827_v46  ;;  %2311 = vrot.lane.b32.xlu2 %v3757_v10, %s4012_s23  ;;  %v3130_v43 = vrot.slane %v3850_v28, 5 }
 0x1df   : > { %v2116_v55 = vpop.permute.xlu2 %2115 }
 0x1e0   : > { %2206 = vst.msk [vmem:[#allocation2 + $0x18] sm:$0xf] %vm2199_vm11, %v2116_v55  ;;  %v3191_v55 = vsel %vm4251_vm5, %v3893_v44, %v3190_v45  ;;  %v3884_v44 = vrot.slane %v3848_v36, 9  ;;  %v3845_v36 = vld [vmem:[%s4050_s17 + $0x54] sm:$0xe] }
 0x1e1   : > { %2321 = vrot.lane.b32.xlu1 %v3762_v47, %s4012_s23  ;;  %v3136_v47 = vrot.slane %v3134_v40, 4 }
 0x1e2   : > { %2319 = vrot.lane.b32.xlu0 %v3761_v51, %s4012_s23 }
 0x1e3   : > { %v2108_v35 = vpop.permute.xlu1 %2107 }
 0x1e4   : > { %2202 = vst.msk [vmem:[#allocation2 + $0x8] sm:$0xf] %vm2199_vm11, %v2108_v35  ;;  %v2106_v57 = vpop.permute.xlu0 %2105  ;;  %v2811_v35 = vshrl.u32 %v3824_v50, 16 }
 0x1e5   : > { %2201 = vst.msk [vmem:[#allocation2 + $0x4] sm:$0xf] %vm2199_vm11, %v2106_v57  ;;  %2317 = vrot.lane.b32.xlu2 %v3760_v59, %s4012_s23  ;;  %v3138_v57 = vsel %vm4251_vm5, %v3136_v47, %v3137_v48  ;;  %v2632_v59 = vshrl.u32 %v3801_v53, 16  ;;  %v5145_v47 = vld [vmem:[%s4050_s17 + $0xc4] sm:$0xf] }
 0x1e6   : > { %v2813_v61 = vrot.slane %v2811_v35, 4  ;;  %v3798_v48 = vld [vmem:[%s4050_s17 + $0x58] sm:$0xf]  ;;  %v3183_v56 = vrot.slane %v5145_v47, 5 }
 0x1e7   : > { %v2122_v7 = vpop.permute.xlu2 %2121  ;;  %v2634_v2 = vrot.slane %v2632_v59, 4  ;;  %v3874_v59 = vld [vmem:[%s4050_s17 + $0xc8] sm:$0x1] }
 0x1e8   : > { %2209 = vst.msk [vmem:[#allocation2 + $0x24] sm:$0xf] %vm2199_vm11, %v2122_v7  ;;  %v2619_v7 = vshrl.u32 %v3800_v54, 16  ;;  %v2817_v12 = vor.u32 %v2816_v52, %v2813_v61 }
 0x1e9   : > { %2327 = vrot.lane.b32.xlu1 %v3765_v60, %s4012_s23  ;;  %v3885_v60 = vrot.slane %v3851_v49, 9  ;;  %v2604_v49 = vshll.u32 %v3798_v48, 16 }
 0x1ea   : > { %2325 = vrot.lane.b32.xlu0 %v3764_v63, %s4012_s23  ;;  %v2818_v21 = vrot.slane %v2817_v12, 4 }
 0x1eb   : > { %v2114_v8 = vpop.permute.xlu1 %2113  ;;  %v3135_v6 = vsel %vm4251_vm5, %v3885_v60, %v3134_v40  ;;  %v2606_v0 = vrot.slane %v2604_v49, 5 }
 0x1ec   : > { %2205 = vst.msk [vmem:[#allocation2 + $0x14] sm:$0xf] %vm2199_vm11, %v2114_v8  ;;  %v2112_v14 = vpop.permute.xlu0 %2111  ;;  %v2622_v8 = vshll.u32 %v3800_v54, 16  ;;  %v2823_v37 = vsel %vm4061_vm2, %v2818_v21, %v2822_v22  ;;  %v3185_v54 = vrot.slane %v3183_v56, 4 }
 0x1ed   : > { %2204 = vst.msk [vmem:[#allocation2 + $0x10] sm:$0xf] %vm2199_vm11, %v2112_v14  ;;  %2323 = vrot.lane.b32.xlu2 %v3763_v16, %s4012_s23  ;;  %v3877_v14 = vld [vmem:[%s4050_s17 + $0xd4] sm:$0x1]  ;;  %v2635_v16 = vor.u32 %v2634_v2, %v5113_v1 }
 0x1ee   : > { %v3193_v19 = vrot.slane %v3877_v14, 5  ;;  %v2624_v20 = vrot.slane %v2622_v8, 5 }
 0x1ef   : > { %v2128_v24 = vpop.permute.xlu2 %2127  ;;  %v2636_v26 = vrot.slane %v2635_v16, 4  ;;  %v3872_v16 = vld [vmem:[%s4050_s17 + $0xc0] sm:$0xe] }
 0x1f0   : > { %2212 = vst.msk [vmem:[#allocation2 + $0x30] sm:$0xf] %vm2199_vm11, %v2128_v24 }
 0x1f1   : > { %2886 = vrot.lane.b32.xlu1 %v2655_v17, %s4013_s24  ;;  %v2638_v17 = vshll.u32 %v3802_v4, 16  ;;  %v3799_v4 = vld [vmem:[%s4050_s17 + $0x5c] sm:$0x1] }
 0x1f2   : > { %2359 = vrot.lane.b32.xlu0 %v3781_v5, %s4012_s23  ;;  %v2621_v5 = vrot.slane %v2619_v7, 4 }
 0x1f3   : > { %v2120_v27 = vpop.permute.xlu1 %2119 }
 0x1f4   : > { %2208 = vst.msk [vmem:[#allocation2 + $0x20] sm:$0xf] %vm2199_vm11, %v2120_v27  ;;  %v2118_v9 = vpop.permute.xlu0 %2117  ;;  %v2640_v27 = vrot.slane %v2638_v17, 5  ;;  %v2625_v34 = vor.u32 %v2624_v20, %v2621_v5  ;;  %v3892_v20 = vrot.slane %v3872_v16, 9 }
 0x1f5   : > { %2207 = vst.msk [vmem:[#allocation2 + $0x1c] sm:$0xf] %vm2199_vm11, %v2118_v9  ;;  %2357 = vrot.lane.b32.xlu2 %v3780_v32, %s4012_s23  ;;  %v3194_v32 = vsel %vm4251_vm5, %v3192_v18, %v3193_v19 }
 0x1f6   : > { %v2626_v40 = vrot.slane %v2625_v34, 4  ;;  %v3184_v34 = vsel %vm4251_vm5, %v3892_v20, %v3183_v56 }
 0x1f7   : > { %v2134_v46 = vpop.permute.xlu2 %2133 }
 0x1f8   : > { %2215 = vst.msk [vmem:[#allocation2 + $0x3c] sm:$0xf] %vm2199_vm11, %v2134_v46  ;;  %v3826_v46 = vld [vmem:[%s4050_s17 + $0xc8] sm:$0x1]  ;;  %v2631_v53 = vsel %vm4061_vm2, %v2626_v40, %v5113_v1  ;;  %v3846_v40 = vld [vmem:[%s4050_s17 + $0x58] sm:$0xf] }
 0x1f9   : > { %2920 = vrot.lane.b32.xlu1 %v2857_v38, %s4013_s24  ;;  %v3127_v38 = vrot.slane %v3849_v29, 5 }
 0x1fa   : > { %2918 = vrot.lane.b32.xlu0 %v2847_v39, %s4013_s24  ;;  %v2641_v39 = vsel %vm4061_vm2, %v2636_v26, %v2640_v27 }
 0x1fb   : > { %v2126_v10 = vpop.permute.xlu1 %2125  ;;  %v3129_v42 = vrot.slane %v3127_v38, 4  ;;  %v3128_v33 = vsel %vm4251_vm5, %v3884_v44, %v3127_v38 }
 0x1fc   : > { %2211 = vst.msk [vmem:[#allocation2 + $0x2c] sm:$0xf] %vm2199_vm11, %v2126_v10  ;;  %v2124_v51 = vpop.permute.xlu0 %2123 }
 0x1fd   : > { %2210 = vst.msk [vmem:[#allocation2 + $0x28] sm:$0xf] %vm2199_vm11, %v2124_v51  ;;  %2888 = vrot.lane.b32.xlu2 %v2665_v31, %s4013_s24  ;;  %v3797_v51 = vld [vmem:[%s4050_s17 + $0x54] sm:$0xf]  ;;  %v2827_v31 = vor.u32 %v2826_v41, %v2822_v22  ;;  %v3131_v35 = vsel %vm4251_vm5, %v3129_v42, %v3130_v43 }
 0x1fe   : > { %v2595_v60 = vshrl.u32 %v3797_v51, 16  ;;  %v2598_v61 = vshll.u32 %v3797_v51, 16 }
 0x1ff   : > { %v2140_v62 = vpop.permute.xlu2 %2139  ;;  %v2828_v52 = vrot.slane %v2827_v31, 4 }
 0x200   : > { %2218 = vst.msk [vmem:[#allocation2 + $0x48] sm:$0xf] %vm2199_vm11, %v2140_v62  ;;  %v2600_v7 = vrot.slane %v2598_v61, 5  ;;  %v3869_v61 = vld [vmem:[%s4050_s17 + $0xb4] sm:$0xe] }
 0x201   : > { %3255 = vrot.lane.b32.xlu1 %v3191_v55, %s4014_s25  ;;  %v2830_v55 = vshll.u32 %v3826_v46, 16  ;;  %v3120_v46 = vrot.slane %v3846_v40, 5  ;;  %v3775_v40 = vld [vmem:[%s4050_s17 + $0xac] sm:$0xf] }
 0x202   : > { %3225 = vrot.lane.b32.xlu0 %v3138_v57, %s4014_s25  ;;  %v2608_v57 = vshrl.u32 %v3798_v48, 16 }
 0x203   : > { %v2132_v63 = vpop.permute.xlu1 %2131  ;;  %v2832_v62 = vrot.slane %v2830_v55, 5  ;;  %v3122_v20 = vrot.slane %v3120_v46, 4 }
 0x204   : > { %2214 = vst.msk [vmem:[#allocation2 + $0x38] sm:$0xf] %vm2199_vm11, %v2132_v63  ;;  %v2130_v3 = vpop.permute.xlu0 %2129  ;;  %v3186_v63 = vrot.slane %v3874_v59, 5  ;;  %v2610_v1 = vrot.slane %v2608_v57, 4  ;;  %v3871_v57 = vld [vmem:[%s4050_s17 + $0xbc] sm:$0x1] }
 0x205   : > { %2213 = vst.msk [vmem:[#allocation2 + $0x34] sm:$0xf] %vm2199_vm11, %v2130_v3  ;;  %3223 = vrot.lane.b32.xlu2 %v3135_v6, %s4014_s25  ;;  %v2597_v6 = vrot.slane %v2595_v60, 4  ;;  %v2833_v12 = vsel %vm4061_vm2, %v2828_v52, %v2832_v62  ;;  %v3179_v62 = vrot.slane %v3871_v57, 5 }
 0x206   : > { %v2611_v14 = vor.u32 %v2610_v1, %v2606_v0  ;;  %v3187_v17 = vsel %vm4251_vm5, %v3185_v54, %v3186_v63  ;;  %v3891_v63 = vrot.slane %v3869_v61, 9 }
 0x207   : > { %v2146_v23 = vpop.permute.xlu2 %2145  ;;  %v2601_v18 = vor.u32 %v2600_v7, %v2597_v6  ;;  %v3819_v6 = vld [vmem:[%s4050_s17 + $0xac] sm:$0xf] }
 0x208   : > { %2221 = vst.msk [vmem:[#allocation2 + $0x54] sm:$0xf] %vm2199_vm11, %v2146_v23  ;;  %v2612_v21 = vrot.slane %v2611_v14, 4  ;;  %v2776_v16 = vshrl.u32 %v3819_v6, 16 }
 0x209   : > { %2355 = vrot.lane.b32.xlu1 %v3779_v11, %s4012_s23  ;;  %v3822_v11 = vld [vmem:[%s4050_s17 + $0xb8] sm:$0xf]  ;;  %v2602_v27 = vrot.slane %v2601_v18, 4 }
 0x20a   : > { %2353 = vrot.lane.b32.xlu0 %v3778_v15, %s4012_s23  ;;  %v2614_v15 = vshll.u32 %v3799_v4, 16  ;;  %v2796_v19 = vshll.u32 %v3822_v11, 16  ;;  %v2800_v5 = vshrl.u32 %v3822_v11, 16  ;;  %v3795_v4 = vld [vmem:[%s4050_s17 + $0x4c] sm:$0xf] }
 0x20b   : > { %v2138_v24 = vpop.permute.xlu1 %2137  ;;  %v2607_v28 = vsel %vm4061_vm2, %v2602_v27, %v2606_v0  ;;  %v2580_v14 = vshll.u32 %v3795_v4, 16 }
 0x20c   : > { %2217 = vst.msk [vmem:[#allocation2 + $0x44] sm:$0xf] %vm2199_vm11, %v2138_v24  ;;  %v2136_v9 = vpop.permute.xlu0 %2135  ;;  %v2616_v22 = vrot.slane %v2614_v15, 5  ;;  %v3821_v24 = vld [vmem:[%s4050_s17 + $0xb4] sm:$0xf]  ;;  %v5179_v29 = vrot.slane %v2796_v19, 5 }
 0x20d   : > { %2216 = vst.msk [vmem:[#allocation2 + $0x40] sm:$0xf] %vm2199_vm11, %v2136_v9  ;;  %3257 = vrot.lane.b32.xlu2 %v3194_v32, %s4014_s25  ;;  %v2802_v9 = vrot.slane %v2800_v5, 4  ;;  %v3823_v32 = vld [vmem:[%s4050_s17 + $0xbc] sm:$0x1]  ;;  %v2790_v38 = vshll.u32 %v3821_v24, 16 }
 0x20e   : > { %v2806_v42 = vshll.u32 %v3823_v32, 16  ;;  %v2772_v15 = vshll.u32 %v3819_v6, 16 }
 0x20f   : > { %v2152_v45 = vpop.permute.xlu2 %2151  ;;  %v2803_v41 = vor.u32 %v2802_v9, %v5179_v29  ;;  %v2792_v44 = vrot.slane %v2790_v38, 5  ;;  %v3820_v9 = vld [vmem:[%s4050_s17 + $0xb0] sm:$0x1] }
 0x210   : > { %2224 = vst.msk [vmem:[#allocation2 + $0x60] sm:$0xf] %vm2199_vm11, %v2152_v45  ;;  %v3883_v45 = vrot.slane %v3845_v36, 9  ;;  %v2808_v51 = vrot.slane %v2806_v42, 5  ;;  %v2782_v36 = vshll.u32 %v3820_v9, 16 }
 0x211   : > { %2914 = vrot.lane.b32.xlu1 %v2823_v37, %s4013_s24  ;;  %v2787_v37 = vshrl.u32 %v3821_v24, 16  ;;  %v2774_v24 = vrot.slane %v2772_v15, 5  ;;  %v3773_v9 = vld [vmem:[%s4050_s17 + $0xa0] sm:$0xf] }
 0x212   : > { %2884 = vrot.lane.b32.xlu0 %v2641_v39, %s4013_s24  ;;  %v2617_v39 = vsel %vm4061_vm2, %v2612_v21, %v2616_v22  ;;  %v3121_v49 = vsel %vm4251_vm5, %v3883_v45, %v3120_v46  ;;  %v3796_v46 = vld [vmem:[%s4050_s17 + $0x50] sm:$0x1] }
 0x213   : > { %v2144_v10 = vpop.permute.xlu1 %2143  ;;  %v2789_v43 = vrot.slane %v2787_v37, 4  ;;  %v2584_v37 = vshrl.u32 %v3795_v4, 16 }
 0x214   : > { %2220 = vst.msk [vmem:[#allocation2 + $0x50] sm:$0xf] %vm2199_vm11, %v2144_v10  ;;  %v2142_v50 = vpop.permute.xlu0 %2141  ;;  %v3870_v10 = vld [vmem:[%s4050_s17 + $0xb8] sm:$0xf] }
 0x215   : > { %2219 = vst.msk [vmem:[#allocation2 + $0x4c] sm:$0xf] %vm2199_vm11, %v2142_v50  ;;  %2882 = vrot.lane.b32.xlu2 %v2631_v53, %s4013_s24  ;;  %v2804_v50 = vrot.slane %v2803_v41, 4  ;;  %v3794_v53 = vld [vmem:[%s4050_s17 + $0x48] sm:$0xf]  ;;  %v3176_v55 = vrot.slane %v3870_v10, 5  ;;  %v2793_v56 = vor.u32 %v2792_v44, %v2789_v43 }
 0x216   : > { %v2574_v59 = vshll.u32 %v3794_v53, 16  ;;  %v2586_v42 = vrot.slane %v2584_v37, 4  ;;  %v2784_v44 = vrot.slane %v2782_v36, 5  ;;  %v3772_v37 = vld [vmem:[%s4050_s17 + $0x9c] sm:$0xf] }
 0x217   : > { %v2158_v2 = vpop.permute.xlu2 %2157  ;;  %v2809_v60 = vsel %vm4061_vm2, %v2804_v50, %v2808_v51  ;;  %v3178_v52 = vrot.slane %v3176_v55, 4  ;;  %v2794_v54 = vrot.slane %v2793_v56, 4  ;;  %v3177_v18 = vsel %vm4251_vm5, %v3891_v63, %v3176_v55  ;;  %v3843_v50 = vld [vmem:[%s4050_s17 + $0x4c] sm:$0xf]  ;;  %v3774_v51 = vld [vmem:[%s4050_s17 + $0xa8] sm:$0xf] }
 0x218   : > { %2227 = vst.msk [vmem:[#allocation2 + $0x6c] sm:$0xf] %vm2199_vm11, %v2158_v2  ;;  %v2576_v1 = vrot.slane %v2574_v59, 5  ;;  %v3866_v56 = vld [vmem:[%s4050_s17 + $0xa8] sm:$0xe]  ;;  %v3113_v57 = vrot.slane %v3843_v50, 5 }
 0x219   : > { %3221 = vrot.lane.b32.xlu1 %v3131_v35, %s4014_s25  ;;  %v3777_v35 = vld [vmem:[%s4050_s17 + $0xb8] sm:$0xf]  ;;  %v3180_v11 = vsel %vm4251_vm5, %v3178_v52, %v3179_v62  ;;  %v3890_v61 = vrot.slane %v3866_v56, 9  ;;  %v3841_v56 = vld [vmem:[%s4050_s17 + $0x44] sm:$0x1] }
 0x21a   : > { %3219 = vrot.lane.b32.xlu0 %v3128_v33, %s4014_s25  ;;  %v2571_v33 = vshrl.u32 %v3794_v53, 16  ;;  %v3115_v63 = vrot.slane %v3113_v57, 4 }
 0x21b   : > { %v2150_v3 = vpop.permute.xlu1 %2149 }
 0x21c   : > { %2223 = vst.msk [vmem:[#allocation2 + $0x5c] sm:$0xf] %vm2199_vm11, %v2150_v3  ;;  %v2148_v8 = vpop.permute.xlu0 %2147  ;;  %v2573_v0 = vrot.slane %v2571_v33, 4  ;;  %v3844_v33 = vld [vmem:[%s4050_s17 + $0x50] sm:$0x1] }
 0x21d   : > { %2222 = vst.msk [vmem:[#allocation2 + $0x58] sm:$0xf] %vm2199_vm11, %v2148_v8  ;;  %2916 = vrot.lane.b32.xlu2 %v2833_v12, %s4013_s24  ;;  %v3818_v8 = vld [vmem:[%s4050_s17 + $0xa8] sm:$0xf]  ;;  %v2799_v12 = vsel %vm4061_vm2, %v2794_v54, %v5179_v29 }
 0x21e   : > { %v2763_v19 = vshrl.u32 %v3818_v8, 16  ;;  %v2766_v5 = vshll.u32 %v3818_v8, 16 }
 0x21f   : > { %v2164_v23 = vpop.permute.xlu2 %2163 }
 0x220   : > { %2230 = vst.msk [vmem:[#allocation2 + $0x78] sm:$0xf] %vm2199_vm11, %v2164_v23  ;;  %v2582_v23 = vrot.slane %v2580_v14, 5  ;;  %v2768_v32 = vrot.slane %v2766_v5, 5 }
 0x221   : > { %2349 = vrot.lane.b32.xlu1 %v3776_v13, %s4012_s23  ;;  %v2577_v13 = vor.u32 %v2576_v1, %v2573_v0  ;;  %v3116_v0 = vrot.slane %v3844_v33, 5  ;;  %v3815_v1 = vld [vmem:[%s4050_s17 + $0x9c] sm:$0xf] }
 0x222   : > { %3253 = vrot.lane.b32.xlu0 %v3187_v17, %s4014_s25  ;;  %v3847_v17 = vld [vmem:[%s4050_s17 + $0x5c] sm:$0x1]  ;;  %v2587_v53 = vor.u32 %v2586_v42, %v2582_v23  ;;  %v2742_v8 = vshll.u32 %v3815_v1, 16 }
 0x223   : > { %v2156_v26 = vpop.permute.xlu1 %2155  ;;  %v3123_v21 = vrot.slane %v3847_v17, 5  ;;  %v2578_v22 = vrot.slane %v2577_v13, 4 }
 0x224   : > { %2226 = vst.msk [vmem:[#allocation2 + $0x68] sm:$0xf] %vm2199_vm11, %v2156_v26  ;;  %v2154_v30 = vpop.permute.xlu0 %2153  ;;  %v2778_v26 = vrot.slane %v2776_v16, 4  ;;  %v2588_v59 = vrot.slane %v2587_v53, 4  ;;  %v2744_v17 = vrot.slane %v2742_v8, 5 }
 0x225   : > { %2225 = vst.msk [vmem:[#allocation2 + $0x64] sm:$0xf] %vm2199_vm11, %v2154_v30  ;;  %3251 = vrot.lane.b32.xlu2 %v3184_v34, %s4014_s25  ;;  %v2765_v30 = vrot.slane %v2763_v19, 4  ;;  %v3124_v38 = vsel %vm4251_vm5, %v3122_v20, %v3123_v21  ;;  %v3791_v19 = vld [vmem:[%s4050_s17 + $0x3c] sm:$0xf] }
 0x226   : > { %v3816_v20 = vld [vmem:[%s4050_s17 + $0xa0] sm:$0xf] }
 0x227   : > { %v2300_v47 = vpop.permute.xlu2 %2299  ;;  %v2769_v41 = vor.u32 %v2768_v32, %v2765_v30  ;;  %v2748_v32 = vshll.u32 %v3816_v20, 16  ;;  %v2752_v50 = vshrl.u32 %v3816_v20, 16 }
 0x228   : > { %2395 = vst.msk [vmem:[#allocation2 + $0x4] sm:$0xf] %vm2393_vm12, %v2300_v47 }
 0x229   : > { %2880 = vrot.lane.b32.xlu1 %v2617_v39, %s4013_s24  ;;  %v2583_v39 = vsel %vm4061_vm2, %v2578_v22, %v2582_v23  ;;  %v2770_v47 = vrot.slane %v2769_v41, 4  ;;  %v2754_v33 = vrot.slane %v2752_v50, 4 }
 0x22a   : > { %2878 = vrot.lane.b32.xlu0 %v2607_v28, %s4013_s24  ;;  %v2779_v28 = vor.u32 %v2778_v26, %v2774_v24 }
 0x22b   : > { %v2162_v48 = vpop.permute.xlu1 %2161 }
 0x22c   : > { %2229 = vst.msk [vmem:[#allocation2 + $0x74] sm:$0xf] %vm2199_vm11, %v2162_v48  ;;  %v2160_v31 = vpop.permute.xlu0 %2159  ;;  %v2780_v43 = vrot.slane %v2779_v28, 4 }
 0x22d   : > { %2228 = vst.msk [vmem:[#allocation2 + $0x70] sm:$0xf] %vm2199_vm11, %v2160_v31  ;;  %2351 = vrot.lane.b32.xlu2 %v3777_v35, %s4012_s23  ;;  %v2590_v31 = vshll.u32 %v3796_v46, 16  ;;  %v2775_v35 = vsel %vm4061_vm2, %v2770_v47, %v2774_v24  ;;  %v3793_v24 = vld [vmem:[%s4050_s17 + $0x44] sm:$0x1] }
 0x22e   : > { %v2785_v55 = vsel %vm4061_vm2, %v2780_v43, %v2784_v44  ;;  %v2750_v43 = vrot.slane %v2748_v32, 5  ;;  %v3840_v47 = vld [vmem:[%s4050_s17 + $0x40] sm:$0xf] }
 0x22f   : > { %v2306_v2 = vpop.permute.xlu2 %2305 }
 0x230   : > { %2398 = vst.msk [vmem:[#allocation2 + $0x10] sm:$0xf] %vm2393_vm12, %v2306_v2 }
 0x231   : > { %3215 = vrot.lane.b32.xlu1 %v3121_v49, %s4014_s25  ;;  %v3867_v49 = vld [vmem:[%s4050_s17 + $0xac] sm:$0xf] }
 0x232   : > { %2912 = vrot.lane.b32.xlu0 %v2809_v60, %s4013_s24  ;;  %v2592_v60 = vrot.slane %v2590_v31, 5  ;;  %v3169_v52 = vrot.slane %v3867_v49, 5  ;;  %v3839_v49 = vld [vmem:[%s4050_s17 + $0x3c] sm:$0xe] }
 0x233   : > { %v2298_v3 = vpop.permute.xlu1 %2297 }
 0x234   : > { %2394 = vst.msk [vmem:[#allocation2] sm:$0xf] %vm2393_vm12, %v2298_v3  ;;  %v2166_v7 = vpop.permute.xlu0 %2165  ;;  %v3792_v3 = vld [vmem:[%s4050_s17 + $0x40] sm:$0xf]  ;;  %v2593_v4 = vsel %vm4061_vm2, %v2588_v59, %v2592_v60  ;;  %v3170_v6 = vsel %vm4251_vm5, %v3890_v61, %v3169_v52  ;;  %v3171_v28 = vrot.slane %v3169_v52, 4  ;;  %v3109_v60 = vrot.slane %v3841_v56, 5 }
 0x235   : > { %2231 = vst.msk [vmem:[#allocation2 + $0x7c] sm:$0xf] %vm2199_vm11, %v2166_v7  ;;  %2910 = vrot.lane.b32.xlu2 %v2799_v12, %s4013_s24  ;;  %v2739_v7 = vshrl.u32 %v3815_v1, 16  ;;  %v3117_v12 = vsel %vm4251_vm5, %v3115_v63, %v3116_v0  ;;  %v2556_v13 = vshll.u32 %v3792_v3, 16  ;;  %v2560_v14 = vshrl.u32 %v3792_v3, 16 }
 0x236   : > { %v3817_v52 = vld [vmem:[%s4050_s17 + $0xa4] sm:$0x1]  ;;  %v3789_v63 = vld [vmem:[%s4050_s17 + $0x34] sm:$0xf]  ;;  %v3864_v1 = vld [vmem:[%s4050_s17 + $0xa0] sm:$0xf] }
 0x237   : > { %v2312_v27 = vpop.permute.xlu2 %2311  ;;  %v2741_v16 = vrot.slane %v2739_v7, 4  ;;  %v5274_v21 = vrot.slane %v2556_v13, 5  ;;  %v2562_v22 = vrot.slane %v2560_v14, 4  ;;  %v2532_v8 = vshll.u32 %v3789_v63, 16  ;;  %v3836_v56 = vld [vmem:[%s4050_s17 + $0x30] sm:$0xe] }
 0x238   : > { %2401 = vst.msk [vmem:[#allocation2 + $0x1c] sm:$0xf] %vm2393_vm12, %v2312_v27  ;;  %v2547_v27 = vshrl.u32 %v3791_v19, 16  ;;  %v3162_v13 = vrot.slane %v3864_v1, 5 }
 0x239   : > { %3249 = vrot.lane.b32.xlu1 %v3180_v11, %s4014_s25  ;;  %v3842_v11 = vld [vmem:[%s4050_s17 + $0x48] sm:$0xe]  ;;  %v2745_v30 = vor.u32 %v2744_v17, %v2741_v16  ;;  %v3865_v16 = vld [vmem:[%s4050_s17 + $0xa4] sm:$0x1] }
 0x23a   : > { %3247 = vrot.lane.b32.xlu0 %v3177_v18, %s4014_s25  ;;  %v3882_v15 = vrot.slane %v3842_v11, 9  ;;  %v2536_v11 = vshrl.u32 %v3789_v63, 16 }
 0x23b   : > { %v2304_v29 = vpop.permute.xlu1 %2303  ;;  %v2746_v42 = vrot.slane %v2745_v30, 4  ;;  %v3770_v30 = vld [vmem:[%s4050_s17 + $0x90] sm:$0xf] }
 0x23c   : > { %2397 = vst.msk [vmem:[#allocation2 + $0xc] sm:$0xf] %vm2393_vm12, %v2304_v29  ;;  %v2302_v34 = vpop.permute.xlu0 %2301  ;;  %v3114_v26 = vsel %vm4251_vm5, %v3882_v15, %v3113_v57  ;;  %v2550_v29 = vshll.u32 %v3791_v19, 16  ;;  %v3790_v19 = vld [vmem:[%s4050_s17 + $0x38] sm:$0x1]  ;;  %v2538_v20 = vrot.slane %v2536_v11, 4 }
 0x23d   : > { %2396 = vst.msk [vmem:[#allocation2 + $0x8] sm:$0xf] %vm2393_vm12, %v2302_v34  ;;  %3217 = vrot.lane.b32.xlu2 %v3124_v38, %s4014_s25  ;;  %v3868_v34 = vld [vmem:[%s4050_s17 + $0xb0] sm:$0x1]  ;;  %v2563_v38 = vor.u32 %v2562_v22, %v5274_v21  ;;  %v2751_v31 = vsel %vm4061_vm2, %v2746_v42, %v2750_v43  ;;  %v2542_v32 = vshll.u32 %v3790_v19, 16 }
 0x23e   : > { %v3172_v36 = vrot.slane %v3868_v34, 5  ;;  %v2552_v41 = vrot.slane %v2550_v29, 5  ;;  %v3813_v29 = vld [vmem:[%s4050_s17 + $0x94] sm:$0xf]  ;;  %v3862_v19 = vld [vmem:[%s4050_s17 + $0x98] sm:$0x1] }
 0x23f   : > { %v2318_v45 = vpop.permute.xlu2 %2317  ;;  %v2564_v46 = vrot.slane %v2563_v38, 4  ;;  %v2724_v38 = vshll.u32 %v3813_v29, 16 }
 0x240   : > { %2404 = vst.msk [vmem:[#allocation2 + $0x28] sm:$0xf] %vm2393_vm12, %v2318_v45 }
 0x241   : > { %2874 = vrot.lane.b32.xlu1 %v2583_v39, %s4013_s24  ;;  %v2566_v39 = vshll.u32 %v3793_v24, 16  ;;  %v3165_v24 = vrot.slane %v3865_v16, 5 }
 0x242   : > { %2347 = vrot.lane.b32.xlu0 %v3775_v40, %s4012_s23  ;;  %v2549_v40 = vrot.slane %v2547_v27, 4 }
 0x243   : > { %v2310_v10 = vpop.permute.xlu1 %2309 }
 0x244   : > { %2400 = vst.msk [vmem:[#allocation2 + $0x18] sm:$0xf] %vm2393_vm12, %v2310_v10  ;;  %v2308_v48 = vpop.permute.xlu0 %2307  ;;  %v2568_v10 = vrot.slane %v2566_v39, 5  ;;  %v2553_v53 = vor.u32 %v2552_v41, %v2549_v40  ;;  %v2728_v39 = vshrl.u32 %v3813_v29, 16 }
 0x245   : > { %2399 = vst.msk [vmem:[#allocation2 + $0x14] sm:$0xf] %vm2393_vm12, %v2308_v48  ;;  %2345 = vrot.lane.b32.xlu2 %v3774_v51, %s4012_s23  ;;  %v3173_v51 = vsel %vm4251_vm5, %v3171_v28, %v3172_v36  ;;  %v3863_v28 = vld [vmem:[%s4050_s17 + $0x9c] sm:$0xe] }
 0x246   : > { %v2554_v57 = vrot.slane %v2553_v53, 4  ;;  %v3889_v41 = vrot.slane %v3863_v28, 9 }
 0x247   : > { %v2324_v62 = vpop.permute.xlu2 %2323 }
 0x248   : > { %2407 = vst.msk [vmem:[#allocation2 + $0x34] sm:$0xf] %vm2393_vm12, %v2324_v62  ;;  %v2559_v3 = vsel %vm4061_vm2, %v2554_v57, %v5274_v21  ;;  %v3163_v53 = vsel %vm4251_vm5, %v3889_v41, %v3162_v13  ;;  %v3838_v41 = vld [vmem:[%s4050_s17 + $0x38] sm:$0x1] }
 0x249   : > { %2908 = vrot.lane.b32.xlu1 %v2785_v55, %s4013_s24  ;;  %v3106_v55 = vrot.slane %v3840_v47, 5 }
 0x24a   : > { %2906 = vrot.lane.b32.xlu0 %v2775_v35, %s4013_s24  ;;  %v2569_v35 = vsel %vm4061_vm2, %v2564_v46, %v2568_v10  ;;  %v3812_v10 = vld [vmem:[%s4050_s17 + $0x90] sm:$0xf] }
 0x24b   : > { %v2316_v54 = vpop.permute.xlu1 %2315  ;;  %v3108_v59 = vrot.slane %v3106_v55, 4 }
 0x24c   : > { %2403 = vst.msk [vmem:[#allocation2 + $0x24] sm:$0xf] %vm2393_vm12, %v2316_v54  ;;  %v2314_v2 = vpop.permute.xlu0 %2313  ;;  %v3881_v54 = vrot.slane %v3839_v49, 9  ;;  %v5349_v49 = vld [vmem:[%s4050_s17 + $0x34] sm:$0xf] }
 0x24d   : > { %2402 = vst.msk [vmem:[#allocation2 + $0x20] sm:$0xf] %vm2393_vm12, %v2314_v2  ;;  %2876 = vrot.lane.b32.xlu2 %v2593_v4, %s4013_s24  ;;  %v3788_v2 = vld [vmem:[%s4050_s17 + $0x30] sm:$0xf]  ;;  %v2755_v4 = vor.u32 %v2754_v33, %v2750_v43  ;;  %v3110_v7 = vsel %vm4251_vm5, %v3108_v59, %v3109_v60  ;;  %v2544_v43 = vrot.slane %v2542_v32, 5  ;;  %v3880_v60 = vrot.slane %v3836_v56, 9 }
 0x24e   : > { %v2523_v14 = vshrl.u32 %v3788_v2, 16  ;;  %v2526_v15 = vshll.u32 %v3788_v2, 16 }
 0x24f   : > { %v2358_v18 = vpop.permute.xlu2 %2357  ;;  %v2756_v17 = vrot.slane %v2755_v4, 4  ;;  %v3785_v4 = vld [vmem:[%s4050_s17 + $0x24] sm:$0xf] }
 0x250   : > { %2424 = vst.msk [vmem:[#allocation2 + $0x78] sm:$0xf] %vm2393_vm12, %v2358_v18  ;;  %v2528_v27 = vrot.slane %v2526_v15, 5  ;;  %v2499_v16 = vshrl.u32 %v3785_v4, 16 }
 0x251   : > { %3243 = vrot.lane.b32.xlu1 %v3170_v6, %s4014_s25  ;;  %v2758_v6 = vshll.u32 %v3817_v52, 16 }
 0x252   : > { %3213 = vrot.lane.b32.xlu0 %v3117_v12, %s4014_s25  ;;  %v3107_v12 = vsel %vm4251_vm5, %v3881_v54, %v3106_v55  ;;  %v2718_v55 = vshll.u32 %v3812_v10, 16 }
 0x253   : > { %v2322_v5 = vpop.permute.xlu1 %2321  ;;  %v2760_v18 = vrot.slane %v2758_v6, 5 }
 0x254   : > { %2406 = vst.msk [vmem:[#allocation2 + $0x30] sm:$0xf] %vm2393_vm12, %v2322_v5  ;;  %v2320_v23 = vpop.permute.xlu0 %2319  ;;  %v2534_v5 = vrot.slane %v2532_v8, 5 }
 0x255   : > { %2405 = vst.msk [vmem:[#allocation2 + $0x2c] sm:$0xf] %vm2393_vm12, %v2320_v23  ;;  %3211 = vrot.lane.b32.xlu2 %v3114_v26, %s4014_s25  ;;  %v3164_v23 = vrot.slane %v3162_v13, 4  ;;  %v2525_v26 = vrot.slane %v2523_v14, 4  ;;  %v2761_v34 = vsel %vm4061_vm2, %v2756_v17, %v2760_v18  ;;  %v2502_v17 = vshll.u32 %v3785_v4, 16 }
 0x257   : > { %v2889_v44 = vpop.permute.xlu2 %2888  ;;  %v3166_v36 = vsel %vm4251_vm5, %v3164_v23, %v3165_v24  ;;  %v2529_v40 = vor.u32 %v2528_v27, %v2525_v26  ;;  %v3786_v23 = vld [vmem:[%s4050_s17 + $0x28] sm:$0xf]  ;;  %v2501_v24 = vrot.slane %v2499_v16, 4  ;;  %v2504_v26 = vrot.slane %v2502_v17, 5  ;;  %v3857_v16 = vld [vmem:[%s4050_s17 + $0x84] sm:$0xe] }
 0x258   : > { %v3858_v17 = vld [vmem:[%s4050_s17 + $0x88] sm:$0xf] }
 0x259   : > { %2343 = vrot.lane.b32.xlu1 %v3773_v9, %s4012_s23  ;;  %v2505_v28 = vor.u32 %v2504_v26, %v2501_v24  ;;  %v3806_v24 = vld [vmem:[%s4050_s17 + $0x78] sm:$0xf] }
 0x25a   : > { %2341 = vrot.lane.b32.xlu0 %v3772_v37, %s4012_s23  ;;  %v2539_v37 = vor.u32 %v2538_v20, %v2534_v5 }
 0x25b   : > { %v2328_v45 = vpop.permute.xlu1 %2327 }
 0x25c   : > { %2409 = vst.msk [vmem:[#allocation2 + $0x3c] sm:$0xf] %vm2393_vm12, %v2328_v45  ;;  %v2326_v48 = vpop.permute.xlu0 %2325  ;;  %v2540_v42 = vrot.slane %v2539_v37, 4  ;;  %v2730_v45 = vrot.slane %v2728_v39, 4  ;;  %v2508_v37 = vshll.u32 %v3786_v23, 16 }
 0x25d   : > { %2408 = vst.msk [vmem:[#allocation2 + $0x38] sm:$0xf] %vm2393_vm12, %v2326_v48  ;;  %3245 = vrot.lane.b32.xlu2 %v3173_v51, %s4014_s25  ;;  %v2530_v48 = vrot.slane %v2529_v40, 4  ;;  %v3814_v51 = vld [vmem:[%s4050_s17 + $0x98] sm:$0x1] }
 0x25e   : > { %2970 = vst.msk [vmem:[#allocation2 + $0x3c] sm:$0xf] %vm2954_vm13, %v2889_v44  ;;  %v5336_v44 = vrot.slane %v2724_v38, 5  ;;  %v2734_v59 = vshll.u32 %v3814_v51, 16 }
 0x25f   : > { %v3224_v61 = vpop.permute.xlu2 %3223  ;;  %v2535_v33 = vsel %vm4061_vm2, %v2530_v48, %v2534_v5  ;;  %v3860_v5 = vld [vmem:[%s4050_s17 + $0x90] sm:$0xe] }
 0x260   : > { %v2731_v57 = vor.u32 %v2730_v45, %v5336_v44  ;;  %v2736_v1 = vrot.slane %v2734_v59, 5 }
 0x261   : > { %2902 = vrot.lane.b32.xlu1 %v2751_v31, %s4013_s24  ;;  %v2715_v31 = vshrl.u32 %v3812_v10, 16  ;;  %v2506_v10 = vrot.slane %v2505_v28, 4  ;;  %v2670_v28 = vshll.u32 %v3806_v24, 16 }
 0x262   : > { %2872 = vrot.lane.b32.xlu0 %v2569_v35, %s4013_s24  ;;  %v2545_v35 = vsel %vm4061_vm2, %v2540_v42, %v2544_v43  ;;  %v2732_v54 = vrot.slane %v2731_v57, 4 }
 0x263   : > { %v2887_v62 = vpop.permute.xlu1 %2886  ;;  %v2717_v52 = vrot.slane %v2715_v31, 4  ;;  %v3811_v31 = vld [vmem:[%s4050_s17 + $0x8c] sm:$0x1] }
 0x264   : > { %2969 = vst.msk [vmem:[#allocation2 + $0x38] sm:$0xf] %vm2954_vm13, %v2887_v62  ;;  %v2360_v0 = vpop.permute.xlu0 %2359  ;;  %v2720_v62 = vrot.slane %v2718_v55, 5  ;;  %v2737_v18 = vsel %vm4061_vm2, %v2732_v54, %v2736_v1  ;;  %v3787_v1 = vld [vmem:[%s4050_s17 + $0x2c] sm:$0x1] }
 0x265   : > { %2425 = vst.msk [vmem:[#allocation2 + $0x7c] sm:$0xf] %vm2393_vm12, %v2360_v0  ;;  %2870 = vrot.lane.b32.xlu2 %v2559_v3, %s4013_s24  ;;  %v3861_v3 = vld [vmem:[%s4050_s17 + $0x94] sm:$0xf] }
 0x266   : > { %3306 = vst.msk [vmem:[#allocation2 + $0x38] sm:$0xf] %vm3291_vm14, %v3224_v61  ;;  %v3099_v61 = vrot.slane %v5349_v49, 5  ;;  %v2721_v13 = vor.u32 %v2720_v62, %v2717_v52  ;;  %v3155_v15 = vrot.slane %v3861_v3, 5  ;;  %v2512_v49 = vshrl.u32 %v3786_v23, 16 }
 0x267   : > { %v3258_v21 = vpop.permute.xlu2 %3257 }
 0x268   : > { %v3100_v8 = vsel %vm4251_vm5, %v3880_v60, %v3099_v61  ;;  %v2722_v20 = vrot.slane %v2721_v13, 4  ;;  %v2710_v60 = vshll.u32 %v3811_v31, 16  ;;  %v2514_v62 = vrot.slane %v2512_v49, 4  ;;  %v3767_v49 = vld [vmem:[%s4050_s17 + $0x7c] sm:$0xf] }
 0x269   : > { %3209 = vrot.lane.b32.xlu1 %v3110_v7, %s4014_s25 }
 0x26a   : > { %3207 = vrot.lane.b32.xlu0 %v3107_v12, %s4014_s25  ;;  %v3771_v12 = vld [vmem:[%s4050_s17 + $0x94] sm:$0xf]  ;;  %v2727_v38 = vsel %vm4061_vm2, %v2722_v20, %v5336_v44  ;;  %v3101_v44 = vrot.slane %v3099_v61, 4  ;;  %v3769_v61 = vld [vmem:[%s4050_s17 + $0x88] sm:$0xf] }
 0x26b   : > { %v2921_v22 = vpop.permute.xlu1 %2920 }
 0x26c   : > { %2986 = vst.msk [vmem:[#allocation2 + $0x7c] sm:$0xf] %vm2954_vm13, %v2921_v22  ;;  %v2919_v9 = vpop.permute.xlu0 %2918  ;;  %v3158_v22 = vrot.slane %v3862_v19, 5  ;;  %v3835_v19 = vld [vmem:[%s4050_s17 + $0x2c] sm:$0x1] }
 0x26d   : > { %2985 = vst.msk [vmem:[#allocation2 + $0x78] sm:$0xf] %vm2954_vm13, %v2919_v9  ;;  %2904 = vrot.lane.b32.xlu2 %v2761_v34, %s4013_s24  ;;  %v3888_v9 = vrot.slane %v3860_v5, 9  ;;  %v3809_v34 = vld [vmem:[%s4050_s17 + $0x84] sm:$0xf] }
 0x26e   : > { %3323 = vst.msk [vmem:[#allocation2 + $0x7c] sm:$0xf] %vm3291_vm14, %v3258_v21  ;;  %v3157_v21 = vrot.slane %v3155_v15, 4  ;;  %v2691_v43 = vshrl.u32 %v3809_v34, 16  ;;  %v2694_v45 = vshll.u32 %v3809_v34, 16 }
 0x26f   : > { %v2883_v46 = vpop.permute.xlu2 %2882  ;;  %v3156_v42 = vsel %vm4251_vm5, %v3888_v9, %v3155_v15 }
 0x270   : > { %2967 = vst.msk [vmem:[#allocation2 + $0x30] sm:$0xf] %vm2954_vm13, %v2883_v46  ;;  %v3159_v39 = vsel %vm4251_vm5, %v3157_v21, %v3158_v22  ;;  %v3102_v46 = vrot.slane %v3838_v41, 5  ;;  %v2693_v55 = vrot.slane %v2691_v43, 4  ;;  %v3887_v21 = vrot.slane %v3857_v16, 9 }
 0x271   : > { %2337 = vrot.lane.b32.xlu1 %v3770_v30, %s4012_s23  ;;  %v3810_v30 = vld [vmem:[%s4050_s17 + $0x88] sm:$0xf]  ;;  %v3148_v22 = vrot.slane %v3858_v17, 5 }
 0x272   : > { %3241 = vrot.lane.b32.xlu0 %v3166_v36, %s4014_s25  ;;  %v2700_v36 = vshll.u32 %v3810_v30, 16  ;;  %v2704_v40 = vshrl.u32 %v3810_v30, 16  ;;  %v3103_v57 = vsel %vm4251_vm5, %v3101_v44, %v3102_v46  ;;  %v2672_v46 = vrot.slane %v2670_v28, 5 }
 0x273   : > { %v3256_v47 = vpop.permute.xlu1 %3255 }
 0x274   : > { %3322 = vst.msk [vmem:[#allocation2 + $0x78] sm:$0xf] %vm3291_vm14, %v3256_v47  ;;  %v3226_v50 = vpop.permute.xlu0 %3225  ;;  %v2510_v47 = vrot.slane %v2508_v37, 5  ;;  %v2702_v48 = vrot.slane %v2700_v36, 5  ;;  %v2667_v37 = vshrl.u32 %v3806_v24, 16 }
 0x275   : > { %3307 = vst.msk [vmem:[#allocation2 + $0x3c] sm:$0xf] %vm3291_vm14, %v3226_v50  ;;  %3239 = vrot.lane.b32.xlu2 %v3163_v53, %s4014_s25  ;;  %v2706_v50 = vrot.slane %v2704_v40, 4  ;;  %v3833_v36 = vld [vmem:[%s4050_s17 + $0x24] sm:$0xe] }
 0x276   : > { %v3879_v43 = vrot.slane %v3833_v36, 9  ;;  %v2669_v44 = vrot.slane %v2667_v37, 4 }
 0x277   : > { %v2917_v63 = vpop.permute.xlu2 %2916  ;;  %v2707_v59 = vor.u32 %v2706_v50, %v2702_v48  ;;  %v3784_v50 = vld [vmem:[%s4050_s17 + $0x20] sm:$0x1] }
 0x279   : > { %2868 = vrot.lane.b32.xlu1 %v2545_v35, %s4013_s24  ;;  %v2696_v35 = vrot.slane %v2694_v45, 5  ;;  %v2708_v54 = vrot.slane %v2707_v59, 4  ;;  %v3807_v45 = vld [vmem:[%s4050_s17 + $0x7c] sm:$0xf]  ;;  %v2494_v59 = vshll.u32 %v3784_v50, 16 }
 0x27a   : > { %2866 = vrot.lane.b32.xlu0 %v2535_v33, %s4013_s24  ;;  %v2511_v33 = vsel %vm4061_vm2, %v2506_v10, %v2510_v47 }
 0x27b   : > { %v2356_v0 = vpop.permute.xlu1 %2355  ;;  %v3978_v2 = vld [vmem:[#allocation2 + $0x78] sm:$0xff]  ;;  %v2697_v52 = vor.u32 %v2696_v35, %v2693_v55 }
 0x27c   : > { %2423 = vst.msk [vmem:[#allocation2 + $0x74] sm:$0xf] %vm2393_vm12, %v2356_v0  ;;  %v2354_v6 = vpop.permute.xlu0 %2353  ;;  %v3970_v7 = vld [vmem:[#allocation2 + $0x38] sm:$0xff]  ;;  %v3493_v11 = vsel %vm3443_vm15, %v3978_v2, 0 }
 0x27d   : > { %2422 = vst.msk [vmem:[#allocation2 + $0x70] sm:$0xf] %vm2393_vm12, %v2354_v6  ;;  %v3469_v14 = vsel %vm3443_vm15, %v3970_v7, 0  ;;  %3508 = vmatpush.bf16.xpose.msra.mxu1 %v3493_v11  ;;  %2339 = vrot.lane.b32.xlu2 %v3771_v12, %s4012_s23  ;;  %v2698_v3 = vrot.slane %v2697_v52, 4  ;;  %v3834_v7 = vld [vmem:[%s4050_s17 + $0x28] sm:$0xf]  ;;  %v2515_v11 = vor.u32 %v2514_v62, %v2510_v47 }
 0x27e   : > { %2984 = vst.msk [vmem:[#allocation2 + $0x74] sm:$0xf] %vm2954_vm13, %v2917_v63  ;;  %3495 = vmatpush.bf16.xpose.msra.mxu0 %v3469_v14  ;;  %v2712_v63 = vrot.slane %v2710_v60, 5  ;;  %v2518_v12 = vshll.u32 %v3787_v1, 16  ;;  %v3782_v47 = vld [vmem:[%s4050_s17 + $0x18] sm:$0xf] }
 0x27f   : > { %v3252_v27 = vpop.permute.xlu2 %3251  ;;  %v2703_v15 = vsel %vm4061_vm2, %v2698_v3, %v2702_v48  ;;  %v2516_v5 = vrot.slane %v2515_v11, 4  ;;  %v2475_v35 = vshrl.u32 %v3782_v47, 16  ;;  %v3859_v60 = vld [vmem:[%s4050_s17 + $0x8c] sm:$0x1]  ;;  %v3150_v62 = vrot.slane %v3148_v22, 4 }
 0x280   : > { %v2713_v14 = vsel %vm4061_vm2, %v2708_v54, %v2712_v63  ;;  %v2520_v20 = vrot.slane %v2518_v12, 5  ;;  %v3151_v54 = vrot.slane %v3859_v60, 5  ;;  %v2496_v3 = vrot.slane %v2494_v59, 5  ;;  %v3831_v11 = vld [vmem:[%s4050_s17 + $0x1c] sm:$0xf] }
 0x281   : > { %3203 = vrot.lane.b32.xlu1 %v3100_v8, %s4014_s25  ;;  %v3768_v8 = vld [vmem:[%s4050_s17 + $0x84] sm:$0xf]  ;;  %v2477_v63 = vrot.slane %v2475_v35, 4 }
 0x282   : > { %2900 = vrot.lane.b32.xlu0 %v2737_v18, %s4013_s24  ;;  %v3092_v18 = vrot.slane %v3834_v7, 5  ;;  %v2521_v34 = vsel %vm4061_vm2, %v2516_v5, %v2520_v20  ;;  %v3832_v5 = vld [vmem:[%s4050_s17 + $0x20] sm:$0x1]  ;;  %v3830_v20 = vld [vmem:[%s4050_s17 + $0x18] sm:$0xe] }
 0x283   : > { %v2915_v29 = vpop.permute.xlu1 %2914  ;;  %v3088_v24 = vrot.slane %v3832_v5, 5 }
 0x284   : > { %2983 = vst.msk [vmem:[#allocation2 + $0x70] sm:$0xf] %vm2954_vm13, %v2915_v29  ;;  %v2885_v32 = vpop.permute.xlu0 %2884  ;;  %v3095_v29 = vrot.slane %v3835_v19, 5  ;;  %v3093_v55 = vsel %vm4251_vm5, %v3879_v43, %v3092_v18 }
 0x285   : > { %2968 = vst.msk [vmem:[#allocation2 + $0x34] sm:$0xf] %vm2954_vm13, %v2885_v32  ;;  %2898 = vrot.lane.b32.xlu2 %v2727_v38, %s4013_s24  ;;  %v3783_v32 = vld [vmem:[%s4050_s17 + $0x1c] sm:$0xf] }
 0x286   : > { %3320 = vst.msk [vmem:[#allocation2 + $0x70] sm:$0xf] %vm3291_vm14, %v3252_v27  ;;  %v3094_v27 = vrot.slane %v3092_v18, 4  ;;  %v2484_v41 = vshll.u32 %v3783_v32, 16  ;;  %v3085_v18 = vrot.slane %v3831_v11, 5 }
 0x287   : > { %v2352_v51 = vpop.permute.xlu2 %2351 }
 0x288   : > { %2421 = vst.msk [vmem:[#allocation2 + $0x6c] sm:$0xf] %vm2393_vm12, %v2352_v51  ;;  %v3096_v40 = vsel %vm4251_vm5, %v3094_v27, %v3095_v29  ;;  %v5440_v51 = vrot.slane %v2484_v41, 5  ;;  %v3808_v27 = vld [vmem:[%s4050_s17 + $0x80] sm:$0x1] }
 0x289   : > { %3237 = vrot.lane.b32.xlu1 %v3159_v39, %s4014_s25  ;;  %v3149_v39 = vsel %vm4251_vm5, %v3887_v21, %v3148_v22 }
 0x28a   : > { %3235 = vrot.lane.b32.xlu0 %v3156_v42, %s4014_s25  ;;  %v2488_v42 = vshrl.u32 %v3783_v32, 16 }
 0x28b   : > { %v3222_v53 = vpop.permute.xlu1 %3221 }
 0x28c   : > { %3305 = vst.msk [vmem:[#allocation2 + $0x34] sm:$0xf] %vm3291_vm14, %v3222_v53  ;;  %v3220_v56 = vpop.permute.xlu0 %3219  ;;  %v2490_v53 = vrot.slane %v2488_v42, 4  ;;  %v3856_v42 = vld [vmem:[%s4050_s17 + $0x80] sm:$0x1] }
 0x28d   : > { %3304 = vst.msk [vmem:[#allocation2 + $0x30] sm:$0xf] %vm3291_vm14, %v3220_v56  ;;  %3205 = vrot.lane.b32.xlu2 %v3103_v57, %s4014_s25  ;;  %v2478_v56 = vshll.u32 %v3782_v47, 16  ;;  %v2673_v57 = vor.u32 %v2672_v46, %v2669_v44  ;;  %v3144_v47 = vrot.slane %v3856_v42, 5 }
 0x28e   : > { %v2491_v52 = vor.u32 %v2490_v53, %v5440_v51 }
 0x28f   : > { %v2911_v0 = vpop.permute.xlu2 %2910  ;;  %v2674_v1 = vrot.slane %v2673_v57, 4 }
 0x290   : > { %v2492_v7 = vrot.slane %v2491_v52, 4 }
 0x291   : > { %2862 = vrot.lane.b32.xlu1 %v2511_v33, %s4013_s24  ;;  %v2676_v33 = vshll.u32 %v3807_v45, 16 }
 0x292   : > { %2335 = vrot.lane.b32.xlu0 %v3769_v61, %s4012_s23  ;;  %v3766_v61 = vld [vmem:[%s4050_s17 + $0x78] sm:$0xf]  ;;  %v2497_v19 = vsel %vm4061_vm2, %v2492_v7, %v2496_v3 }
 0x293   : > { %v2350_v2 = vpop.permute.xlu1 %2349 }
 0x294   : > { %2420 = vst.msk [vmem:[#allocation2 + $0x68] sm:$0xf] %vm2393_vm12, %v2350_v2  ;;  %v3254_v4 = vpop.permute.xlu0 %3253  ;;  %v3969_v6 = vld [vmem:[#allocation2 + $0x30] sm:$0xff]  ;;  %v2678_v2 = vrot.slane %v2676_v33, 5 }
 0x295   : > { %3321 = vst.msk [vmem:[#allocation2 + $0x74] sm:$0xf] %vm3291_vm14, %v3254_v4  ;;  %v3466_v13 = vsel %vm3443_vm15, %v3969_v6, 0  ;;  %2333 = vrot.lane.b32.xlu2 %v3768_v8, %s4012_s23 }
 0x296   : > { %2981 = vst.msk [vmem:[#allocation2 + $0x68] sm:$0xf] %vm2954_vm13, %v2911_v0  ;;  %3496 = vmatpush.bf16.xpose.msra.mxu0 %v3466_v13  ;;  %v2480_v0 = vrot.slane %v2478_v56, 5  ;;  %v2680_v13 = vshrl.u32 %v3807_v45, 16  ;;  %v2679_v17 = vsel %vm4061_vm2, %v2674_v1, %v2678_v2 }
 0x297   : > { %v3218_v23 = vpop.permute.xlu2 %3217 }
 0x298   : > { %v2481_v16 = vor.u32 %v2480_v0, %v2477_v63  ;;  %v2682_v22 = vrot.slane %v2680_v13, 4 }
 0x299   : > { %2896 = vrot.lane.b32.xlu1 %v2713_v14, %s4013_s24 }
 0x29a   : > { %2894 = vrot.lane.b32.xlu0 %v2703_v15, %s4013_s24  ;;  %v3152_v15 = vsel %vm4251_vm5, %v3150_v62, %v3151_v54  ;;  %v2482_v21 = vrot.slane %v2481_v16, 4 }
 0x29b   : > { %v2881_v26 = vpop.permute.xlu1 %2880 }
 0x29c   : > { %2966 = vst.msk [vmem:[#allocation2 + $0x2c] sm:$0xf] %vm2954_vm13, %v2881_v26  ;;  %v2879_v9 = vpop.permute.xlu0 %2878  ;;  %v3977_v30 = vld [vmem:[#allocation2 + $0x70] sm:$0xff]  ;;  %v2487_v37 = vsel %vm4061_vm2, %v2482_v21, %v5440_v51  ;;  %v3854_v51 = vld [vmem:[%s4050_s17 + $0x78] sm:$0xe] }
 0x29d   : > { %2965 = vst.msk [vmem:[#allocation2 + $0x28] sm:$0xf] %vm2954_vm13, %v2879_v9  ;;  %v3490_v38 = vsel %vm3443_vm15, %v3977_v30, 0  ;;  %2864 = vrot.lane.b32.xlu2 %v2521_v34, %s4013_s24  ;;  %v3878_v9 = vrot.slane %v3830_v20, 9  ;;  %v3855_v34 = vld [vmem:[%s4050_s17 + $0x7c] sm:$0xf] }
 0x29e   : > { %3303 = vst.msk [vmem:[#allocation2 + $0x2c] sm:$0xf] %vm3291_vm14, %v3218_v23  ;;  %3509 = vmatpush.bf16.xpose.msra.mxu1 %v3490_v38  ;;  %v3087_v23 = vrot.slane %v3085_v18, 4  ;;  %v2683_v38 = vor.u32 %v2682_v22, %v2678_v2  ;;  %v3141_v41 = vrot.slane %v3855_v34, 5 }
 0x29f   : > { %v2346_v10 = vpop.permute.xlu2 %2345 }
 0x2a0   : > { %2418 = vst.msk [vmem:[#allocation2 + $0x60] sm:$0xf] %vm2393_vm12, %v2346_v10  ;;  %v3089_v36 = vsel %vm4251_vm5, %v3087_v23, %v3088_v24  ;;  %v2684_v43 = vrot.slane %v2683_v38, 4  ;;  %v3143_v10 = vrot.slane %v3141_v41, 4 }
 0x2a1   : > { %3231 = vrot.lane.b32.xlu1 %v3149_v39, %s4014_s25  ;;  %v2686_v39 = vshll.u32 %v3808_v27, 16 }
 0x2a2   : > { %3201 = vrot.lane.b32.xlu0 %v3096_v40, %s4014_s25  ;;  %v3086_v40 = vsel %vm4251_vm5, %v3878_v9, %v3085_v18  ;;  %v3145_v53 = vsel %vm4251_vm5, %v3143_v10, %v3144_v47  ;;  %v4015_v10 = vmov 0  }
 0x2a3   : > { %v3216_v48 = vpop.permute.xlu1 %3215  ;;  %v2688_v45 = vrot.slane %v2686_v39, 5  ;;  %3997 = vset.pattern.permute.xlu1 %v4015_v10  ;;  %3998 = vset.pattern.permute.xlu0 %v4015_v10 }
 0x2a4   : > { %3302 = vst.msk [vmem:[#allocation2 + $0x28] sm:$0xf] %vm3291_vm14, %v3216_v48  ;;  %v2913_v31 = vpop.permute.xlu0 %2912 }
 0x2a5   : > { %2982 = vst.msk [vmem:[#allocation2 + $0x6c] sm:$0xf] %vm2954_vm13, %v2913_v31  ;;  %3199 = vrot.lane.b32.xlu2 %v3093_v55, %s4014_s25  ;;  %v2689_v50 = vsel %vm4061_vm2, %v2684_v43, %v2688_v45  ;;  %v3886_v31 = vrot.slane %v3854_v51, 9 }
 0x2a7   : > { %v2877_v4 = vpop.permute.xlu2 %2876  ;;  %v3142_v25 = vsel %vm4251_vm5, %v3886_v31, %v3141_v41  ;;  %v3324_v31 = vld [vmem:[%s5568_s1] sm:$0xf] }
 0x2a8   : > { %2964 = vst.msk [vmem:[#allocation2 + $0x24] sm:$0xf] %vm2954_vm13, %v2877_v4 }
 0x2a9   : > { %2331 = vrot.lane.b32.xlu1 %v3767_v49, %s4012_s23 }
 0x2aa   : > { %2329 = vrot.lane.b32.xlu0 %v3766_v61, %s4012_s23 }
 0x2ab   : > { %v3250_v6 = vpop.permute.xlu1 %3249  ;;  %v3968_v8 = vld [vmem:[#allocation2 + $0x28] sm:$0xff] }
 0x2ac   : > { %3319 = vst.msk [vmem:[#allocation2 + $0x6c] sm:$0xf] %vm3291_vm14, %v3250_v6  ;;  %v3248_v12 = vpop.permute.xlu0 %3247  ;;  %v3463_v14 = vsel %vm3443_vm15, %v3968_v8, 0 }
 0x2ad   : > { %3318 = vst.msk [vmem:[#allocation2 + $0x68] sm:$0xf] %vm3291_vm14, %v3248_v12  ;;  %3497 = vmatpush.bf16.xpose.msra.mxu0 %v3463_v14  ;;  %3233 = vrot.lane.b32.xlu2 %v3152_v15, %s4014_s25 }
 0x2af   : > { %v3212_v26 = vpop.permute.xlu2 %3211 }
 0x2b1   : > { %2890 = vrot.lane.b32.xlu1 %v2679_v17, %s4013_s24 }
 0x2b2   : > { %2860 = vrot.lane.b32.xlu0 %v2497_v19, %s4013_s24 }
 0x2b3   : > { %v2875_v29 = vpop.permute.xlu1 %2874 }
 0x2b4   : > { %2963 = vst.msk [vmem:[#allocation2 + $0x20] sm:$0xf] %vm2954_vm13, %v2875_v29  ;;  %v2348_v30 = vpop.permute.xlu0 %2347  ;;  %v3976_v32 = vld [vmem:[#allocation2 + $0x68] sm:$0xff] }
 0x2b5   : > { %2419 = vst.msk [vmem:[#allocation2 + $0x64] sm:$0xf] %vm2393_vm12, %v2348_v30  ;;  %v3487_v28 = vsel %vm3443_vm15, %v3976_v32, 0  ;;  %2858 = vrot.lane.b32.xlu2 %v2487_v37, %s4013_s24 }
 0x2b6   : > { %3300 = vst.msk [vmem:[#allocation2 + $0x20] sm:$0xf] %vm3291_vm14, %v3212_v26  ;;  %3510 = vmatpush.bf16.xpose.msra.mxu1 %v3487_v28 }
 0x2b7   : > { %v3246_v44 = vpop.permute.xlu2 %3245 }
 0x2b9   : > { %3197 = vrot.lane.b32.xlu1 %v3089_v36, %s4014_s25 }
 0x2ba   : > { %3195 = vrot.lane.b32.xlu0 %v3086_v40, %s4014_s25 }
 0x2bb   : > { %v2909_v46 = vpop.permute.xlu1 %2908 }
 0x2bc   : > { %2980 = vst.msk [vmem:[#allocation2 + $0x64] sm:$0xf] %vm2954_vm13, %v2909_v46  ;;  %v2907_v48 = vpop.permute.xlu0 %2906  ;;  %v3357_v46 = vld [vmem:[%s5569_s2] sm:$0xff] }
 0x2bd   : > { %2979 = vst.msk [vmem:[#allocation2 + $0x60] sm:$0xf] %vm2954_vm13, %v2907_v48  ;;  %2892 = vrot.lane.b32.xlu2 %v2689_v50, %s4013_s24 }
 0x2be   : > { %3317 = vst.msk [vmem:[#allocation2 + $0x64] sm:$0xf] %vm3291_vm14, %v3246_v44 }
 0x2bf   : > { %v2871_v55 = vpop.permute.xlu2 %2870 }
 0x2c0   : > { %2961 = vst.msk [vmem:[#allocation2 + $0x18] sm:$0xf] %vm2954_vm13, %v2871_v55 }
 0x2c1   : > { %3360 = vperm.xlu1 %3997, %v3357_v46  }
 0x2c2   : > { %3229 = vrot.lane.b32.xlu0 %v3145_v53, %s4014_s25 }
 0x2c3   : > { %v3244_v35 = vpop.permute.xlu1 %3243 }
 0x2c4   : > { %3316 = vst.msk [vmem:[#allocation2 + $0x60] sm:$0xf] %vm3291_vm14, %v3244_v35  ;;  %v3214_v56 = vpop.permute.xlu0 %3213 }
 0x2c5   : > { %3301 = vst.msk [vmem:[#allocation2 + $0x24] sm:$0xf] %vm3291_vm14, %v3214_v56  ;;  %3227 = vrot.lane.b32.xlu2 %v3142_v25, %s4014_s25 }
 0x2c7   : > { %v2905_v49 = vpop.permute.xlu2 %2904 }
 0x2cb   : > { %v2344_v57 = vpop.permute.xlu1 %2343  ;;  %v3975_v33 = vld [vmem:[#allocation2 + $0x60] sm:$0xff] }
 0x2cc   : > { %2417 = vst.msk [vmem:[#allocation2 + $0x5c] sm:$0xf] %vm2393_vm12, %v2344_v57  ;;  %v2342_v59 = vpop.permute.xlu0 %2341  ;;  %v3967_v60 = vld [vmem:[#allocation2 + $0x20] sm:$0xff]  ;;  %v3484_v61 = vsel %vm3443_vm15, %v3975_v33, 0 }
 0x2cd   : > { %2416 = vst.msk [vmem:[#allocation2 + $0x58] sm:$0xf] %vm2393_vm12, %v2342_v59  ;;  %v3460_v52 = vsel %vm3443_vm15, %v3967_v60, 0  ;;  %3511 = vmatpush.bf16.xpose.msra.mxu1 %v3484_v61 }
 0x2ce   : > { %2978 = vst.msk [vmem:[#allocation2 + $0x5c] sm:$0xf] %vm2954_vm13, %v2905_v49  ;;  %3498 = vmatpush.bf16.xpose.msra.mxu0 %v3460_v52 }
 0x2cf   : > { %v3240_v58 = vpop.permute.xlu2 %3239 }
 0x2d3   : > { %v2903_v62 = vpop.permute.xlu1 %2902 }
 0x2d4   : > { %2977 = vst.msk [vmem:[#allocation2 + $0x58] sm:$0xf] %vm2954_vm13, %v2903_v62  ;;  %v2873_v54 = vpop.permute.xlu0 %2872 }
 0x2d5   : > { %2962 = vst.msk [vmem:[#allocation2 + $0x1c] sm:$0xf] %vm2954_vm13, %v2873_v54 }
 0x2d6   : > { %3314 = vst.msk [vmem:[#allocation2 + $0x58] sm:$0xf] %vm3291_vm14, %v3240_v58 }
 0x2d7   : > { %v2340_v63 = vpop.permute.xlu2 %2339 }
 0x2d8   : > { %2415 = vst.msk [vmem:[#allocation2 + $0x54] sm:$0xf] %vm2393_vm12, %v2340_v63 }
 0x2db   : > { %v3210_v0 = vpop.permute.xlu1 %3209 }
 0x2dc   : > { %3299 = vst.msk [vmem:[#allocation2 + $0x1c] sm:$0xf] %vm3291_vm14, %v3210_v0  ;;  %v3208_v1 = vpop.permute.xlu0 %3207 }
 0x2dd   : > { %3298 = vst.msk [vmem:[#allocation2 + $0x18] sm:$0xf] %vm3291_vm14, %v3208_v1 }
 0x2df   : > { %v2899_v2 = vpop.permute.xlu2 %2898 }
 0x2e3   : > { %v2338_v3 = vpop.permute.xlu1 %2337 }
 0x2e4   : > { %2414 = vst.msk [vmem:[#allocation2 + $0x50] sm:$0xf] %vm2393_vm12, %v2338_v3  ;;  %v3242_v4 = vpop.permute.xlu0 %3241  ;;  %v3966_v6 = vld [vmem:[#allocation2 + $0x18] sm:$0xff] }
 0x2e5   : > { %3315 = vst.msk [vmem:[#allocation2 + $0x5c] sm:$0xf] %vm3291_vm14, %v3242_v4  ;;  %v3457_v7 = vsel %vm3443_vm15, %v3966_v6, 0 }
 0x2e6   : > { %2975 = vst.msk [vmem:[#allocation2 + $0x50] sm:$0xf] %vm2954_vm13, %v2899_v2  ;;  %3499 = vmatpush.bf16.xpose.msra.mxu0 %v3457_v7 }
 0x2e7   : > { %v3206_v8 = vpop.permute.xlu2 %3205 }
 0x2eb   : > { %v2869_v11 = vpop.permute.xlu1 %2868 }
 0x2ec   : > { %2960 = vst.msk [vmem:[#allocation2 + $0x14] sm:$0xf] %vm2954_vm13, %v2869_v11  ;;  %v2867_v12 = vpop.permute.xlu0 %2866  ;;  %v3974_v13 = vld [vmem:[#allocation2 + $0x58] sm:$0xff] }
 0x2ed   : > { %2959 = vst.msk [vmem:[#allocation2 + $0x10] sm:$0xf] %vm2954_vm13, %v2867_v12  ;;  %v3481_v14 = vsel %vm3443_vm15, %v3974_v13, 0 }
 0x2ee   : > { %3297 = vst.msk [vmem:[#allocation2 + $0x14] sm:$0xf] %vm3291_vm14, %v3206_v8  ;;  %3512 = vmatpush.bf16.xpose.msra.mxu1 %v3481_v14 }
 0x2ef   : > { %v2334_v15 = vpop.permute.xlu2 %2333 }
 0x2f0   : > { %2412 = vst.msk [vmem:[#allocation2 + $0x48] sm:$0xf] %vm2393_vm12, %v2334_v15 }
 0x2f3   : > { %v3204_v16 = vpop.permute.xlu1 %3203 }
 0x2f4   : > { %3296 = vst.msk [vmem:[#allocation2 + $0x10] sm:$0xf] %vm3291_vm14, %v3204_v16  ;;  %v2901_v17 = vpop.permute.xlu0 %2900 }
 0x2f5   : > { %2976 = vst.msk [vmem:[#allocation2 + $0x54] sm:$0xf] %vm2954_vm13, %v2901_v17 }
 0x2f7   : > { %v2865_v18 = vpop.permute.xlu2 %2864 }
 0x2f8   : > { %2958 = vst.msk [vmem:[#allocation2 + $0xc] sm:$0xf] %vm2954_vm13, %v2865_v18 }
 0x2fb   : > { %v3238_v19 = vpop.permute.xlu1 %3237  ;;  %v3965_v5 = vld [vmem:[#allocation2 + $0x10] sm:$0xff] }
 0x2fc   : > { %3313 = vst.msk [vmem:[#allocation2 + $0x54] sm:$0xf] %vm3291_vm14, %v3238_v19  ;;  %v3236_v20 = vpop.permute.xlu0 %3235  ;;  %v3454_v21 = vsel %vm3443_vm15, %v3965_v5, 0 }
 0x2fd   : > { %3312 = vst.msk [vmem:[#allocation2 + $0x50] sm:$0xf] %vm3291_vm14, %v3236_v20  ;;  %3500 = vmatpush.bf16.xpose.msra.mxu0 %v3454_v21 }
 0x2ff   : > { %v3200_v22 = vpop.permute.xlu2 %3199 }
 0x303   : > { %v2863_v23 = vpop.permute.xlu1 %2862 }
 0x304   : > { %2957 = vst.msk [vmem:[#allocation2 + $0x8] sm:$0xf] %vm2954_vm13, %v2863_v23  ;;  %v2336_v24 = vpop.permute.xlu0 %2335  ;;  %v3973_v26 = vld [vmem:[#allocation2 + $0x50] sm:$0xff] }
 0x305   : > { %2413 = vst.msk [vmem:[#allocation2 + $0x4c] sm:$0xf] %vm2393_vm12, %v2336_v24  ;;  %v3478_v27 = vsel %vm3443_vm15, %v3973_v26, 0 }
 0x306   : > { %3294 = vst.msk [vmem:[#allocation2 + $0x8] sm:$0xf] %vm3291_vm14, %v3200_v22  ;;  %3513 = vmatpush.bf16.xpose.msra.mxu1 %v3478_v27 }
 0x307   : > { %v3234_v29 = vpop.permute.xlu2 %3233 }
 0x30b   : > { %v2897_v9 = vpop.permute.xlu1 %2896 }
 0x30c   : > { %2974 = vst.msk [vmem:[#allocation2 + $0x4c] sm:$0xf] %vm2954_vm13, %v2897_v9  ;;  %v2895_v30 = vpop.permute.xlu0 %2894 }
 0x30d   : > { %2973 = vst.msk [vmem:[#allocation2 + $0x48] sm:$0xf] %vm2954_vm13, %v2895_v30 }
 0x30e   : > { %3311 = vst.msk [vmem:[#allocation2 + $0x4c] sm:$0xf] %vm3291_vm14, %v3234_v29 }
 0x30f   : > { %v2859_v32 = vpop.permute.xlu2 %2858 }
 0x310   : > { %2955 = vst.msk [vmem:[#allocation2] sm:$0xf] %vm2954_vm13, %v2859_v32 }
 0x313   : > { %v3232_v34 = vpop.permute.xlu1 %3231 }
 0x314   : > { %3310 = vst.msk [vmem:[#allocation2 + $0x48] sm:$0xf] %vm3291_vm14, %v3232_v34  ;;  %v3202_v37 = vpop.permute.xlu0 %3201 }
 0x315   : > { %3295 = vst.msk [vmem:[#allocation2 + $0xc] sm:$0xf] %vm3291_vm14, %v3202_v37 }
 0x317   : > { %v2893_v38 = vpop.permute.xlu2 %2892 }
 0x31b   : > { %v2332_v39 = vpop.permute.xlu1 %2331  ;;  %v3972_v28 = vld [vmem:[#allocation2 + $0x48] sm:$0xff] }
 0x31c   : > { %2411 = vst.msk [vmem:[#allocation2 + $0x44] sm:$0xf] %vm2393_vm12, %v2332_v39  ;;  %v2330_v36 = vpop.permute.xlu0 %2329  ;;  %v3964_v40 = vld [vmem:[#allocation2 + $0x8] sm:$0xff]  ;;  %v3475_v41 = vsel %vm3443_vm15, %v3972_v28, 0 }
 0x31d   : > { %2410 = vst.msk [vmem:[#allocation2 + $0x40] sm:$0xf] %vm2393_vm12, %v2330_v36  ;;  %v3451_v42 = vsel %vm3443_vm15, %v3964_v40, 0  ;;  %3514 = vmatpush.bf16.xpose.msra.mxu1 %v3475_v41 }
 0x31e   : > { %2972 = vst.msk [vmem:[#allocation2 + $0x44] sm:$0xf] %vm2954_vm13, %v2893_v38  ;;  %3501 = vmatpush.bf16.xpose.msra.mxu0 %v3451_v42 }
 0x31f   : > { %v3228_v45 = vpop.permute.xlu2 %3227 }
 0x323   : > { %v2891_v43 = vpop.permute.xlu1 %2890 }
 0x324   : > { %2971 = vst.msk [vmem:[#allocation2 + $0x40] sm:$0xf] %vm2954_vm13, %v2891_v43  ;;  %v2861_v44 = vpop.permute.xlu0 %2860 }
 0x325   : > { %2956 = vst.msk [vmem:[#allocation2 + $0x4] sm:$0xf] %vm2954_vm13, %v2861_v44 }
 0x326   : > { %3308 = vst.msk [vmem:[#allocation2 + $0x40] sm:$0xf] %vm3291_vm14, %v3228_v45 }
 0x32b   : > { %v3198_v47 = vpop.permute.xlu1 %3197 }
 0x32c   : > { %3293 = vst.msk [vmem:[#allocation2 + $0x4] sm:$0xf] %vm3291_vm14, %v3198_v47  ;;  %v3196_v48 = vpop.permute.xlu0 %3195 }
 0x32d   : > { %3292 = vst.msk [vmem:[#allocation2] sm:$0xf] %vm3291_vm14, %v3196_v48 }
 0x333   : > { %v3361_v25 = vpop.permute.xlu1 %3360 }
 0x334   : > { %v3230_v50 = vpop.permute.xlu0 %3229  ;;  %v3963_v51 = vld [vmem:[#allocation2] sm:$0xff] }
 0x335   : > { %3309 = vst.msk [vmem:[#allocation2 + $0x44] sm:$0xf] %vm3291_vm14, %v3230_v50  ;;  %v3448_v53 = vsel %vm3443_vm15, %v3963_v51, 0 }
 0x336   : > { %3502 = vmatpush.bf16.xpose.msra.mxu0 %v3448_v53 }
 0x33c   : > { %v3971_v55 = vld [vmem:[#allocation2 + $0x40] sm:$0xff] }
 0x33d   : > { %3958 = vmatmul.msk.bf16.vlgmr.msra.gmra.mxu0 %vm3443_vm15, %v3324_v31  ;;  %v3472_v35 = vsel %vm3443_vm15, %v3971_v55, 0 }
 0x33e   : > { %3515 = vmatpush.bf16.xpose.msra.mxu1 %v3472_v35 }
 0x345   : > { %3959 = vmatmul.msk.bf16.vlgmr.msra.gmra.mxu1 %vm3443_vm15, %v3324_v31 }
 0x3ba   : > { %v3504_v56 = vpop.f32.mrf.mxu0 }
 0x3bb   : > { %v3505_v49 = vadd.f32 %v3504_v56, %v3361_v25 }
 0x3bd   : > { %v3521_v57 = vmax.f32 %v3505_v49, 0.0 }
 0x3bf   : > { %v3523_v61 = vmin.f32 %v3521_v57, 6.0 }
 0x3c2   : > { %v3506_v33 = vpop.f32.mrf.mxu0  ;;  %v3517_v59 = vpop.f32.mrf.mxu1 }
 0x3c3   : > { %v3518_v60 = vadd.f32 %v3517_v59, %v3361_v25 }
 0x3c5   : > { %v3522_v52 = vmax.f32 %v3518_v60, 0.0 }
 0x3c7   : > { %v3524_v58 = vmin.f32 %v3522_v52, 6.0 }
 0x3c9   : > { %v3525_v62 = vpack.c.bf16 %v3524_v58, %v3523_v61 }
 0x3ca   : > { %v3519_v54 = vpop.f32.mrf.mxu1 }
 0x3cb   : > { %3526 = vst [vmem:[%s170_s6] sm:$0xff] %v3525_v62 }
 0x3cc PF: > { %s13_s12 = sadd.s32 1, %s4005_s12  }
 0x3cd   : > { %p10_p4 = scmp.ge.s32.totalorder %s13_s12, 4  }
 0x3cf   :  { %12 = sbr.rel (!%p10_p4) target bundleno = 1 (0x1), region = 64 }

</bundles_post_ra>
